<compile_context>
chip_gen: v5e
topology: v5e:2x2
jax: 0.10.0
libtpu: 0.0.40
codegen_flags: <defaults>
</compile_context>

<pallas_src>
import functools
import numpy as np
import jax
import jax.numpy as jnp
from jax.experimental import pallas as pl
from jax.experimental.pallas import tpu as pltpu


# ----------------------------------------------------------------------------- config / utils
_SMALL_M = 64        # <= this many rows: skip pallas, let XLA fuse (launch cost >> math)
_TILE_M_MAX = 256    # cap so grid_m >= 2 -> both v7x TensorCores get a tile


def _rup(x, m):
    return ((x + m - 1) // m) * m


# ----------------------------------------------------------------------------- Pallas kernels
def _mm_kernel(x_ref, w_ref, b_ref, o_ref, *, act):
    """One M-tile of  Y = act(X @ W + b).  X/W are bf16; accumulate + epilogue in f32."""
    acc = jnp.dot(x_ref[...], w_ref[...], preferred_element_type=jnp.float32)
    acc = acc + b_ref[...]
    if act == "sigmoid":
        acc = jax.nn.sigmoid(acc)
    o_ref[...] = acc


def _mm_kernel_prelu(x_ref, w_ref, b_ref, a_ref, o_ref):
    """Y = prelu(X @ W + b) with a per-output-column slope vector a_ref (1, Np).

    Columns whose slope is 1.0 behave as identity, which lets sibling convs with
    different epilogues (e.g. UpsampleBlock l1 [PReLU] + r1 [linear]) share one
    matmul with their weights concatenated along N.
    """
    acc = jnp.dot(x_ref[...], w_ref[...], preferred_element_type=jnp.float32)
    acc = acc + b_ref[...]
    o_ref[...] = jnp.where(acc >= 0.0, acc, a_ref[...] * acc)


@functools.lru_cache(maxsize=None)
def _matmul_call(Mp, tile_m, Kp, Np, act):
    grid_m = Mp // tile_m
    x_spec = pl.BlockSpec((tile_m, Kp), lambda i: (i, 0))     # activations: fresh tile / step
    w_spec = pl.BlockSpec((Kp, Np), lambda i: (0, 0))         # weights: VMEM resident
    b_spec = pl.BlockSpec((1, Np), lambda i: (0, 0))          # bias: VMEM resident
    if act == "prelu":
        kernel = _mm_kernel_prelu
        in_specs = [x_spec, w_spec, b_spec,
                    pl.BlockSpec((1, Np), lambda i: (0, 0))]  # per-column PReLU slope
    else:
        kernel = functools.partial(_mm_kernel, act=act)
        in_specs = [x_spec, w_spec, b_spec]
    return pl.pallas_call(
        kernel,
        out_shape=jax.ShapeDtypeStruct((Mp, Np), jnp.float32),
        grid=(grid_m,),
        in_specs=in_specs,
        out_specs=pl.BlockSpec((tile_m, Np), lambda i: (i, 0)),
        compiler_params=pltpu.CompilerParams(
            dimension_semantics=("parallel",),                # grid_m >= 2 -> v7x dual-TC
        ),
        cost_estimate=pl.CostEstimate(
            flops=2 * Mp * Kp * Np,
            transcendentals=(Mp * Np if act == "sigmoid" else 0),
            bytes_accessed=2 * (Mp * Kp + Kp * Np) + 4 * (2 * Np + Mp * Np),
        ),
    )


def _dense(X, p, act="none", alpha=None):
    """Y = act(X @ W + b).  X:(M,K) f32.  p holds bf16 padded weight (Kp,Np), f32 bias."""
    M, K = X.shape
    Kp, Np = p["wm"].shape
    cout = p["cout"]
    Xb = X.astype(jnp.bfloat16)

    avec = None
    if act == "prelu":
        a = jnp.asarray(alpha, jnp.float32)
        if a.ndim == 2 and a.shape == (1, Np):
            avec = a
        else:
            avec = jnp.broadcast_to(a.reshape(1, 1), (1, Np))

    # --- tiny matmuls (GAP / SE branches, 4x4 scale): plain jnp so XLA fuses them ---
    if M <= _SMALL_M:
        y = jnp.dot(Xb, p["wm"][:K, :cout], preferred_element_type=jnp.float32)
        y = y + p["b"][:, :cout]
        if act == "prelu":
            y = jnp.where(y >= 0.0, y, avec[:, :cout] * y)
        elif act == "sigmoid":
            y = jax.nn.sigmoid(y)
        return y

    # --- Pallas path ---
    if K < Kp:                                    # pad contraction dim (fused under the jit)
        Xb = jnp.pad(Xb, ((0, 0), (0, Kp - K)))
    tile_m = max(16, min(_TILE_M_MAX, _rup(-(-M // 2), 16)))   # >= 2 grid steps
    Mp = _rup(M, tile_m)
    if Mp > M:
        Xb = jnp.pad(Xb, ((0, Mp - M), (0, 0)))
    call = _matmul_call(Mp, tile_m, Kp, Np, act)
    if act == "prelu":
        out = call(Xb, p["wm"], p["b"], avec)
    else:
        out = call(Xb, p["wm"], p["b"])
    return out[:M, :cout]


# ----------------------------------------------------------------------------- conv op (im2col -> matmul)
def conv_fwd(p, x, act="none", alpha=None, stride=1, reflect=False):
    """x: NHWC.  p: matmul-ready conv params.  stride=1 or 2 (blur-composed)."""
    N, H, W, Cin = x.shape
    k, pad, cout = p["k"], p["pad"], p["cout"]
    if pad > 0:
        mode = "reflect" if reflect else "constant"
        x = jnp.pad(x, ((0, 0), (pad, pad), (pad, pad), (0, 0)), mode=mode)
    Hp, Wp = H + 2 * pad, W + 2 * pad
    Ho = (Hp - k) // stride + 1
    Wo = (Wp - k) // stride + 1
    if k == 1 and stride == 1:
        X = x.reshape(N * Ho * Wo, Cin)
    else:
        # TODO(synk): move this im2col inside the kernel (9 shifted dots on a spatial tile).
        patches = [x[:, ky:ky + stride * (Ho - 1) + 1:stride,
                     kx:kx + stride * (Wo - 1) + 1:stride, :]
                   for ky in range(k) for kx in range(k)]
        X = jnp.concatenate(patches, axis=-1).reshape(N * Ho * Wo, k * k * Cin)
    y = _dense(X, p, act=act, alpha=alpha)
    return y.reshape(N, Ho, Wo, cout)


def bilinear_up2(x):
    """2x bilinear upsample, align_corners=False (PyTorch semantics, bias=False case)."""
    N, H, W, C = x.shape

    def idx(L):
        o = jnp.arange(2 * L, dtype=jnp.float32)
        src = jnp.maximum((o + 0.5) * 0.5 - 0.5, 0.0)
        i0 = jnp.minimum(jnp.floor(src).astype(jnp.int32), L - 1)
        i1 = jnp.minimum(i0 + 1, L - 1)
        f = src - i0.astype(jnp.float32)
        return i0, i1, f

    hi0, hi1, fh = idx(H)
    wi0, wi1, fw = idx(W)
    rows = x[:, hi0] * (1.0 - fh)[None, :, None, None] + x[:, hi1] * fh[None, :, None, None]
    out = rows[:, :, wi0] * (1.0 - fw)[None, None, :, None] + rows[:, :, wi1] * fw[None, None, :, None]
    return out


# ----------------------------------------------------------------------------- parameter init (weights pre-padded ONCE, bf16)
class ParamGen:
    def __init__(self, seed=42):
        self.key = jax.random.PRNGKey(seed)
        self.count = 0

    def normal(self, shape, scale):
        self.count += 1
        k = jax.random.fold_in(self.key, self.count)
        return scale * jax.random.normal(k, shape, jnp.float32)


def _conv_param(w_pt, b_vec, k, pad):
    """PyTorch-layout weight (Cout,Cin,k,k) -> padded bf16 matmul weight (Kp,Np) + f32 bias."""
    cout, cin = int(w_pt.shape[0]), int(w_pt.shape[1])
    K = k * k * cin
    Kp = _rup(K, 128)
    Np = _rup(cout, 128)
    wm = jnp.transpose(w_pt, (2, 3, 1, 0)).reshape(K, cout)      # (ky,kx,cin) x cout
    wm = jnp.zeros((Kp, Np), jnp.float32).at[:K, :cout].set(wm).astype(jnp.bfloat16)
    b = jnp.zeros((1, Np), jnp.float32)
    if b_vec is not None:
        b = b.at[0, :cout].set(jnp.asarray(b_vec, jnp.float32))
    return {"wm": wm, "b": b, "k": k, "pad": pad, "cout": cout}


def init_conv(pg, cin, cout, k, bias):
    w = pg.normal((cout, cin, k, k), 1.0 / np.sqrt(cin * k * k))
    b = pg.normal((cout,), 0.01) if bias else None
    return _conv_param(w, b, k, (k - 1) // 2)


def init_prelu():
    return jnp.asarray([0.25], jnp.float32)


_BLUR3 = np.array([[1., 2., 1.], [2., 4., 2.], [1., 2., 1.]], np.float32) / 16.0


def _blur_compose(w1x1, b_vec):
    """Depthwise 3x3 binomial blur (stride2, reflect pad) folded into a following 1x1 conv."""
    w3 = w1x1[:, :, 0, 0][:, :, None, None] * jnp.asarray(_BLUR3)[None, None, :, :]
    return _conv_param(w3, b_vec, 3, 1)


def init_ca(pg, C, r, bias):
    return {"c1": init_conv(pg, C, C // r, 1, bias), "a": init_prelu(),
            "c2": init_conv(pg, C // r, C, 1, bias)}


def init_sa(pg):
    return {"conv": init_conv(pg, 2, 1, 5, True)}    # nn.Conv2d default bias=True


def init_dau(pg, C, r=8, bias=False):
    return {"b1": init_conv(pg, C, C, 3, bias), "a": init_prelu(),
            "b2": init_conv(pg, C, C, 3, bias),
            "sa": init_sa(pg), "ca": init_ca(pg, C, r, bias),
            "c11": init_conv(pg, 2 * C, C, 1, bias)}


def init_dsb(pg, C, bias=False):
    l3_w = pg.normal((2 * C, C, 1, 1), 1.0 / np.sqrt(C))
    l3_b = pg.normal((2 * C,), 0.01) if bias else None
    r1_w = pg.normal((2 * C, C, 1, 1), 1.0 / np.sqrt(C))
    r1_b = pg.normal((2 * C,), 0.01) if bias else None
    return {"l1": init_conv(pg, C, C, 1, bias), "la1": init_prelu(),
            "l2": init_conv(pg, C, C, 3, bias), "la2": init_prelu(),
            "l3c": _blur_compose(l3_w, l3_b),     # blur-pool + 1x1 fused into strided 3x3
            "r1c": _blur_compose(r1_w, r1_b)}


def init_downsamp(pg, C, scale, stride=2):
    n = int(np.log2(scale))
    blocks, c = [], C
    for _ in range(n):
        blocks.append(init_dsb(pg, c))
        c = int(c * stride)
    return blocks


def init_upb(pg, C, bias=False):
    # l1 (C->C, PReLU) and r1 (C->C/2, linear) read the same input -> one matmul
    # with weights concatenated along N; per-column PReLU slope (1.0 == identity).
    l1_w = pg.normal((C, C, 1, 1), 1.0 / np.sqrt(C))
    r1_w = pg.normal((C // 2, C, 1, 1), 1.0 / np.sqrt(C))
    l1_b = pg.normal((C,), 0.01) if bias else None
    r1_b = pg.normal((C // 2,), 0.01) if bias else None
    w = jnp.concatenate([l1_w, r1_w], axis=0)
    b = jnp.concatenate([l1_b, r1_b]) if bias else None
    fused = _conv_param(w, b, 1, 0)
    Np = fused["wm"].shape[1]
    fused["avec"] = jnp.ones((1, Np), jnp.float32).at[0, :C].set(0.25)
    return {"l1r1": fused, "C": C,
            "l2": init_conv(pg, C, C, 3, bias), "la2": init_prelu(),
            "l3": init_conv(pg, C, C // 2, 1, bias)}


def init_upsample(pg, C, scale, stride=2):
    n = int(np.log2(scale))
    blocks, c = [], C
    for _ in range(n):
        blocks.append(init_upb(pg, c))
        c = int(c // 2)
    return blocks


def init_skff(pg, in_c, r, bias=False):
    d = max(int(in_c / r), 4)
    fw = [pg.normal((in_c, d, 1, 1), 1.0 / np.sqrt(d)) for _ in range(3)]
    fb = [pg.normal((in_c,), 0.01) for _ in range(3)] if bias else None
    w = jnp.concatenate(fw, axis=0)                               # 3 fcs fused along N
    b = jnp.concatenate(fb) if bias else None
    return {"conv": init_conv(pg, in_c, d, 1, bias), "a": init_prelu(),
            "fcs": _conv_param(w, b, 1, 0)}


def init_msrb(pg, F, height, width, stride, bias):
    # NOTE: PyTorch `[DAU(...)] * width` shares ONE DAU per row across all width steps.
    dau = [init_dau(pg, int(F * stride ** i)) for i in range(height)]
    feats = [int(stride ** i * F) for i in range(height)]
    scale = [2 ** i for i in range(1, height)]
    last_up = {str(i): init_upsample(pg, int(F * stride ** i), 2 ** i, stride)
               for i in range(1, height)}
    down = {}
    i = 0
    sc = list(reversed(scale))
    for f in feats:
        for s in sc[i:]:
            down[f"{f}_{s}"] = init_downsamp(pg, f, s, stride)
        i += 1
    up = {}
    i = 0
    featr = list(reversed(feats))
    for f in featr:
        for s in sc[i:]:
            up[f"{f}_{s}"] = init_upsample(pg, f, s, stride)
        i += 1
    out_conv = init_conv(pg, F, F, 3, bias)
    skff = [init_skff(pg, int(F * stride ** i), height) for i in range(height)]
    return {"dau": dau, "down": down, "up": up, "last_up": last_up,
            "skff": skff, "out_conv": out_conv, "height": height, "width": width}


def init_rrg(pg, F, num_MSRB, height, width, stride, bias=False):
    return {"msrbs": [init_msrb(pg, F, height, width, stride, bias) for _ in range(num_MSRB)],
            "final": init_conv(pg, F, F, 3, bias)}


# ----------------------------------------------------------------------------- module forwards (NHWC)
def ca_fwd(p, x):
    s = jnp.mean(x, axis=(1, 2), keepdims=True)                   # GAP -> (N,1,1,C); tiny -> jnp
    z = conv_fwd(p["c1"], s, act="prelu", alpha=p["a"])
    g = conv_fwd(p["c2"], z, act="sigmoid")
    return x * g                                                   # XLA-fused gate


def sa_fwd(p, x):
    mx = jnp.max(x, axis=-1, keepdims=True)
    mn = jnp.mean(x, axis=-1, keepdims=True)
    c = jnp.concatenate([mx, mn], axis=-1)                         # (N,H,W,2)
    s = conv_fwd(p["conv"], c, act="sigmoid")                      # (N,H,W,1)
    return x * s


def dau_fwd(p, x):
    r = conv_fwd(p["b1"], x, act="prelu", alpha=p["a"])
    r = conv_fwd(p["b2"], r)
    cat = jnp.concatenate([sa_fwd(p["sa"], r), ca_fwd(p["ca"], r)], axis=-1)
    return conv_fwd(p["c11"], cat) + x


def dsb_fwd(p, x):
    l = conv_fwd(p["l1"], x, act="prelu", alpha=p["la1"])
    l = conv_fwd(p["l2"], l, act="prelu", alpha=p["la2"])
    l = conv_fwd(p["l3c"], l, stride=2, reflect=True)              # blur+1x1 as one strided conv
    r = conv_fwd(p["r1c"], x, stride=2, reflect=True)
    return l + r


def downsamp_fwd(blocks, x):
    for b in blocks:
        x = dsb_fwd(b, x)
    return x


def upb_fwd(p, x):
    C = p["C"]
    y = conv_fwd(p["l1r1"], x, act="prelu", alpha=p["l1r1"]["avec"])   # l1 + r1 in one matmul
    l, r = y[..., :C], y[..., C:]
    l = conv_fwd(p["l2"], l, act="prelu", alpha=p["la2"])
    # 1x1 convs commute with bilinear upsampling -> run them at low resolution (4x fewer rows)
    l = bilinear_up2(conv_fwd(p["l3"], l))
    r = bilinear_up2(r)
    return l + r


def upsample_fwd(blocks, x):
    for b in blocks:
        x = upb_fwd(b, x)
    return x


def skff_fwd(p, feats):
    u = feats[0] + feats[1] + feats[2]
    s = jnp.mean(u, axis=(1, 2), keepdims=True)                    # (N,1,1,C); tiny -> jnp matmuls
    z = conv_fwd(p["conv"], s, act="prelu", alpha=p["a"])
    a = conv_fwd(p["fcs"], z)                                      # all 3 fcs in one matmul
    N, C = a.shape[0], feats[0].shape[-1]
    a = jax.nn.softmax(a.reshape(N, 1, 1, 3, C), axis=3)           # softmax over the 3 branches
    return (feats[0] * a[:, :, :, 0, :] + feats[1] * a[:, :, :, 1, :]
            + feats[2] * a[:, :, :, 2, :])


def select_up_down(p, t, j, k):
    if j == k:
        return t
    diff = 2 ** abs(j - k)
    ch = t.shape[-1]
    if j < k:
        return upsample_fwd(p["up"][f"{ch}_{diff}"], t)
    return downsamp_fwd(p["down"][f"{ch}_{diff}"], t)


def msrb_fwd(p, x):
    height, width = p["height"], p["width"]
    inp = x
    out = []
    for j in range(height):
        if j == 0:
            inp = dau_fwd(p["dau"][j], inp)
        else:
            ch = inp.shape[-1]
            inp = dau_fwd(p["dau"][j], downsamp_fwd(p["down"][f"{ch}_2"], inp))
        out.append(inp)
    for _ in range(1, width):
        temp = []
        for j in range(height):
            tensors = [select_up_down(p, out[k], j, k) for k in range(height)]
            temp.append(skff_fwd(p["skff"][j], tensors))
        for j in range(height):
            out[j] = dau_fwd(p["dau"][j], temp[j])
    output = [out[0]] + [upsample_fwd(p["last_up"][str(k)], out[k]) for k in range(1, height)]
    o = skff_fwd(p["skff"][0], output)                             # reference reuses skff[0] here
    o = conv_fwd(p["out_conv"], o)
    return o + x


def rrg_fwd(params, x_nchw):
    x = jnp.transpose(x_nchw, (0, 2, 3, 1)).astype(jnp.float32)    # NCHW -> NHWC
    out = x
    for mp in params["msrbs"]:
        out = msrb_fwd(mp, out)
    out = conv_fwd(params["final"], out)
    out = out + x                                                  # RRG residual
    return jnp.transpose(out, (0, 3, 1, 2))                        # back to NCHW


# ----------------------------------------------------------------------------- main
if __name__ == "__main__":
    num_features, num_MSRB, height, width, stride = 8, 1, 3, 2, 2
    pg = ParamGen(seed=42)
    params = init_rrg(pg, num_features, num_MSRB, height, width, stride, bias=False)

    # One jit over the whole forward: params are closed over (static metadata stays
    # Python, weights become program constants); all Pallas calls + jnp glue compile
    # into a single XLA executable with a single dispatch.
    forward = jax.jit(functools.partial(rrg_fwd, params))

    key = jax.random.PRNGKey(0)
    x = jax.random.normal(key, (2, num_features, 16, 16), jnp.float32)  # NCHW like PyTorch

    out = jax.block_until_ready(forward(x))
    assert out.shape == x.shape and out.dtype == jnp.float32
    assert bool(jnp.all(jnp.isfinite(out)))
    print("KERNEL_OK")
</pallas_src>

<mosaic_0001>
module attributes {stable_mosaic.version = 11 : i64} {
  func.func @_mm_kernel_prelu(%arg0: i32, %arg1: memref<256x128xbf16, #tpu.memory_space<vmem>>, %arg2: memref<128x128xbf16, #tpu.memory_space<vmem>>, %arg3: memref<1x128xf32, #tpu.memory_space<vmem>>, %arg4: memref<1x128xf32, #tpu.memory_space<vmem>>, %arg5: memref<256x128xf32, #tpu.memory_space<vmem>>) attributes {dimension_semantics = [#tpu.dimension_semantics<parallel>], iteration_bounds = array<i64: 2>, scalar_prefetch = 0 : i64, scratch_operands = 0 : i64, tpu.core_type = #tpu.core_type<tc>, window_params = [{transform_indices = @transform_0, window_bounds = array<i64: 256, 128>}, {pipeline_mode = #tpu.pipeline_mode<synchronous>, transform_indices = @transform_1, window_bounds = array<i64: 128, 128>}, {pipeline_mode = #tpu.pipeline_mode<synchronous>, transform_indices = @transform_2, window_bounds = array<i64: 1, 128>}, {pipeline_mode = #tpu.pipeline_mode<synchronous>, transform_indices = @transform_3, window_bounds = array<i64: 1, 128>}, {transform_indices = @transform_4, window_bounds = array<i64: 256, 128>}]} {
    %c0 = arith.constant 0 : index
    %c0_0 = arith.constant 0 : index
    %0 = vector.load %arg1[%c0, %c0_0] : memref<256x128xbf16, #tpu.memory_space<vmem>>, vector<256x128xbf16>
    %c0_1 = arith.constant 0 : index
    %c0_2 = arith.constant 0 : index
    %1 = vector.load %arg2[%c0_1, %c0_2] : memref<128x128xbf16, #tpu.memory_space<vmem>>, vector<128x128xbf16>
    %cst = arith.constant dense<0.000000e+00> : vector<256x128xf32>
    %2 = tpu.matmul %0, %1, %cst {dimension_numbers = #tpu.dot_dimension_numbers<[1], [0], [0], [1], [0, 0, 1, 1], [], []>} : vector<256x128xbf16>, vector<128x128xbf16>, vector<256x128xf32> -> vector<256x128xf32>
    %c0_3 = arith.constant 0 : index
    %c0_4 = arith.constant 0 : index
    %3 = vector.load %arg3[%c0_3, %c0_4] : memref<1x128xf32, #tpu.memory_space<vmem>>, vector<1x128xf32>
    %4 = vector.broadcast %3 : vector<1x128xf32> to vector<256x128xf32>
    %5 = arith.addf %2, %4 : vector<256x128xf32>
    %cst_5 = arith.constant 0.000000e+00 : f32
    %6 = vector.broadcast %cst_5 : f32 to vector<256x128xf32>
    %7 = arith.cmpf oge, %5, %6 : vector<256x128xf32>
    %c0_6 = arith.constant 0 : index
    %c0_7 = arith.constant 0 : index
    %8 = vector.load %arg4[%c0_6, %c0_7] : memref<1x128xf32, #tpu.memory_space<vmem>>, vector<1x128xf32>
    %9 = vector.broadcast %8 : vector<1x128xf32> to vector<256x128xf32>
    %10 = arith.mulf %9, %5 : vector<256x128xf32>
    %11 = arith.select %7, %5, %10 : vector<256x128xi1>, vector<256x128xf32>
    %c0_8 = arith.constant 0 : index
    %c0_9 = arith.constant 0 : index
    %12 = vector.load %arg5[%c0_8, %c0_9] : memref<256x128xf32, #tpu.memory_space<vmem>>, vector<256x128xf32>
    tpu.vector_store %arg5[%c0_8, %c0_9], %11 {strides = array<i32>} : memref<256x128xf32, #tpu.memory_space<vmem>>, vector<256x128xf32>,
    return
  }
  func.func @transform_0(%arg0: i32) -> (i32, i32) {
    %c0_i32 = arith.constant 0 : i32
    %c0_i32_0 = arith.constant 0 : i32
    return %arg0, %c0_i32 : i32, i32
  }
  func.func @transform_1(%arg0: i32) -> (i32, i32) {
    %c0_i32 = arith.constant 0 : i32
    %c0_i32_0 = arith.constant 0 : i32
    %c0_i32_1 = arith.constant 0 : i32
    return %c0_i32, %c0_i32_0 : i32, i32
  }
  func.func @transform_2(%arg0: i32) -> (i32, i32) {
    %c0_i32 = arith.constant 0 : i32
    %c0_i32_0 = arith.constant 0 : i32
    %c0_i32_1 = arith.constant 0 : i32
    return %c0_i32, %c0_i32_0 : i32, i32
  }
  func.func @transform_3(%arg0: i32) -> (i32, i32) {
    %c0_i32 = arith.constant 0 : i32
    %c0_i32_0 = arith.constant 0 : i32
    %c0_i32_1 = arith.constant 0 : i32
    return %c0_i32, %c0_i32_0 : i32, i32
  }
  func.func @transform_4(%arg0: i32) -> (i32, i32) {
    %c0_i32 = arith.constant 0 : i32
    %c0_i32_0 = arith.constant 0 : i32
    return %arg0, %c0_i32 : i32, i32
  }
}

module attributes {stable_mosaic.version = 11 : i64} {
  func.func @_mm_kernel(%arg0: i32, %arg1: memref<256x128xbf16, #tpu.memory_space<vmem>>, %arg2: memref<128x128xbf16, #tpu.memory_space<vmem>>, %arg3: memref<1x128xf32, #tpu.memory_space<vmem>>, %arg4: memref<256x128xf32, #tpu.memory_space<vmem>>) attributes {dimension_semantics = [#tpu.dimension_semantics<parallel>], iteration_bounds = array<i64: 2>, scalar_prefetch = 0 : i64, scratch_operands = 0 : i64, tpu.core_type = #tpu.core_type<tc>, window_params = [{transform_indices = @transform_0, window_bounds = array<i64: 256, 128>}, {pipeline_mode = #tpu.pipeline_mode<synchronous>, transform_indices = @transform_1, window_bounds = array<i64: 128, 128>}, {pipeline_mode = #tpu.pipeline_mode<synchronous>, transform_indices = @transform_2, window_bounds = array<i64: 1, 128>}, {transform_indices = @transform_3, window_bounds = array<i64: 256, 128>}]} {
    %c0 = arith.constant 0 : index
    %c0_0 = arith.constant 0 : index
    %0 = vector.load %arg1[%c0, %c0_0] : memref<256x128xbf16, #tpu.memory_space<vmem>>, vector<256x128xbf16>
    %c0_1 = arith.constant 0 : index
    %c0_2 = arith.constant 0 : index
    %1 = vector.load %arg2[%c0_1, %c0_2] : memref<128x128xbf16, #tpu.memory_space<vmem>>, vector<128x128xbf16>
    %cst = arith.constant dense<0.000000e+00> : vector<256x128xf32>
    %2 = tpu.matmul %0, %1, %cst {dimension_numbers = #tpu.dot_dimension_numbers<[1], [0], [0], [1], [0, 0, 1, 1], [], []>} : vector<256x128xbf16>, vector<128x128xbf16>, vector<256x128xf32> -> vector<256x128xf32>
    %c0_3 = arith.constant 0 : index
    %c0_4 = arith.constant 0 : index
    %3 = vector.load %arg3[%c0_3, %c0_4] : memref<1x128xf32, #tpu.memory_space<vmem>>, vector<1x128xf32>
    %4 = vector.broadcast %3 : vector<1x128xf32> to vector<256x128xf32>
    %5 = arith.addf %2, %4 : vector<256x128xf32>
    %c0_5 = arith.constant 0 : index
    %c0_6 = arith.constant 0 : index
    %6 = vector.load %arg4[%c0_5, %c0_6] : memref<256x128xf32, #tpu.memory_space<vmem>>, vector<256x128xf32>
    tpu.vector_store %arg4[%c0_5, %c0_6], %5 {strides = array<i32>} : memref<256x128xf32, #tpu.memory_space<vmem>>, vector<256x128xf32>,
    return
  }
  func.func @transform_0(%arg0: i32) -> (i32, i32) {
    %c0_i32 = arith.constant 0 : i32
    %c0_i32_0 = arith.constant 0 : i32
    return %arg0, %c0_i32 : i32, i32
  }
  func.func @transform_1(%arg0: i32) -> (i32, i32) {
    %c0_i32 = arith.constant 0 : i32
    %c0_i32_0 = arith.constant 0 : i32
    %c0_i32_1 = arith.constant 0 : i32
    return %c0_i32, %c0_i32_0 : i32, i32
  }
  func.func @transform_2(%arg0: i32) -> (i32, i32) {
    %c0_i32 = arith.constant 0 : i32
    %c0_i32_0 = arith.constant 0 : i32
    %c0_i32_1 = arith.constant 0 : i32
    return %c0_i32, %c0_i32_0 : i32, i32
  }
  func.func @transform_3(%arg0: i32) -> (i32, i32) {
    %c0_i32 = arith.constant 0 : i32
    %c0_i32_0 = arith.constant 0 : i32
    return %arg0, %c0_i32 : i32, i32
  }
}

module attributes {stable_mosaic.version = 11 : i64} {
  func.func @_mm_kernel(%arg0: i32, %arg1: memref<256x128xbf16, #tpu.memory_space<vmem>>, %arg2: memref<128x128xbf16, #tpu.memory_space<vmem>>, %arg3: memref<1x128xf32, #tpu.memory_space<vmem>>, %arg4: memref<256x128xf32, #tpu.memory_space<vmem>>) attributes {dimension_semantics = [#tpu.dimension_semantics<parallel>], iteration_bounds = array<i64: 2>, scalar_prefetch = 0 : i64, scratch_operands = 0 : i64, tpu.core_type = #tpu.core_type<tc>, window_params = [{transform_indices = @transform_0, window_bounds = array<i64: 256, 128>}, {pipeline_mode = #tpu.pipeline_mode<synchronous>, transform_indices = @transform_1, window_bounds = array<i64: 128, 128>}, {pipeline_mode = #tpu.pipeline_mode<synchronous>, transform_indices = @transform_2, window_bounds = array<i64: 1, 128>}, {transform_indices = @transform_3, window_bounds = array<i64: 256, 128>}]} {
    %c0 = arith.constant 0 : index
    %c0_0 = arith.constant 0 : index
    %0 = vector.load %arg1[%c0, %c0_0] : memref<256x128xbf16, #tpu.memory_space<vmem>>, vector<256x128xbf16>
    %c0_1 = arith.constant 0 : index
    %c0_2 = arith.constant 0 : index
    %1 = vector.load %arg2[%c0_1, %c0_2] : memref<128x128xbf16, #tpu.memory_space<vmem>>, vector<128x128xbf16>
    %cst = arith.constant dense<0.000000e+00> : vector<256x128xf32>
    %2 = tpu.matmul %0, %1, %cst {dimension_numbers = #tpu.dot_dimension_numbers<[1], [0], [0], [1], [0, 0, 1, 1], [], []>} : vector<256x128xbf16>, vector<128x128xbf16>, vector<256x128xf32> -> vector<256x128xf32>
    %c0_3 = arith.constant 0 : index
    %c0_4 = arith.constant 0 : index
    %3 = vector.load %arg3[%c0_3, %c0_4] : memref<1x128xf32, #tpu.memory_space<vmem>>, vector<1x128xf32>
    %4 = vector.broadcast %3 : vector<1x128xf32> to vector<256x128xf32>
    %5 = arith.addf %2, %4 : vector<256x128xf32>
    %6 = arith.negf %5 : vector<256x128xf32>
    %7 = math.exp %6 : vector<256x128xf32>
    %cst_5 = arith.constant 1.000000e+00 : f32
    %8 = vector.broadcast %cst_5 : f32 to vector<256x128xf32>
    %9 = arith.addf %8, %7 : vector<256x128xf32>
    %10 = arith.divf %8, %9 : vector<256x128xf32>
    %c0_6 = arith.constant 0 : index
    %c0_7 = arith.constant 0 : index
    %11 = vector.load %arg4[%c0_6, %c0_7] : memref<256x128xf32, #tpu.memory_space<vmem>>, vector<256x128xf32>
    tpu.vector_store %arg4[%c0_6, %c0_7], %10 {strides = array<i32>} : memref<256x128xf32, #tpu.memory_space<vmem>>, vector<256x128xf32>,
    return
  }
  func.func @transform_0(%arg0: i32) -> (i32, i32) {
    %c0_i32 = arith.constant 0 : i32
    %c0_i32_0 = arith.constant 0 : i32
    return %arg0, %c0_i32 : i32, i32
  }
  func.func @transform_1(%arg0: i32) -> (i32, i32) {
    %c0_i32 = arith.constant 0 : i32
    %c0_i32_0 = arith.constant 0 : i32
    %c0_i32_1 = arith.constant 0 : i32
    return %c0_i32, %c0_i32_0 : i32, i32
  }
  func.func @transform_2(%arg0: i32) -> (i32, i32) {
    %c0_i32 = arith.constant 0 : i32
    %c0_i32_0 = arith.constant 0 : i32
    %c0_i32_1 = arith.constant 0 : i32
    return %c0_i32, %c0_i32_0 : i32, i32
  }
  func.func @transform_3(%arg0: i32) -> (i32, i32) {
    %c0_i32 = arith.constant 0 : i32
    %c0_i32_0 = arith.constant 0 : i32
    return %arg0, %c0_i32 : i32, i32
  }
}

module attributes {stable_mosaic.version = 11 : i64} {
  func.func @_mm_kernel(%arg0: i32, %arg1: memref<64x128xbf16, #tpu.memory_space<vmem>>, %arg2: memref<128x128xbf16, #tpu.memory_space<vmem>>, %arg3: memref<1x128xf32, #tpu.memory_space<vmem>>, %arg4: memref<64x128xf32, #tpu.memory_space<vmem>>) attributes {dimension_semantics = [#tpu.dimension_semantics<parallel>], iteration_bounds = array<i64: 2>, scalar_prefetch = 0 : i64, scratch_operands = 0 : i64, tpu.core_type = #tpu.core_type<tc>, window_params = [{transform_indices = @transform_0, window_bounds = array<i64: 64, 128>}, {pipeline_mode = #tpu.pipeline_mode<synchronous>, transform_indices = @transform_1, window_bounds = array<i64: 128, 128>}, {pipeline_mode = #tpu.pipeline_mode<synchronous>, transform_indices = @transform_2, window_bounds = array<i64: 1, 128>}, {transform_indices = @transform_3, window_bounds = array<i64: 64, 128>}]} {
    %c0 = arith.constant 0 : index
    %c0_0 = arith.constant 0 : index
    %0 = vector.load %arg1[%c0, %c0_0] : memref<64x128xbf16, #tpu.memory_space<vmem>>, vector<64x128xbf16>
    %c0_1 = arith.constant 0 : index
    %c0_2 = arith.constant 0 : index
    %1 = vector.load %arg2[%c0_1, %c0_2] : memref<128x128xbf16, #tpu.memory_space<vmem>>, vector<128x128xbf16>
    %cst = arith.constant dense<0.000000e+00> : vector<64x128xf32>
    %2 = tpu.matmul %0, %1, %cst {dimension_numbers = #tpu.dot_dimension_numbers<[1], [0], [0], [1], [0, 0, 1, 1], [], []>} : vector<64x128xbf16>, vector<128x128xbf16>, vector<64x128xf32> -> vector<64x128xf32>
    %c0_3 = arith.constant 0 : index
    %c0_4 = arith.constant 0 : index
    %3 = vector.load %arg3[%c0_3, %c0_4] : memref<1x128xf32, #tpu.memory_space<vmem>>, vector<1x128xf32>
    %4 = vector.broadcast %3 : vector<1x128xf32> to vector<64x128xf32>
    %5 = arith.addf %2, %4 : vector<64x128xf32>
    %c0_5 = arith.constant 0 : index
    %c0_6 = arith.constant 0 : index
    %6 = vector.load %arg4[%c0_5, %c0_6] : memref<64x128xf32, #tpu.memory_space<vmem>>, vector<64x128xf32>
    tpu.vector_store %arg4[%c0_5, %c0_6], %5 {strides = array<i32>} : memref<64x128xf32, #tpu.memory_space<vmem>>, vector<64x128xf32>,
    return
  }
  func.func @transform_0(%arg0: i32) -> (i32, i32) {
    %c0_i32 = arith.constant 0 : i32
    %c0_i32_0 = arith.constant 0 : i32
    return %arg0, %c0_i32 : i32, i32
  }
  func.func @transform_1(%arg0: i32) -> (i32, i32) {
    %c0_i32 = arith.constant 0 : i32
    %c0_i32_0 = arith.constant 0 : i32
    %c0_i32_1 = arith.constant 0 : i32
    return %c0_i32, %c0_i32_0 : i32, i32
  }
  func.func @transform_2(%arg0: i32) -> (i32, i32) {
    %c0_i32 = arith.constant 0 : i32
    %c0_i32_0 = arith.constant 0 : i32
    %c0_i32_1 = arith.constant 0 : i32
    return %c0_i32, %c0_i32_0 : i32, i32
  }
  func.func @transform_3(%arg0: i32) -> (i32, i32) {
    %c0_i32 = arith.constant 0 : i32
    %c0_i32_0 = arith.constant 0 : i32
    return %arg0, %c0_i32 : i32, i32
  }
}

module attributes {stable_mosaic.version = 11 : i64} {
  func.func @_mm_kernel_prelu(%arg0: i32, %arg1: memref<64x256xbf16, #tpu.memory_space<vmem>>, %arg2: memref<256x128xbf16, #tpu.memory_space<vmem>>, %arg3: memref<1x128xf32, #tpu.memory_space<vmem>>, %arg4: memref<1x128xf32, #tpu.memory_space<vmem>>, %arg5: memref<64x128xf32, #tpu.memory_space<vmem>>) attributes {dimension_semantics = [#tpu.dimension_semantics<parallel>], iteration_bounds = array<i64: 2>, scalar_prefetch = 0 : i64, scratch_operands = 0 : i64, tpu.core_type = #tpu.core_type<tc>, window_params = [{transform_indices = @transform_0, window_bounds = array<i64: 64, 256>}, {pipeline_mode = #tpu.pipeline_mode<synchronous>, transform_indices = @transform_1, window_bounds = array<i64: 256, 128>}, {pipeline_mode = #tpu.pipeline_mode<synchronous>, transform_indices = @transform_2, window_bounds = array<i64: 1, 128>}, {pipeline_mode = #tpu.pipeline_mode<synchronous>, transform_indices = @transform_3, window_bounds = array<i64: 1, 128>}, {transform_indices = @transform_4, window_bounds = array<i64: 64, 128>}]} {
    %c0 = arith.constant 0 : index
    %c0_0 = arith.constant 0 : index
    %0 = vector.load %arg1[%c0, %c0_0] : memref<64x256xbf16, #tpu.memory_space<vmem>>, vector<64x256xbf16>
    %c0_1 = arith.constant 0 : index
    %c0_2 = arith.constant 0 : index
    %1 = vector.load %arg2[%c0_1, %c0_2] : memref<256x128xbf16, #tpu.memory_space<vmem>>, vector<256x128xbf16>
    %cst = arith.constant dense<0.000000e+00> : vector<64x128xf32>
    %2 = tpu.matmul %0, %1, %cst {dimension_numbers = #tpu.dot_dimension_numbers<[1], [0], [0], [1], [0, 0, 1, 1], [], []>} : vector<64x256xbf16>, vector<256x128xbf16>, vector<64x128xf32> -> vector<64x128xf32>
    %c0_3 = arith.constant 0 : index
    %c0_4 = arith.constant 0 : index
    %3 = vector.load %arg3[%c0_3, %c0_4] : memref<1x128xf32, #tpu.memory_space<vmem>>, vector<1x128xf32>
    %4 = vector.broadcast %3 : vector<1x128xf32> to vector<64x128xf32>
    %5 = arith.addf %2, %4 : vector<64x128xf32>
    %cst_5 = arith.constant 0.000000e+00 : f32
    %6 = vector.broadcast %cst_5 : f32 to vector<64x128xf32>
    %7 = arith.cmpf oge, %5, %6 : vector<64x128xf32>
    %c0_6 = arith.constant 0 : index
    %c0_7 = arith.constant 0 : index
    %8 = vector.load %arg4[%c0_6, %c0_7] : memref<1x128xf32, #tpu.memory_space<vmem>>, vector<1x128xf32>
    %9 = vector.broadcast %8 : vector<1x128xf32> to vector<64x128xf32>
    %10 = arith.mulf %9, %5 : vector<64x128xf32>
    %11 = arith.select %7, %5, %10 : vector<64x128xi1>, vector<64x128xf32>
    %c0_8 = arith.constant 0 : index
    %c0_9 = arith.constant 0 : index
    %12 = vector.load %arg5[%c0_8, %c0_9] : memref<64x128xf32, #tpu.memory_space<vmem>>, vector<64x128xf32>
    tpu.vector_store %arg5[%c0_8, %c0_9], %11 {strides = array<i32>} : memref<64x128xf32, #tpu.memory_space<vmem>>, vector<64x128xf32>,
    return
  }
  func.func @transform_0(%arg0: i32) -> (i32, i32) {
    %c0_i32 = arith.constant 0 : i32
    %c0_i32_0 = arith.constant 0 : i32
    return %arg0, %c0_i32 : i32, i32
  }
  func.func @transform_1(%arg0: i32) -> (i32, i32) {
    %c0_i32 = arith.constant 0 : i32
    %c0_i32_0 = arith.constant 0 : i32
    %c0_i32_1 = arith.constant 0 : i32
    return %c0_i32, %c0_i32_0 : i32, i32
  }
  func.func @transform_2(%arg0: i32) -> (i32, i32) {
    %c0_i32 = arith.constant 0 : i32
    %c0_i32_0 = arith.constant 0 : i32
    %c0_i32_1 = arith.constant 0 : i32
    return %c0_i32, %c0_i32_0 : i32, i32
  }
  func.func @transform_3(%arg0: i32) -> (i32, i32) {
    %c0_i32 = arith.constant 0 : i32
    %c0_i32_0 = arith.constant 0 : i32
    %c0_i32_1 = arith.constant 0 : i32
    return %c0_i32, %c0_i32_0 : i32, i32
  }
  func.func @transform_4(%arg0: i32) -> (i32, i32) {
    %c0_i32 = arith.constant 0 : i32
    %c0_i32_0 = arith.constant 0 : i32
    return %arg0, %c0_i32 : i32, i32
  }
}

module attributes {stable_mosaic.version = 11 : i64} {
  func.func @_mm_kernel(%arg0: i32, %arg1: memref<64x256xbf16, #tpu.memory_space<vmem>>, %arg2: memref<256x128xbf16, #tpu.memory_space<vmem>>, %arg3: memref<1x128xf32, #tpu.memory_space<vmem>>, %arg4: memref<64x128xf32, #tpu.memory_space<vmem>>) attributes {dimension_semantics = [#tpu.dimension_semantics<parallel>], iteration_bounds = array<i64: 2>, scalar_prefetch = 0 : i64, scratch_operands = 0 : i64, tpu.core_type = #tpu.core_type<tc>, window_params = [{transform_indices = @transform_0, window_bounds = array<i64: 64, 256>}, {pipeline_mode = #tpu.pipeline_mode<synchronous>, transform_indices = @transform_1, window_bounds = array<i64: 256, 128>}, {pipeline_mode = #tpu.pipeline_mode<synchronous>, transform_indices = @transform_2, window_bounds = array<i64: 1, 128>}, {transform_indices = @transform_3, window_bounds = array<i64: 64, 128>}]} {
    %c0 = arith.constant 0 : index
    %c0_0 = arith.constant 0 : index
    %0 = vector.load %arg1[%c0, %c0_0] : memref<64x256xbf16, #tpu.memory_space<vmem>>, vector<64x256xbf16>
    %c0_1 = arith.constant 0 : index
    %c0_2 = arith.constant 0 : index
    %1 = vector.load %arg2[%c0_1, %c0_2] : memref<256x128xbf16, #tpu.memory_space<vmem>>, vector<256x128xbf16>
    %cst = arith.constant dense<0.000000e+00> : vector<64x128xf32>
    %2 = tpu.matmul %0, %1, %cst {dimension_numbers = #tpu.dot_dimension_numbers<[1], [0], [0], [1], [0, 0, 1, 1], [], []>} : vector<64x256xbf16>, vector<256x128xbf16>, vector<64x128xf32> -> vector<64x128xf32>
    %c0_3 = arith.constant 0 : index
    %c0_4 = arith.constant 0 : index
    %3 = vector.load %arg3[%c0_3, %c0_4] : memref<1x128xf32, #tpu.memory_space<vmem>>, vector<1x128xf32>
    %4 = vector.broadcast %3 : vector<1x128xf32> to vector<64x128xf32>
    %5 = arith.addf %2, %4 : vector<64x128xf32>
    %c0_5 = arith.constant 0 : index
    %c0_6 = arith.constant 0 : index
    %6 = vector.load %arg4[%c0_5, %c0_6] : memref<64x128xf32, #tpu.memory_space<vmem>>, vector<64x128xf32>
    tpu.vector_store %arg4[%c0_5, %c0_6], %5 {strides = array<i32>} : memref<64x128xf32, #tpu.memory_space<vmem>>, vector<64x128xf32>,
    return
  }
  func.func @transform_0(%arg0: i32) -> (i32, i32) {
    %c0_i32 = arith.constant 0 : i32
    %c0_i32_0 = arith.constant 0 : i32
    return %arg0, %c0_i32 : i32, i32
  }
  func.func @transform_1(%arg0: i32) -> (i32, i32) {
    %c0_i32 = arith.constant 0 : i32
    %c0_i32_0 = arith.constant 0 : i32
    %c0_i32_1 = arith.constant 0 : i32
    return %c0_i32, %c0_i32_0 : i32, i32
  }
  func.func @transform_2(%arg0: i32) -> (i32, i32) {
    %c0_i32 = arith.constant 0 : i32
    %c0_i32_0 = arith.constant 0 : i32
    %c0_i32_1 = arith.constant 0 : i32
    return %c0_i32, %c0_i32_0 : i32, i32
  }
  func.func @transform_3(%arg0: i32) -> (i32, i32) {
    %c0_i32 = arith.constant 0 : i32
    %c0_i32_0 = arith.constant 0 : i32
    return %arg0, %c0_i32 : i32, i32
  }
}

module attributes {stable_mosaic.version = 11 : i64} {
  func.func @_mm_kernel(%arg0: i32, %arg1: memref<64x128xbf16, #tpu.memory_space<vmem>>, %arg2: memref<128x128xbf16, #tpu.memory_space<vmem>>, %arg3: memref<1x128xf32, #tpu.memory_space<vmem>>, %arg4: memref<64x128xf32, #tpu.memory_space<vmem>>) attributes {dimension_semantics = [#tpu.dimension_semantics<parallel>], iteration_bounds = array<i64: 2>, scalar_prefetch = 0 : i64, scratch_operands = 0 : i64, tpu.core_type = #tpu.core_type<tc>, window_params = [{transform_indices = @transform_0, window_bounds = array<i64: 64, 128>}, {pipeline_mode = #tpu.pipeline_mode<synchronous>, transform_indices = @transform_1, window_bounds = array<i64: 128, 128>}, {pipeline_mode = #tpu.pipeline_mode<synchronous>, transform_indices = @transform_2, window_bounds = array<i64: 1, 128>}, {transform_indices = @transform_3, window_bounds = array<i64: 64, 128>}]} {
    %c0 = arith.constant 0 : index
    %c0_0 = arith.constant 0 : index
    %0 = vector.load %arg1[%c0, %c0_0] : memref<64x128xbf16, #tpu.memory_space<vmem>>, vector<64x128xbf16>
    %c0_1 = arith.constant 0 : index
    %c0_2 = arith.constant 0 : index
    %1 = vector.load %arg2[%c0_1, %c0_2] : memref<128x128xbf16, #tpu.memory_space<vmem>>, vector<128x128xbf16>
    %cst = arith.constant dense<0.000000e+00> : vector<64x128xf32>
    %2 = tpu.matmul %0, %1, %cst {dimension_numbers = #tpu.dot_dimension_numbers<[1], [0], [0], [1], [0, 0, 1, 1], [], []>} : vector<64x128xbf16>, vector<128x128xbf16>, vector<64x128xf32> -> vector<64x128xf32>
    %c0_3 = arith.constant 0 : index
    %c0_4 = arith.constant 0 : index
    %3 = vector.load %arg3[%c0_3, %c0_4] : memref<1x128xf32, #tpu.memory_space<vmem>>, vector<1x128xf32>
    %4 = vector.broadcast %3 : vector<1x128xf32> to vector<64x128xf32>
    %5 = arith.addf %2, %4 : vector<64x128xf32>
    %6 = arith.negf %5 : vector<64x128xf32>
    %7 = math.exp %6 : vector<64x128xf32>
    %cst_5 = arith.constant 1.000000e+00 : f32
    %8 = vector.broadcast %cst_5 : f32 to vector<64x128xf32>
    %9 = arith.addf %8, %7 : vector<64x128xf32>
    %10 = arith.divf %8, %9 : vector<64x128xf32>
    %c0_6 = arith.constant 0 : index
    %c0_7 = arith.constant 0 : index
    %11 = vector.load %arg4[%c0_6, %c0_7] : memref<64x128xf32, #tpu.memory_space<vmem>>, vector<64x128xf32>
    tpu.vector_store %arg4[%c0_6, %c0_7], %10 {strides = array<i32>} : memref<64x128xf32, #tpu.memory_space<vmem>>, vector<64x128xf32>,
    return
  }
  func.func @transform_0(%arg0: i32) -> (i32, i32) {
    %c0_i32 = arith.constant 0 : i32
    %c0_i32_0 = arith.constant 0 : i32
    return %arg0, %c0_i32 : i32, i32
  }
  func.func @transform_1(%arg0: i32) -> (i32, i32) {
    %c0_i32 = arith.constant 0 : i32
    %c0_i32_0 = arith.constant 0 : i32
    %c0_i32_1 = arith.constant 0 : i32
    return %c0_i32, %c0_i32_0 : i32, i32
  }
  func.func @transform_2(%arg0: i32) -> (i32, i32) {
    %c0_i32 = arith.constant 0 : i32
    %c0_i32_0 = arith.constant 0 : i32
    %c0_i32_1 = arith.constant 0 : i32
    return %c0_i32, %c0_i32_0 : i32, i32
  }
  func.func @transform_3(%arg0: i32) -> (i32, i32) {
    %c0_i32 = arith.constant 0 : i32
    %c0_i32_0 = arith.constant 0 : i32
    return %arg0, %c0_i32 : i32, i32
  }
}

module attributes {stable_mosaic.version = 11 : i64} {
  func.func @_mm_kernel_prelu(%arg0: i32, %arg1: memref<64x128xbf16, #tpu.memory_space<vmem>>, %arg2: memref<128x128xbf16, #tpu.memory_space<vmem>>, %arg3: memref<1x128xf32, #tpu.memory_space<vmem>>, %arg4: memref<1x128xf32, #tpu.memory_space<vmem>>, %arg5: memref<64x128xf32, #tpu.memory_space<vmem>>) attributes {dimension_semantics = [#tpu.dimension_semantics<parallel>], iteration_bounds = array<i64: 2>, scalar_prefetch = 0 : i64, scratch_operands = 0 : i64, tpu.core_type = #tpu.core_type<tc>, window_params = [{transform_indices = @transform_0, window_bounds = array<i64: 64, 128>}, {pipeline_mode = #tpu.pipeline_mode<synchronous>, transform_indices = @transform_1, window_bounds = array<i64: 128, 128>}, {pipeline_mode = #tpu.pipeline_mode<synchronous>, transform_indices = @transform_2, window_bounds = array<i64: 1, 128>}, {pipeline_mode = #tpu.pipeline_mode<synchronous>, transform_indices = @transform_3, window_bounds = array<i64: 1, 128>}, {transform_indices = @transform_4, window_bounds = array<i64: 64, 128>}]} {
    %c0 = arith.constant 0 : index
    %c0_0 = arith.constant 0 : index
    %0 = vector.load %arg1[%c0, %c0_0] : memref<64x128xbf16, #tpu.memory_space<vmem>>, vector<64x128xbf16>
    %c0_1 = arith.constant 0 : index
    %c0_2 = arith.constant 0 : index
    %1 = vector.load %arg2[%c0_1, %c0_2] : memref<128x128xbf16, #tpu.memory_space<vmem>>, vector<128x128xbf16>
    %cst = arith.constant dense<0.000000e+00> : vector<64x128xf32>
    %2 = tpu.matmul %0, %1, %cst {dimension_numbers = #tpu.dot_dimension_numbers<[1], [0], [0], [1], [0, 0, 1, 1], [], []>} : vector<64x128xbf16>, vector<128x128xbf16>, vector<64x128xf32> -> vector<64x128xf32>
    %c0_3 = arith.constant 0 : index
    %c0_4 = arith.constant 0 : index
    %3 = vector.load %arg3[%c0_3, %c0_4] : memref<1x128xf32, #tpu.memory_space<vmem>>, vector<1x128xf32>
    %4 = vector.broadcast %3 : vector<1x128xf32> to vector<64x128xf32>
    %5 = arith.addf %2, %4 : vector<64x128xf32>
    %cst_5 = arith.constant 0.000000e+00 : f32
    %6 = vector.broadcast %cst_5 : f32 to vector<64x128xf32>
    %7 = arith.cmpf oge, %5, %6 : vector<64x128xf32>
    %c0_6 = arith.constant 0 : index
    %c0_7 = arith.constant 0 : index
    %8 = vector.load %arg4[%c0_6, %c0_7] : memref<1x128xf32, #tpu.memory_space<vmem>>, vector<1x128xf32>
    %9 = vector.broadcast %8 : vector<1x128xf32> to vector<64x128xf32>
    %10 = arith.mulf %9, %5 : vector<64x128xf32>
    %11 = arith.select %7, %5, %10 : vector<64x128xi1>, vector<64x128xf32>
    %c0_8 = arith.constant 0 : index
    %c0_9 = arith.constant 0 : index
    %12 = vector.load %arg5[%c0_8, %c0_9] : memref<64x128xf32, #tpu.memory_space<vmem>>, vector<64x128xf32>
    tpu.vector_store %arg5[%c0_8, %c0_9], %11 {strides = array<i32>} : memref<64x128xf32, #tpu.memory_space<vmem>>, vector<64x128xf32>,
    return
  }
  func.func @transform_0(%arg0: i32) -> (i32, i32) {
    %c0_i32 = arith.constant 0 : i32
    %c0_i32_0 = arith.constant 0 : i32
    return %arg0, %c0_i32 : i32, i32
  }
  func.func @transform_1(%arg0: i32) -> (i32, i32) {
    %c0_i32 = arith.constant 0 : i32
    %c0_i32_0 = arith.constant 0 : i32
    %c0_i32_1 = arith.constant 0 : i32
    return %c0_i32, %c0_i32_0 : i32, i32
  }
  func.func @transform_2(%arg0: i32) -> (i32, i32) {
    %c0_i32 = arith.constant 0 : i32
    %c0_i32_0 = arith.constant 0 : i32
    %c0_i32_1 = arith.constant 0 : i32
    return %c0_i32, %c0_i32_0 : i32, i32
  }
  func.func @transform_3(%arg0: i32) -> (i32, i32) {
    %c0_i32 = arith.constant 0 : i32
    %c0_i32_0 = arith.constant 0 : i32
    %c0_i32_1 = arith.constant 0 : i32
    return %c0_i32, %c0_i32_0 : i32, i32
  }
  func.func @transform_4(%arg0: i32) -> (i32, i32) {
    %c0_i32 = arith.constant 0 : i32
    %c0_i32_0 = arith.constant 0 : i32
    return %arg0, %c0_i32 : i32, i32
  }
}

</mosaic_0001>

<bundles_post_ra>
// kernel: rrg_fwd.48
= control target key start
LH: loop header
LB: loop body
LE: loop exit
PB: predicated region body
PF: predicated region fallthrough
CT: control target
= control target key end

     0   :  { %s872_s15 = smov 0   ;;  %s1043_s0 = inlined_call_operand.vmem [shape: bf16[512,128], index: 0, kind: input, shape index: {}]   ;;  %s1044_s1 = inlined_call_operand.vmem [shape: bf16[128,128], index: 1, kind: input, shape index: {}]   ;;  %s1045_s2 = inlined_call_operand.vmem [shape: f32[1,128], index: 2, kind: input, shape index: {}]   ;;  %s1046_s3 = inlined_call_operand.vmem [shape: f32[1,128], index: 3, kind: input, shape index: {}]   ;;  %s1047_s4 = inlined_call_operand.vmem [shape: f32[512,128], index: 4, kind: output, shape index: {}]  }
   0x1 LB: > { %s674_s16 = sadd.s32 4294967295, %s845_s15   ;;  %p678_p0 = scmp.ge.s32.totalorder %s845_s15, 1  ;;  %s845_s15 = sphi %s872_s15, %s14_s15  }
   0x2   : > { %p163_p1 = scmp.lt.s32.totalorder %s845_s15, 3 }
   0x4   : > { %p164_p2 = pnand %p678_p0, %p163_p1 }
   0x5   : > { %s679_s25 = sshll.u32 (!%p164_p2), %s674_s16, 5 }
   0x6   : > { %167 = sbr.rel (%p164_p2) target bundleno = 239 (0xef), region = 36  ;;  %p190_p3 = scmp.lt.s32.totalorder (!%p164_p2), %s679_s25, 63 }
   0xb   : > { %v804_v0 = vld [vmem:[%s1044_s1 + $0x38] sm:$0xff]  ;;  %v803_v1 = vld [vmem:[%s1044_s1 + $0x30] sm:$0xff]  ;;  %v802_v2 = vld [vmem:[%s1044_s1 + $0x28] sm:$0xff]  ;;  %s1049_s25 = smov (!%p190_p3, %s679_s25), 63 }
   0xc   : > { %397 = vmatpush.bf16.msra.mxu0 %v804_v0  ;;  %805 = vmatpush.bf16.msra.mxu1 %v804_v0  ;;  %v801_v3 = vld [vmem:[%s1044_s1 + $0x20] sm:$0xff]  ;;  %v800_v4 = vld [vmem:[%s1044_s1 + $0x18] sm:$0xff]  ;;  %v799_v5 = vld [vmem:[%s1044_s1 + $0x10] sm:$0xff]  ;;  %s680_s6 = sshll.u32 %s1049_s25, 2  ;;  %s682_s17 = sshll.u32 %s1049_s25, 3 }
   0xd   : > { %806 = vmatpush.bf16.msra.mxu2 %v804_v0  ;;  %807 = vmatpush.bf16.msra.mxu3 %v804_v0  ;;  %v798_v6 = vld [vmem:[%s1044_s1 + $0x8] sm:$0xff]  ;;  %v797_v7 = vld [vmem:[%s1044_s1] sm:$0xff]  ;;  %s910_s11 = scalar_lea.vmem %s1043_s0, %s680_s6  ;;  %s944_s20 = scalar_lea.vmem %s1047_s4, %s682_s17 }
   0xe   : > { %v781_v8 = vld [vmem:[%s910_s11] sm:$0xff]  ;;  %v782_v12 = vld [vmem:[%s910_s11 + $0x8] sm:$0xff]  ;;  %v783_v16 = vld [vmem:[%s910_s11 + $0x10] sm:$0xff] }
   0xf   : > { %v785_v9 = vld [vmem:[%s910_s11 + $0x20] sm:$0xff]  ;;  %v786_v13 = vld [vmem:[%s910_s11 + $0x28] sm:$0xff]  ;;  %v787_v17 = vld [vmem:[%s910_s11 + $0x30] sm:$0xff] }
  0x10   : > { %398 = vmatpush.bf16.msra.mxu0 %v803_v1  ;;  %808 = vmatpush.bf16.msra.mxu1 %v803_v1  ;;  %v789_v10 = vld [vmem:[%s910_s11 + $0x40] sm:$0xff]  ;;  %v790_v14 = vld [vmem:[%s910_s11 + $0x48] sm:$0xff]  ;;  %v791_v18 = vld [vmem:[%s910_s11 + $0x50] sm:$0xff] }
  0x11   : > { %809 = vmatpush.bf16.msra.mxu2 %v803_v1  ;;  %810 = vmatpush.bf16.msra.mxu3 %v803_v1  ;;  %v793_v11 = vld [vmem:[%s910_s11 + $0x60] sm:$0xff]  ;;  %v794_v15 = vld [vmem:[%s910_s11 + $0x68] sm:$0xff]  ;;  %v795_v19 = vld [vmem:[%s910_s11 + $0x70] sm:$0xff] }
  0x12   : > { %v784_v20 = vld [vmem:[%s910_s11 + $0x18] sm:$0xff]  ;;  %v931_v24 = vld [vmem:[%s1045_s2] ss:$0 sm:$0xff] }
  0x13   : > { %v788_v21 = vld [vmem:[%s910_s11 + $0x38] sm:$0xff]  ;;  %v936_v25 = vld [vmem:[%s1046_s3] ss:$0 sm:$0xff] }
  0x14   : > { %399 = vmatpush.bf16.msra.mxu0 %v802_v2  ;;  %811 = vmatpush.bf16.msra.mxu1 %v802_v2  ;;  %v792_v22 = vld [vmem:[%s910_s11 + $0x58] sm:$0xff] }
  0x15   : > { %812 = vmatpush.bf16.msra.mxu2 %v802_v2  ;;  %813 = vmatpush.bf16.msra.mxu3 %v802_v2  ;;  %v796_v23 = vld [vmem:[%s910_s11 + $0x78] sm:$0xff] }
  0x18   : > { %400 = vmatpush.bf16.msra.mxu0 %v801_v3  ;;  %814 = vmatpush.bf16.msra.mxu1 %v801_v3 }
  0x19   : > { %815 = vmatpush.bf16.msra.mxu2 %v801_v3  ;;  %816 = vmatpush.bf16.msra.mxu3 %v801_v3 }
  0x1c   : > { %401 = vmatpush.bf16.msra.mxu0 %v800_v4  ;;  %817 = vmatpush.bf16.msra.mxu1 %v800_v4 }
  0x1d   : > { %818 = vmatpush.bf16.msra.mxu2 %v800_v4  ;;  %819 = vmatpush.bf16.msra.mxu3 %v800_v4 }
  0x20   : > { %402 = vmatpush.bf16.msra.mxu0 %v799_v5  ;;  %820 = vmatpush.bf16.msra.mxu1 %v799_v5 }
  0x21   : > { %821 = vmatpush.bf16.msra.mxu2 %v799_v5  ;;  %822 = vmatpush.bf16.msra.mxu3 %v799_v5 }
  0x24   : > { %403 = vmatpush.bf16.msra.mxu0 %v798_v6  ;;  %823 = vmatpush.bf16.msra.mxu1 %v798_v6 }
  0x25   : > { %824 = vmatpush.bf16.msra.mxu2 %v798_v6  ;;  %825 = vmatpush.bf16.msra.mxu3 %v798_v6 }
  0x28   : > { %404 = vmatpush.bf16.msra.mxu0 %v797_v7  ;;  %826 = vmatpush.bf16.msra.mxu1 %v797_v7 }
  0x29   : > { %827 = vmatpush.bf16.msra.mxu2 %v797_v7  ;;  %828 = vmatpush.bf16.msra.mxu3 %v797_v7 }
  0x2b   : > { %405 = vmatmul.bf16.vlgmr.msra.gmra.mxu0 %v781_v8  ;;  %425 = vmatmul.bf16.vlgmr.msra.gmra.mxu1 %v785_v9 }
  0x2c   : > { %445 = vmatmul.bf16.vlgmr.msra.gmra.mxu2 %v789_v10  ;;  %465 = vmatmul.bf16.vlgmr.msra.gmra.mxu3 %v793_v11 }
  0x3b   : > { %410 = vmatmul.bf16.gmra.mxu0 %v782_v12  ;;  %430 = vmatmul.bf16.gmra.mxu1 %v786_v13 }
  0x3c   : > { %450 = vmatmul.bf16.gmra.mxu2 %v790_v14  ;;  %470 = vmatmul.bf16.gmra.mxu3 %v794_v15 }
  0x4b   : > { %415 = vmatmul.bf16.gmra.mxu0 %v783_v16  ;;  %435 = vmatmul.bf16.gmra.mxu1 %v787_v17 }
  0x4c   : > { %455 = vmatmul.bf16.gmra.mxu2 %v791_v18  ;;  %475 = vmatmul.bf16.gmra.mxu3 %v795_v19 }
  0x5b   : > { %420 = vmatmul.bf16.gmra.mxu0 %v784_v20  ;;  %440 = vmatmul.bf16.gmra.mxu1 %v788_v21 }
  0x5c   : > { %460 = vmatmul.bf16.gmra.mxu2 %v792_v22  ;;  %480 = vmatmul.bf16.gmra.mxu3 %v796_v23 }
  0xa8   : > { %v406_v26 = vpop.f32.mrf.mxu0  ;;  %v426_v27 = vpop.f32.mrf.mxu1 }
  0xa9   : > { %v407_v28 = vadd.f32 %v931_v24, %v406_v26  ;;  %v427_v29 = vadd.f32 %v931_v24, %v426_v27 }
  0xab   : > { %vm486_vm0 = vcmp.ge.f32.partialorder %v407_v28, 0.0  ;;  %v522_v30 = vmul.f32 %v936_v25, %v407_v28  ;;  %vm494_vm1 = vcmp.ge.f32.partialorder %v427_v29, 0.0  ;;  %v530_v31 = vmul.f32 %v936_v25, %v427_v29 }
  0xad   : > { %v554_v32 = vsel %vm486_vm0, %v407_v28, %v522_v30  ;;  %v562_v33 = vsel %vm494_vm1, %v427_v29, %v530_v31 }
  0xae   : > { %586 = vst [vmem:[%s944_s20] sm:$0xff] %v554_v32 }
  0xaf   : > { %594 = vst [vmem:[%s944_s20 + $0x40] sm:$0xff] %v562_v33  ;;  %v446_v34 = vpop.f32.mrf.mxu2  ;;  %v466_v35 = vpop.f32.mrf.mxu3 }
  0xb0   : > { %v447_v36 = vadd.f32 %v931_v24, %v446_v34  ;;  %v467_v37 = vadd.f32 %v931_v24, %v466_v35  ;;  %v408_v38 = vpop.f32.mrf.mxu0  ;;  %v428_v39 = vpop.f32.mrf.mxu1 }
  0xb1   : > { %v409_v40 = vadd.f32 %v931_v24, %v408_v38  ;;  %v429_v41 = vadd.f32 %v931_v24, %v428_v39 }
  0xb2   : > { %vm502_vm2 = vcmp.ge.f32.partialorder %v447_v36, 0.0  ;;  %v538_v42 = vmul.f32 %v936_v25, %v447_v36  ;;  %vm510_vm3 = vcmp.ge.f32.partialorder %v467_v37, 0.0  ;;  %v546_v43 = vmul.f32 %v936_v25, %v467_v37 }
  0xb3   : > { %vm487_vm4 = vcmp.ge.f32.partialorder %v409_v40, 0.0  ;;  %v523_v44 = vmul.f32 %v936_v25, %v409_v40  ;;  %vm495_vm5 = vcmp.ge.f32.partialorder %v429_v41, 0.0  ;;  %v531_v45 = vmul.f32 %v936_v25, %v429_v41 }
  0xb4   : > { %v570_v46 = vsel %vm502_vm2, %v447_v36, %v538_v42  ;;  %v578_v47 = vsel %vm510_vm3, %v467_v37, %v546_v43 }
  0xb5   : > { %602 = vst [vmem:[%s944_s20 + $0x80] sm:$0xff] %v570_v46  ;;  %v555_v48 = vsel %vm487_vm4, %v409_v40, %v523_v44  ;;  %v563_v49 = vsel %vm495_vm5, %v429_v41, %v531_v45 }
  0xb6   : > { %610 = vst [vmem:[%s944_s20 + $0xc0] sm:$0xff] %v578_v47 }
  0xb7   : > { %587 = vst [vmem:[%s944_s20 + $0x8] sm:$0xff] %v555_v48  ;;  %v448_v50 = vpop.f32.mrf.mxu2  ;;  %v468_v51 = vpop.f32.mrf.mxu3 }
  0xb8   : > { %595 = vst [vmem:[%s944_s20 + $0x48] sm:$0xff] %v563_v49  ;;  %v449_v52 = vadd.f32 %v931_v24, %v448_v50  ;;  %v469_v53 = vadd.f32 %v931_v24, %v468_v51  ;;  %v411_v54 = vpop.f32.mrf.mxu0  ;;  %v431_v55 = vpop.f32.mrf.mxu1 }
  0xb9   : > { %v412_v56 = vadd.f32 %v931_v24, %v411_v54  ;;  %v432_v57 = vadd.f32 %v931_v24, %v431_v55 }
  0xba   : > { %vm503_vm6 = vcmp.ge.f32.partialorder %v449_v52, 0.0  ;;  %v539_v58 = vmul.f32 %v936_v25, %v449_v52  ;;  %vm511_vm7 = vcmp.ge.f32.partialorder %v469_v53, 0.0  ;;  %v547_v59 = vmul.f32 %v936_v25, %v469_v53 }
  0xbb   : > { %vm488_vm8 = vcmp.ge.f32.partialorder %v412_v56, 0.0  ;;  %v524_v60 = vmul.f32 %v936_v25, %v412_v56  ;;  %vm496_vm9 = vcmp.ge.f32.partialorder %v432_v57, 0.0  ;;  %v532_v61 = vmul.f32 %v936_v25, %v432_v57 }
  0xbc   : > { %v571_v62 = vsel %vm503_vm6, %v449_v52, %v539_v58  ;;  %v579_v63 = vsel %vm511_vm7, %v469_v53, %v547_v59 }
  0xbd   : > { %603 = vst [vmem:[%s944_s20 + $0x88] sm:$0xff] %v571_v62  ;;  %v556_v0 = vsel %vm488_vm8, %v412_v56, %v524_v60  ;;  %v564_v1 = vsel %vm496_vm9, %v432_v57, %v532_v61 }
  0xbe   : > { %611 = vst [vmem:[%s944_s20 + $0xc8] sm:$0xff] %v579_v63 }
  0xbf   : > { %588 = vst [vmem:[%s944_s20 + $0x10] sm:$0xff] %v556_v0  ;;  %v451_v2 = vpop.f32.mrf.mxu2  ;;  %v471_v3 = vpop.f32.mrf.mxu3 }
  0xc0   : > { %596 = vst [vmem:[%s944_s20 + $0x50] sm:$0xff] %v564_v1  ;;  %v452_v4 = vadd.f32 %v931_v24, %v451_v2  ;;  %v472_v5 = vadd.f32 %v931_v24, %v471_v3  ;;  %v413_v6 = vpop.f32.mrf.mxu0  ;;  %v433_v7 = vpop.f32.mrf.mxu1 }
  0xc1   : > { %v414_v8 = vadd.f32 %v931_v24, %v413_v6  ;;  %v434_v9 = vadd.f32 %v931_v24, %v433_v7 }
  0xc2   : > { %vm504_vm10 = vcmp.ge.f32.partialorder %v452_v4, 0.0  ;;  %v540_v10 = vmul.f32 %v936_v25, %v452_v4  ;;  %vm512_vm11 = vcmp.ge.f32.partialorder %v472_v5, 0.0  ;;  %v548_v11 = vmul.f32 %v936_v25, %v472_v5 }
  0xc3   : > { %vm489_vm12 = vcmp.ge.f32.partialorder %v414_v8, 0.0  ;;  %v525_v12 = vmul.f32 %v936_v25, %v414_v8  ;;  %vm497_vm13 = vcmp.ge.f32.partialorder %v434_v9, 0.0  ;;  %v533_v13 = vmul.f32 %v936_v25, %v434_v9 }
  0xc4   : > { %v572_v14 = vsel %vm504_vm10, %v452_v4, %v540_v10  ;;  %v580_v15 = vsel %vm512_vm11, %v472_v5, %v548_v11 }
  0xc5   : > { %604 = vst [vmem:[%s944_s20 + $0x90] sm:$0xff] %v572_v14  ;;  %v557_v16 = vsel %vm489_vm12, %v414_v8, %v525_v12  ;;  %v565_v17 = vsel %vm497_vm13, %v434_v9, %v533_v13 }
  0xc6   : > { %612 = vst [vmem:[%s944_s20 + $0xd0] sm:$0xff] %v580_v15 }
  0xc7   : > { %589 = vst [vmem:[%s944_s20 + $0x18] sm:$0xff] %v557_v16  ;;  %v453_v18 = vpop.f32.mrf.mxu2  ;;  %v473_v19 = vpop.f32.mrf.mxu3 }
  0xc8   : > { %597 = vst [vmem:[%s944_s20 + $0x58] sm:$0xff] %v565_v17  ;;  %v454_v20 = vadd.f32 %v931_v24, %v453_v18  ;;  %v474_v21 = vadd.f32 %v931_v24, %v473_v19  ;;  %v416_v22 = vpop.f32.mrf.mxu0  ;;  %v436_v23 = vpop.f32.mrf.mxu1 }
  0xc9   : > { %v417_v26 = vadd.f32 %v931_v24, %v416_v22  ;;  %v437_v27 = vadd.f32 %v931_v24, %v436_v23 }
  0xca   : > { %vm505_vm14 = vcmp.ge.f32.partialorder %v454_v20, 0.0  ;;  %v541_v28 = vmul.f32 %v936_v25, %v454_v20  ;;  %vm513_vm15 = vcmp.ge.f32.partialorder %v474_v21, 0.0  ;;  %v549_v29 = vmul.f32 %v936_v25, %v474_v21 }
  0xcb   : > { %vm490_vm0 = vcmp.ge.f32.partialorder %v417_v26, 0.0  ;;  %v526_v30 = vmul.f32 %v936_v25, %v417_v26  ;;  %vm498_vm1 = vcmp.ge.f32.partialorder %v437_v27, 0.0  ;;  %v534_v31 = vmul.f32 %v936_v25, %v437_v27 }
  0xcc   : > { %v573_v32 = vsel %vm505_vm14, %v454_v20, %v541_v28  ;;  %v581_v33 = vsel %vm513_vm15, %v474_v21, %v549_v29 }
  0xcd   : > { %605 = vst [vmem:[%s944_s20 + $0x98] sm:$0xff] %v573_v32  ;;  %v558_v34 = vsel %vm490_vm0, %v417_v26, %v526_v30  ;;  %v566_v35 = vsel %vm498_vm1, %v437_v27, %v534_v31 }
  0xce   : > { %613 = vst [vmem:[%s944_s20 + $0xd8] sm:$0xff] %v581_v33 }
  0xcf   : > { %590 = vst [vmem:[%s944_s20 + $0x20] sm:$0xff] %v558_v34  ;;  %v456_v36 = vpop.f32.mrf.mxu2  ;;  %v476_v37 = vpop.f32.mrf.mxu3 }
  0xd0   : > { %598 = vst [vmem:[%s944_s20 + $0x60] sm:$0xff] %v566_v35  ;;  %v457_v38 = vadd.f32 %v931_v24, %v456_v36  ;;  %v477_v39 = vadd.f32 %v931_v24, %v476_v37  ;;  %v418_v40 = vpop.f32.mrf.mxu0  ;;  %v438_v41 = vpop.f32.mrf.mxu1 }
  0xd1   : > { %v419_v42 = vadd.f32 %v931_v24, %v418_v40  ;;  %v439_v43 = vadd.f32 %v931_v24, %v438_v41 }
  0xd2   : > { %vm506_vm2 = vcmp.ge.f32.partialorder %v457_v38, 0.0  ;;  %v542_v44 = vmul.f32 %v936_v25, %v457_v38  ;;  %vm514_vm3 = vcmp.ge.f32.partialorder %v477_v39, 0.0  ;;  %v550_v45 = vmul.f32 %v936_v25, %v477_v39 }
  0xd3   : > { %vm491_vm4 = vcmp.ge.f32.partialorder %v419_v42, 0.0  ;;  %v527_v46 = vmul.f32 %v936_v25, %v419_v42  ;;  %vm499_vm5 = vcmp.ge.f32.partialorder %v439_v43, 0.0  ;;  %v535_v47 = vmul.f32 %v936_v25, %v439_v43 }
  0xd4   : > { %v574_v48 = vsel %vm506_vm2, %v457_v38, %v542_v44  ;;  %v582_v49 = vsel %vm514_vm3, %v477_v39, %v550_v45 }
  0xd5   : > { %606 = vst [vmem:[%s944_s20 + $0xa0] sm:$0xff] %v574_v48  ;;  %v559_v50 = vsel %vm491_vm4, %v419_v42, %v527_v46  ;;  %v567_v51 = vsel %vm499_vm5, %v439_v43, %v535_v47 }
  0xd6   : > { %614 = vst [vmem:[%s944_s20 + $0xe0] sm:$0xff] %v582_v49 }
  0xd7   : > { %591 = vst [vmem:[%s944_s20 + $0x28] sm:$0xff] %v559_v50  ;;  %v458_v52 = vpop.f32.mrf.mxu2  ;;  %v478_v53 = vpop.f32.mrf.mxu3 }
  0xd8   : > { %599 = vst [vmem:[%s944_s20 + $0x68] sm:$0xff] %v567_v51  ;;  %v459_v54 = vadd.f32 %v931_v24, %v458_v52  ;;  %v479_v55 = vadd.f32 %v931_v24, %v478_v53  ;;  %v421_v56 = vpop.f32.mrf.mxu0  ;;  %v441_v57 = vpop.f32.mrf.mxu1 }
  0xd9   : > { %v422_v58 = vadd.f32 %v931_v24, %v421_v56  ;;  %v442_v59 = vadd.f32 %v931_v24, %v441_v57 }
  0xda   : > { %vm507_vm6 = vcmp.ge.f32.partialorder %v459_v54, 0.0  ;;  %v543_v60 = vmul.f32 %v936_v25, %v459_v54  ;;  %vm515_vm7 = vcmp.ge.f32.partialorder %v479_v55, 0.0  ;;  %v551_v61 = vmul.f32 %v936_v25, %v479_v55 }
  0xdb   : > { %vm492_vm8 = vcmp.ge.f32.partialorder %v422_v58, 0.0  ;;  %v528_v62 = vmul.f32 %v936_v25, %v422_v58  ;;  %vm500_vm9 = vcmp.ge.f32.partialorder %v442_v59, 0.0  ;;  %v536_v63 = vmul.f32 %v936_v25, %v442_v59 }
  0xdc   : > { %v575_v0 = vsel %vm507_vm6, %v459_v54, %v543_v60  ;;  %v583_v1 = vsel %vm515_vm7, %v479_v55, %v551_v61 }
  0xdd   : > { %607 = vst [vmem:[%s944_s20 + $0xa8] sm:$0xff] %v575_v0  ;;  %v560_v2 = vsel %vm492_vm8, %v422_v58, %v528_v62  ;;  %v568_v3 = vsel %vm500_vm9, %v442_v59, %v536_v63 }
  0xde   : > { %615 = vst [vmem:[%s944_s20 + $0xe8] sm:$0xff] %v583_v1 }
  0xdf   : > { %592 = vst [vmem:[%s944_s20 + $0x30] sm:$0xff] %v560_v2  ;;  %v461_v4 = vpop.f32.mrf.mxu2  ;;  %v481_v5 = vpop.f32.mrf.mxu3 }
  0xe0   : > { %600 = vst [vmem:[%s944_s20 + $0x70] sm:$0xff] %v568_v3  ;;  %v462_v6 = vadd.f32 %v931_v24, %v461_v4  ;;  %v482_v7 = vadd.f32 %v931_v24, %v481_v5  ;;  %v423_v8 = vpop.f32.mrf.mxu0  ;;  %v443_v9 = vpop.f32.mrf.mxu1 }
  0xe1   : > { %v424_v10 = vadd.f32 %v931_v24, %v423_v8  ;;  %v444_v11 = vadd.f32 %v931_v24, %v443_v9 }
  0xe2   : > { %vm508_vm10 = vcmp.ge.f32.partialorder %v462_v6, 0.0  ;;  %v544_v12 = vmul.f32 %v936_v25, %v462_v6  ;;  %vm516_vm11 = vcmp.ge.f32.partialorder %v482_v7, 0.0  ;;  %v552_v13 = vmul.f32 %v936_v25, %v482_v7 }
  0xe3   : > { %vm493_vm12 = vcmp.ge.f32.partialorder %v424_v10, 0.0  ;;  %v529_v14 = vmul.f32 %v936_v25, %v424_v10  ;;  %vm501_vm13 = vcmp.ge.f32.partialorder %v444_v11, 0.0  ;;  %v537_v15 = vmul.f32 %v936_v25, %v444_v11 }
  0xe4   : > { %v576_v16 = vsel %vm508_vm10, %v462_v6, %v544_v12  ;;  %v584_v17 = vsel %vm516_vm11, %v482_v7, %v552_v13 }
  0xe5   : > { %608 = vst [vmem:[%s944_s20 + $0xb0] sm:$0xff] %v576_v16  ;;  %v561_v18 = vsel %vm493_vm12, %v424_v10, %v529_v14  ;;  %v569_v19 = vsel %vm501_vm13, %v444_v11, %v537_v15 }
  0xe6   : > { %616 = vst [vmem:[%s944_s20 + $0xf0] sm:$0xff] %v584_v17 }
  0xe7   : > { %593 = vst [vmem:[%s944_s20 + $0x38] sm:$0xff] %v561_v18  ;;  %v463_v20 = vpop.f32.mrf.mxu2  ;;  %v483_v21 = vpop.f32.mrf.mxu3 }
  0xe8   : > { %601 = vst [vmem:[%s944_s20 + $0x78] sm:$0xff] %v569_v19  ;;  %v464_v22 = vadd.f32 %v931_v24, %v463_v20  ;;  %v484_v23 = vadd.f32 %v931_v24, %v483_v21 }
  0xea   : > { %vm509_vm14 = vcmp.ge.f32.partialorder %v464_v22, 0.0  ;;  %v545_v26 = vmul.f32 %v936_v25, %v464_v22  ;;  %vm517_vm15 = vcmp.ge.f32.partialorder %v484_v23, 0.0  ;;  %v553_v27 = vmul.f32 %v936_v25, %v484_v23 }
  0xec   : > { %v577_v28 = vsel %vm509_vm14, %v464_v22, %v545_v26  ;;  %v585_v29 = vsel %vm517_vm15, %v484_v23, %v553_v27 }
  0xed   : > { %609 = vst [vmem:[%s944_s20 + $0xb8] sm:$0xff] %v577_v28 }
  0xee   : > { %617 = vst [vmem:[%s944_s20 + $0xf8] sm:$0xff] %v585_v29 }
  0xef PF: > { %s14_s15 = sadd.s32 1, %s845_s15  }
  0xf0   : > { %p11_p4 = scmp.ge.s32.totalorder %s14_s15, 4  }
  0xf2   :  { %13 = sbr.rel (!%p11_p4) target bundleno = 1 (0x1), region = 66 }

// kernel: rrg_fwd.49
= control target key start
LH: loop header
LB: loop body
LE: loop exit
PB: predicated region body
PF: predicated region fallthrough
CT: control target
= control target key end

     0   :  { %s739_s12 = smov 0   ;;  %s873_s0 = inlined_call_operand.vmem [shape: bf16[512,128], index: 0, kind: input, shape index: {}]   ;;  %s874_s1 = inlined_call_operand.vmem [shape: bf16[128,128], index: 1, kind: input, shape index: {}]   ;;  %s875_s2 = inlined_call_operand.vmem [shape: f32[1,128], index: 2, kind: input, shape index: {}]   ;;  %s876_s3 = inlined_call_operand.vmem [shape: f32[512,128], index: 3, kind: output, shape index: {}]  }
   0x1 LB: > { %s547_s13 = sadd.s32 4294967295, %s717_s12   ;;  %p551_p0 = scmp.ge.s32.totalorder %s717_s12, 1  ;;  %s717_s12 = sphi %s739_s12, %s13_s12  }
   0x2   : > { %p138_p1 = scmp.lt.s32.totalorder %s717_s12, 3 }
   0x4   : > { %p139_p2 = pnand %p551_p0, %p138_p1 }
   0x5   : > { %s552_s22 = sshll.u32 (!%p139_p2), %s547_s13, 5 }
   0x6   : > { %142 = sbr.rel (%p139_p2) target bundleno = 236 (0xec), region = 32  ;;  %p163_p3 = scmp.lt.s32.totalorder (!%p139_p2), %s552_s22, 63 }
   0xb   : > { %v677_v0 = vld [vmem:[%s874_s1 + $0x38] sm:$0xff]  ;;  %v676_v1 = vld [vmem:[%s874_s1 + $0x30] sm:$0xff]  ;;  %v675_v2 = vld [vmem:[%s874_s1 + $0x28] sm:$0xff]  ;;  %s878_s22 = smov (!%p163_p3, %s552_s22), 63 }
   0xc   : > { %370 = vmatpush.bf16.msra.mxu0 %v677_v0  ;;  %678 = vmatpush.bf16.msra.mxu1 %v677_v0  ;;  %v674_v3 = vld [vmem:[%s874_s1 + $0x20] sm:$0xff]  ;;  %v673_v4 = vld [vmem:[%s874_s1 + $0x18] sm:$0xff]  ;;  %v672_v5 = vld [vmem:[%s874_s1 + $0x10] sm:$0xff]  ;;  %s553_s29 = sshll.u32 %s878_s22, 2  ;;  %s555_s8 = sshll.u32 %s878_s22, 3 }
   0xd   : > { %679 = vmatpush.bf16.msra.mxu2 %v677_v0  ;;  %680 = vmatpush.bf16.msra.mxu3 %v677_v0  ;;  %v671_v6 = vld [vmem:[%s874_s1 + $0x8] sm:$0xff]  ;;  %v670_v7 = vld [vmem:[%s874_s1] sm:$0xff]  ;;  %s777_s7 = scalar_lea.vmem %s873_s0, %s553_s29  ;;  %s804_s14 = scalar_lea.vmem %s876_s3, %s555_s8 }
   0xe   : > { %v654_v8 = vld [vmem:[%s777_s7] sm:$0xff]  ;;  %v655_v12 = vld [vmem:[%s777_s7 + $0x8] sm:$0xff]  ;;  %v656_v16 = vld [vmem:[%s777_s7 + $0x10] sm:$0xff] }
   0xf   : > { %v658_v9 = vld [vmem:[%s777_s7 + $0x20] sm:$0xff]  ;;  %v659_v13 = vld [vmem:[%s777_s7 + $0x28] sm:$0xff]  ;;  %v660_v17 = vld [vmem:[%s777_s7 + $0x30] sm:$0xff] }
  0x10   : > { %371 = vmatpush.bf16.msra.mxu0 %v676_v1  ;;  %681 = vmatpush.bf16.msra.mxu1 %v676_v1  ;;  %v662_v10 = vld [vmem:[%s777_s7 + $0x40] sm:$0xff]  ;;  %v663_v14 = vld [vmem:[%s777_s7 + $0x48] sm:$0xff]  ;;  %v664_v18 = vld [vmem:[%s777_s7 + $0x50] sm:$0xff] }
  0x11   : > { %682 = vmatpush.bf16.msra.mxu2 %v676_v1  ;;  %683 = vmatpush.bf16.msra.mxu3 %v676_v1  ;;  %v666_v11 = vld [vmem:[%s777_s7 + $0x60] sm:$0xff]  ;;  %v667_v15 = vld [vmem:[%s777_s7 + $0x68] sm:$0xff]  ;;  %v668_v19 = vld [vmem:[%s777_s7 + $0x70] sm:$0xff] }
  0x12   : > { %v657_v20 = vld [vmem:[%s777_s7 + $0x18] sm:$0xff]  ;;  %v799_v24 = vld [vmem:[%s875_s2] ss:$0 sm:$0xff] }
  0x13   : > { %v661_v21 = vld [vmem:[%s777_s7 + $0x38] sm:$0xff] }
  0x14   : > { %372 = vmatpush.bf16.msra.mxu0 %v675_v2  ;;  %684 = vmatpush.bf16.msra.mxu1 %v675_v2  ;;  %v665_v22 = vld [vmem:[%s777_s7 + $0x58] sm:$0xff] }
  0x15   : > { %685 = vmatpush.bf16.msra.mxu2 %v675_v2  ;;  %686 = vmatpush.bf16.msra.mxu3 %v675_v2  ;;  %v669_v23 = vld [vmem:[%s777_s7 + $0x78] sm:$0xff] }
  0x18   : > { %373 = vmatpush.bf16.msra.mxu0 %v674_v3  ;;  %687 = vmatpush.bf16.msra.mxu1 %v674_v3 }
  0x19   : > { %688 = vmatpush.bf16.msra.mxu2 %v674_v3  ;;  %689 = vmatpush.bf16.msra.mxu3 %v674_v3 }
  0x1c   : > { %374 = vmatpush.bf16.msra.mxu0 %v673_v4  ;;  %690 = vmatpush.bf16.msra.mxu1 %v673_v4 }
  0x1d   : > { %691 = vmatpush.bf16.msra.mxu2 %v673_v4  ;;  %692 = vmatpush.bf16.msra.mxu3 %v673_v4 }
  0x20   : > { %375 = vmatpush.bf16.msra.mxu0 %v672_v5  ;;  %693 = vmatpush.bf16.msra.mxu1 %v672_v5 }
  0x21   : > { %694 = vmatpush.bf16.msra.mxu2 %v672_v5  ;;  %695 = vmatpush.bf16.msra.mxu3 %v672_v5 }
  0x24   : > { %376 = vmatpush.bf16.msra.mxu0 %v671_v6  ;;  %696 = vmatpush.bf16.msra.mxu1 %v671_v6 }
  0x25   : > { %697 = vmatpush.bf16.msra.mxu2 %v671_v6  ;;  %698 = vmatpush.bf16.msra.mxu3 %v671_v6 }
  0x28   : > { %377 = vmatpush.bf16.msra.mxu0 %v670_v7  ;;  %699 = vmatpush.bf16.msra.mxu1 %v670_v7 }
  0x29   : > { %700 = vmatpush.bf16.msra.mxu2 %v670_v7  ;;  %701 = vmatpush.bf16.msra.mxu3 %v670_v7 }
  0x2b   : > { %378 = vmatmul.bf16.vlgmr.msra.gmra.mxu0 %v654_v8  ;;  %398 = vmatmul.bf16.vlgmr.msra.gmra.mxu1 %v658_v9 }
  0x2c   : > { %418 = vmatmul.bf16.vlgmr.msra.gmra.mxu2 %v662_v10  ;;  %438 = vmatmul.bf16.vlgmr.msra.gmra.mxu3 %v666_v11 }
  0x3b   : > { %383 = vmatmul.bf16.gmra.mxu0 %v655_v12  ;;  %403 = vmatmul.bf16.gmra.mxu1 %v659_v13 }
  0x3c   : > { %423 = vmatmul.bf16.gmra.mxu2 %v663_v14  ;;  %443 = vmatmul.bf16.gmra.mxu3 %v667_v15 }
  0x4b   : > { %388 = vmatmul.bf16.gmra.mxu0 %v656_v16  ;;  %408 = vmatmul.bf16.gmra.mxu1 %v660_v17 }
  0x4c   : > { %428 = vmatmul.bf16.gmra.mxu2 %v664_v18  ;;  %448 = vmatmul.bf16.gmra.mxu3 %v668_v19 }
  0x5b   : > { %393 = vmatmul.bf16.gmra.mxu0 %v657_v20  ;;  %413 = vmatmul.bf16.gmra.mxu1 %v661_v21 }
  0x5c   : > { %433 = vmatmul.bf16.gmra.mxu2 %v665_v22  ;;  %453 = vmatmul.bf16.gmra.mxu3 %v669_v23 }
  0xa8   : > { %v379_v25 = vpop.f32.mrf.mxu0  ;;  %v399_v26 = vpop.f32.mrf.mxu1 }
  0xa9   : > { %v380_v27 = vadd.f32 %v799_v24, %v379_v25  ;;  %v400_v28 = vadd.f32 %v799_v24, %v399_v26 }
  0xab   : > { %459 = vst [vmem:[%s804_s14] sm:$0xff] %v380_v27 }
  0xac   : > { %467 = vst [vmem:[%s804_s14 + $0x40] sm:$0xff] %v400_v28 }
  0xaf   : > { %v419_v29 = vpop.f32.mrf.mxu2  ;;  %v439_v30 = vpop.f32.mrf.mxu3 }
  0xb0   : > { %v420_v31 = vadd.f32 %v799_v24, %v419_v29  ;;  %v440_v32 = vadd.f32 %v799_v24, %v439_v30  ;;  %v381_v33 = vpop.f32.mrf.mxu0  ;;  %v401_v34 = vpop.f32.mrf.mxu1 }
  0xb1   : > { %v382_v35 = vadd.f32 %v799_v24, %v381_v33  ;;  %v402_v36 = vadd.f32 %v799_v24, %v401_v34 }
  0xb2   : > { %475 = vst [vmem:[%s804_s14 + $0x80] sm:$0xff] %v420_v31 }
  0xb3   : > { %483 = vst [vmem:[%s804_s14 + $0xc0] sm:$0xff] %v440_v32 }
  0xb4   : > { %460 = vst [vmem:[%s804_s14 + $0x8] sm:$0xff] %v382_v35 }
  0xb5   : > { %468 = vst [vmem:[%s804_s14 + $0x48] sm:$0xff] %v402_v36 }
  0xb7   : > { %v421_v37 = vpop.f32.mrf.mxu2  ;;  %v441_v38 = vpop.f32.mrf.mxu3 }
  0xb8   : > { %v422_v39 = vadd.f32 %v799_v24, %v421_v37  ;;  %v442_v40 = vadd.f32 %v799_v24, %v441_v38  ;;  %v384_v41 = vpop.f32.mrf.mxu0  ;;  %v404_v42 = vpop.f32.mrf.mxu1 }
  0xb9   : > { %v385_v43 = vadd.f32 %v799_v24, %v384_v41  ;;  %v405_v44 = vadd.f32 %v799_v24, %v404_v42 }
  0xba   : > { %476 = vst [vmem:[%s804_s14 + $0x88] sm:$0xff] %v422_v39 }
  0xbb   : > { %484 = vst [vmem:[%s804_s14 + $0xc8] sm:$0xff] %v442_v40 }
  0xbc   : > { %461 = vst [vmem:[%s804_s14 + $0x10] sm:$0xff] %v385_v43 }
  0xbd   : > { %469 = vst [vmem:[%s804_s14 + $0x50] sm:$0xff] %v405_v44 }
  0xbf   : > { %v424_v45 = vpop.f32.mrf.mxu2  ;;  %v444_v46 = vpop.f32.mrf.mxu3 }
  0xc0   : > { %v425_v47 = vadd.f32 %v799_v24, %v424_v45  ;;  %v445_v48 = vadd.f32 %v799_v24, %v444_v46  ;;  %v386_v49 = vpop.f32.mrf.mxu0  ;;  %v406_v50 = vpop.f32.mrf.mxu1 }
  0xc1   : > { %v387_v51 = vadd.f32 %v799_v24, %v386_v49  ;;  %v407_v52 = vadd.f32 %v799_v24, %v406_v50 }
  0xc2   : > { %477 = vst [vmem:[%s804_s14 + $0x90] sm:$0xff] %v425_v47 }
  0xc3   : > { %485 = vst [vmem:[%s804_s14 + $0xd0] sm:$0xff] %v445_v48 }
  0xc4   : > { %462 = vst [vmem:[%s804_s14 + $0x18] sm:$0xff] %v387_v51 }
  0xc5   : > { %470 = vst [vmem:[%s804_s14 + $0x58] sm:$0xff] %v407_v52 }
  0xc7   : > { %v426_v53 = vpop.f32.mrf.mxu2  ;;  %v446_v54 = vpop.f32.mrf.mxu3 }
  0xc8   : > { %v427_v55 = vadd.f32 %v799_v24, %v426_v53  ;;  %v447_v56 = vadd.f32 %v799_v24, %v446_v54  ;;  %v389_v57 = vpop.f32.mrf.mxu0  ;;  %v409_v58 = vpop.f32.mrf.mxu1 }
  0xc9   : > { %v390_v59 = vadd.f32 %v799_v24, %v389_v57  ;;  %v410_v60 = vadd.f32 %v799_v24, %v409_v58 }
  0xca   : > { %478 = vst [vmem:[%s804_s14 + $0x98] sm:$0xff] %v427_v55 }
  0xcb   : > { %486 = vst [vmem:[%s804_s14 + $0xd8] sm:$0xff] %v447_v56 }
  0xcc   : > { %463 = vst [vmem:[%s804_s14 + $0x20] sm:$0xff] %v390_v59 }
  0xcd   : > { %471 = vst [vmem:[%s804_s14 + $0x60] sm:$0xff] %v410_v60 }
  0xcf   : > { %v429_v61 = vpop.f32.mrf.mxu2  ;;  %v449_v62 = vpop.f32.mrf.mxu3 }
  0xd0   : > { %v430_v63 = vadd.f32 %v799_v24, %v429_v61  ;;  %v450_v0 = vadd.f32 %v799_v24, %v449_v62  ;;  %v391_v1 = vpop.f32.mrf.mxu0  ;;  %v411_v2 = vpop.f32.mrf.mxu1 }
  0xd1   : > { %v392_v3 = vadd.f32 %v799_v24, %v391_v1  ;;  %v412_v4 = vadd.f32 %v799_v24, %v411_v2 }
  0xd2   : > { %479 = vst [vmem:[%s804_s14 + $0xa0] sm:$0xff] %v430_v63 }
  0xd3   : > { %487 = vst [vmem:[%s804_s14 + $0xe0] sm:$0xff] %v450_v0 }
  0xd4   : > { %464 = vst [vmem:[%s804_s14 + $0x28] sm:$0xff] %v392_v3 }
  0xd5   : > { %472 = vst [vmem:[%s804_s14 + $0x68] sm:$0xff] %v412_v4 }
  0xd7   : > { %v431_v5 = vpop.f32.mrf.mxu2  ;;  %v451_v6 = vpop.f32.mrf.mxu3 }
  0xd8   : > { %v432_v7 = vadd.f32 %v799_v24, %v431_v5  ;;  %v452_v8 = vadd.f32 %v799_v24, %v451_v6  ;;  %v394_v9 = vpop.f32.mrf.mxu0  ;;  %v414_v10 = vpop.f32.mrf.mxu1 }
  0xd9   : > { %v395_v11 = vadd.f32 %v799_v24, %v394_v9  ;;  %v415_v12 = vadd.f32 %v799_v24, %v414_v10 }
  0xda   : > { %480 = vst [vmem:[%s804_s14 + $0xa8] sm:$0xff] %v432_v7 }
  0xdb   : > { %488 = vst [vmem:[%s804_s14 + $0xe8] sm:$0xff] %v452_v8 }
  0xdc   : > { %465 = vst [vmem:[%s804_s14 + $0x30] sm:$0xff] %v395_v11 }
  0xdd   : > { %473 = vst [vmem:[%s804_s14 + $0x70] sm:$0xff] %v415_v12 }
  0xdf   : > { %v434_v13 = vpop.f32.mrf.mxu2  ;;  %v454_v14 = vpop.f32.mrf.mxu3 }
  0xe0   : > { %v435_v15 = vadd.f32 %v799_v24, %v434_v13  ;;  %v455_v16 = vadd.f32 %v799_v24, %v454_v14  ;;  %v396_v17 = vpop.f32.mrf.mxu0  ;;  %v416_v18 = vpop.f32.mrf.mxu1 }
  0xe1   : > { %v397_v19 = vadd.f32 %v799_v24, %v396_v17  ;;  %v417_v20 = vadd.f32 %v799_v24, %v416_v18 }
  0xe2   : > { %481 = vst [vmem:[%s804_s14 + $0xb0] sm:$0xff] %v435_v15 }
  0xe3   : > { %489 = vst [vmem:[%s804_s14 + $0xf0] sm:$0xff] %v455_v16 }
  0xe4   : > { %466 = vst [vmem:[%s804_s14 + $0x38] sm:$0xff] %v397_v19 }
  0xe5   : > { %474 = vst [vmem:[%s804_s14 + $0x78] sm:$0xff] %v417_v20 }
  0xe7   : > { %v436_v21 = vpop.f32.mrf.mxu2  ;;  %v456_v22 = vpop.f32.mrf.mxu3 }
  0xe8   : > { %v437_v23 = vadd.f32 %v799_v24, %v436_v21  ;;  %v457_v25 = vadd.f32 %v799_v24, %v456_v22 }
  0xea   : > { %482 = vst [vmem:[%s804_s14 + $0xb8] sm:$0xff] %v437_v23 }
  0xeb   : > { %490 = vst [vmem:[%s804_s14 + $0xf8] sm:$0xff] %v457_v25 }
  0xec PF: > { %s13_s12 = sadd.s32 1, %s717_s12  }
  0xed   : > { %p10_p4 = scmp.ge.s32.totalorder %s13_s12, 4  }
  0xef   :  { %12 = sbr.rel (!%p10_p4) target bundleno = 1 (0x1), region = 62 }

// kernel: rrg_fwd.50
= control target key start
LH: loop header
LB: loop body
LE: loop exit
PB: predicated region body
PF: predicated region fallthrough
CT: control target
= control target key end

     0   :  { %s1508_s12 = smov 0   ;;  %s2070_s0 = inlined_call_operand.vmem [shape: bf16[512,128], index: 0, kind: input, shape index: {}]   ;;  %s2071_s1 = inlined_call_operand.vmem [shape: bf16[128,128], index: 1, kind: input, shape index: {}]   ;;  %s2072_s2 = inlined_call_operand.vmem [shape: f32[1,128], index: 2, kind: input, shape index: {}]   ;;  %s2073_s3 = inlined_call_operand.vmem [shape: f32[512,128], index: 3, kind: output, shape index: {}]  }
   0x1 LB: > { %s1155_s13 = sadd.s32 4294967295, %s1486_s12   ;;  %p1159_p0 = scmp.ge.s32.totalorder %s1486_s12, 1  ;;  %s1486_s12 = sphi %s1508_s12, %s13_s12  }
   0x2   : > { %p138_p1 = scmp.lt.s32.totalorder %s1486_s12, 3 }
   0x4   : > { %p139_p2 = pnand %p1159_p0, %p138_p1 }
   0x5   : > { %s1160_s22 = sshll.u32 (!%p139_p2), %s1155_s13, 5 }
   0x6   : > { %142 = sbr.rel (%p139_p2) target bundleno = 323 (0x143), region = 32  ;;  %p163_p3 = scmp.lt.s32.totalorder (!%p139_p2), %s1160_s22, 63 }
   0xb   : > { %v1317_v0 = vld [vmem:[%s2071_s1 + $0x38] sm:$0xff]  ;;  %v1316_v1 = vld [vmem:[%s2071_s1 + $0x30] sm:$0xff]  ;;  %v1315_v2 = vld [vmem:[%s2071_s1 + $0x28] sm:$0xff]  ;;  %s2121_s22 = smov (!%p163_p3, %s1160_s22), 63 }
   0xc   : > { %370 = vmatpush.bf16.msra.mxu0 %v1317_v0  ;;  %1318 = vmatpush.bf16.msra.mxu1 %v1317_v0  ;;  %v1314_v3 = vld [vmem:[%s2071_s1 + $0x20] sm:$0xff]  ;;  %v1313_v4 = vld [vmem:[%s2071_s1 + $0x18] sm:$0xff]  ;;  %v1312_v5 = vld [vmem:[%s2071_s1 + $0x10] sm:$0xff]  ;;  %s1161_s29 = sshll.u32 %s2121_s22, 2  ;;  %s1163_s10 = sshll.u32 %s2121_s22, 3 }
   0xd   : > { %1319 = vmatpush.bf16.msra.mxu2 %v1317_v0  ;;  %1320 = vmatpush.bf16.msra.mxu3 %v1317_v0  ;;  %v1311_v6 = vld [vmem:[%s2071_s1 + $0x8] sm:$0xff]  ;;  %v1310_v7 = vld [vmem:[%s2071_s1] sm:$0xff]  ;;  %s1546_s7 = scalar_lea.vmem %s2070_s0, %s1161_s29  ;;  %s1622_s14 = scalar_lea.vmem %s2073_s3, %s1163_s10 }
   0xe   : > { %v1294_v8 = vld [vmem:[%s1546_s7] sm:$0xff]  ;;  %v1295_v12 = vld [vmem:[%s1546_s7 + $0x8] sm:$0xff]  ;;  %v1296_v16 = vld [vmem:[%s1546_s7 + $0x10] sm:$0xff] }
   0xf   : > { %v1298_v9 = vld [vmem:[%s1546_s7 + $0x20] sm:$0xff]  ;;  %v1299_v13 = vld [vmem:[%s1546_s7 + $0x28] sm:$0xff]  ;;  %v1300_v17 = vld [vmem:[%s1546_s7 + $0x30] sm:$0xff] }
  0x10   : > { %371 = vmatpush.bf16.msra.mxu0 %v1316_v1  ;;  %1321 = vmatpush.bf16.msra.mxu1 %v1316_v1  ;;  %v1302_v10 = vld [vmem:[%s1546_s7 + $0x40] sm:$0xff]  ;;  %v1303_v14 = vld [vmem:[%s1546_s7 + $0x48] sm:$0xff]  ;;  %v1304_v18 = vld [vmem:[%s1546_s7 + $0x50] sm:$0xff] }
  0x11   : > { %1322 = vmatpush.bf16.msra.mxu2 %v1316_v1  ;;  %1323 = vmatpush.bf16.msra.mxu3 %v1316_v1  ;;  %v1306_v11 = vld [vmem:[%s1546_s7 + $0x60] sm:$0xff]  ;;  %v1307_v15 = vld [vmem:[%s1546_s7 + $0x68] sm:$0xff]  ;;  %v1308_v19 = vld [vmem:[%s1546_s7 + $0x70] sm:$0xff] }
  0x12   : > { %v1297_v20 = vld [vmem:[%s1546_s7 + $0x18] sm:$0xff]  ;;  %v1567_v24 = vld [vmem:[%s2072_s2] ss:$0 sm:$0xff] }
  0x13   : > { %v1301_v21 = vld [vmem:[%s1546_s7 + $0x38] sm:$0xff] }
  0x14   : > { %372 = vmatpush.bf16.msra.mxu0 %v1315_v2  ;;  %1324 = vmatpush.bf16.msra.mxu1 %v1315_v2  ;;  %v1305_v22 = vld [vmem:[%s1546_s7 + $0x58] sm:$0xff] }
  0x15   : > { %1325 = vmatpush.bf16.msra.mxu2 %v1315_v2  ;;  %1326 = vmatpush.bf16.msra.mxu3 %v1315_v2  ;;  %v1309_v23 = vld [vmem:[%s1546_s7 + $0x78] sm:$0xff] }
  0x18   : > { %373 = vmatpush.bf16.msra.mxu0 %v1314_v3  ;;  %1327 = vmatpush.bf16.msra.mxu1 %v1314_v3 }
  0x19   : > { %1328 = vmatpush.bf16.msra.mxu2 %v1314_v3  ;;  %1329 = vmatpush.bf16.msra.mxu3 %v1314_v3 }
  0x1c   : > { %374 = vmatpush.bf16.msra.mxu0 %v1313_v4  ;;  %1330 = vmatpush.bf16.msra.mxu1 %v1313_v4 }
  0x1d   : > { %1331 = vmatpush.bf16.msra.mxu2 %v1313_v4  ;;  %1332 = vmatpush.bf16.msra.mxu3 %v1313_v4 }
  0x20   : > { %375 = vmatpush.bf16.msra.mxu0 %v1312_v5  ;;  %1333 = vmatpush.bf16.msra.mxu1 %v1312_v5 }
  0x21   : > { %1334 = vmatpush.bf16.msra.mxu2 %v1312_v5  ;;  %1335 = vmatpush.bf16.msra.mxu3 %v1312_v5 }
  0x24   : > { %376 = vmatpush.bf16.msra.mxu0 %v1311_v6  ;;  %1336 = vmatpush.bf16.msra.mxu1 %v1311_v6 }
  0x25   : > { %1337 = vmatpush.bf16.msra.mxu2 %v1311_v6  ;;  %1338 = vmatpush.bf16.msra.mxu3 %v1311_v6 }
  0x28   : > { %377 = vmatpush.bf16.msra.mxu0 %v1310_v7  ;;  %1339 = vmatpush.bf16.msra.mxu1 %v1310_v7 }
  0x29   : > { %1340 = vmatpush.bf16.msra.mxu2 %v1310_v7  ;;  %1341 = vmatpush.bf16.msra.mxu3 %v1310_v7 }
  0x2b   : > { %378 = vmatmul.bf16.vlgmr.msra.gmra.mxu0 %v1294_v8  ;;  %398 = vmatmul.bf16.vlgmr.msra.gmra.mxu1 %v1298_v9 }
  0x2c   : > { %418 = vmatmul.bf16.vlgmr.msra.gmra.mxu2 %v1302_v10  ;;  %438 = vmatmul.bf16.vlgmr.msra.gmra.mxu3 %v1306_v11 }
  0x3b   : > { %383 = vmatmul.bf16.gmra.mxu0 %v1295_v12  ;;  %403 = vmatmul.bf16.gmra.mxu1 %v1299_v13 }
  0x3c   : > { %423 = vmatmul.bf16.gmra.mxu2 %v1303_v14  ;;  %443 = vmatmul.bf16.gmra.mxu3 %v1307_v15 }
  0x4b   : > { %388 = vmatmul.bf16.gmra.mxu0 %v1296_v16  ;;  %408 = vmatmul.bf16.gmra.mxu1 %v1300_v17 }
  0x4c   : > { %428 = vmatmul.bf16.gmra.mxu2 %v1304_v18  ;;  %448 = vmatmul.bf16.gmra.mxu3 %v1308_v19 }
  0x5b   : > { %393 = vmatmul.bf16.gmra.mxu0 %v1297_v20  ;;  %413 = vmatmul.bf16.gmra.mxu1 %v1301_v21 }
  0x5c   : > { %433 = vmatmul.bf16.gmra.mxu2 %v1305_v22  ;;  %453 = vmatmul.bf16.gmra.mxu3 %v1309_v23 }
  0xa8   : > { %v379_v25 = vpop.f32.mrf.mxu0  ;;  %v399_v26 = vpop.f32.mrf.mxu1 }
  0xa9   : > { %v380_v27 = vadd.f32 %v1567_v24, %v379_v25  ;;  %v400_v28 = vadd.f32 %v1567_v24, %v399_v26 }
  0xab   : > { %v1260_v29 = vmul.f32 -1.442695, %v380_v27  ;;  %v1268_v30 = vmul.f32 -1.442695, %v400_v28 }
  0xad   : > { %1351 = vpow2.f32 %v1260_v29 }
  0xae   : > { %1353 = vpow2.f32 %v1268_v30 }
  0xaf   : > { %v419_v31 = vpop.f32.mrf.mxu2  ;;  %v439_v32 = vpop.f32.mrf.mxu3 }
  0xb0   : > { %v420_v33 = vadd.f32 %v1567_v24, %v419_v31  ;;  %v440_v34 = vadd.f32 %v1567_v24, %v439_v32  ;;  %v381_v35 = vpop.f32.mrf.mxu0  ;;  %v401_v36 = vpop.f32.mrf.mxu1 }
  0xb1   : > { %v382_v37 = vadd.f32 %v1567_v24, %v381_v35  ;;  %v402_v38 = vadd.f32 %v1567_v24, %v401_v36 }
  0xb2   : > { %v1276_v39 = vmul.f32 -1.442695, %v420_v33  ;;  %v1284_v40 = vmul.f32 -1.442695, %v440_v34 }
  0xb3   : > { %v1352_v41 = vpop.eup %1351  ;;  %v1261_v44 = vmul.f32 -1.442695, %v382_v37  ;;  %v1269_v46 = vmul.f32 -1.442695, %v402_v38 }
  0xb4   : > { %v1354_v42 = vpop.eup %1353  ;;  %v1575_v43 = vadd.f32 1.0, %v1352_v41  ;;  %1355 = vpow2.f32 %v1276_v39 }
  0xb5   : > { %v1577_v45 = vadd.f32 1.0, %v1354_v42  ;;  %1357 = vpow2.f32 %v1284_v40 }
  0xb6   : > { %1359 = vrcp.f32 %v1575_v43  ;;  %v596_v50 = vand.u32 2147483647, %v1575_v43  ;;  %v598_v51 = vand.u32 2147483648, %v1575_v43  ;;  %vm592_vm0 = vweird.f32 %v1575_v43 }
  0xb7   : > { %1361 = vrcp.f32 %v1577_v45  ;;  %v421_v47 = vpop.f32.mrf.mxu2  ;;  %v441_v48 = vpop.f32.mrf.mxu3  ;;  %v716_v54 = vand.u32 2147483647, %v1577_v45  ;;  %v718_v58 = vand.u32 2147483648, %v1577_v45  ;;  %vm712_vm1 = vweird.f32 %v1577_v45 }
  0xb8   : > { %1363 = vpow2.f32 %v1261_v44  ;;  %v422_v49 = vadd.f32 %v1567_v24, %v421_v47  ;;  %v384_v52 = vpop.f32.mrf.mxu0  ;;  %v442_v56 = vadd.f32 %v1567_v24, %v441_v48  ;;  %v404_v63 = vpop.f32.mrf.mxu1  ;;  %vm1595_vm2 = vcmp.eq.f32.partialorder %v596_v50, 8.507059e+37 }
  0xb9   : > { %1365 = vpow2.f32 %v1269_v46  ;;  %v385_v62 = vadd.f32 %v1567_v24, %v384_v52  ;;  %v599_v3 = vor.u32 1.1754944e-38, %v598_v51  ;;  %vm1601_vm3 = vcmp.eq.f32.partialorder %v716_v54, 8.507059e+37 }
  0xba   : > { %v1356_v53 = vpop.eup %1355  ;;  %v1277_v55 = vmul.f32 -1.442695, %v422_v49  ;;  %v1285_v7 = vmul.f32 -1.442695, %v442_v56  ;;  %v719_v10 = vor.u32 1.1754944e-38, %v718_v58  ;;  %v405_v11 = vadd.f32 %v1567_v24, %v404_v63 }
  0xbb   : > { %v1358_v57 = vpop.eup %1357  ;;  %v1587_v59 = vadd.f32 1.0, %v1356_v53  ;;  %v1262_v14 = vmul.f32 -1.442695, %v385_v62 }
  0xbc   : > { %v1360_v60 = vpop.eup %1359  ;;  %v1591_v61 = vadd.f32 1.0, %v1358_v57  ;;  %v1617_v25 = vmul.f32 -1.442695, %v405_v11 }
  0xbd   : > { %v1362_v0 = vpop.eup %1361  ;;  %v588_v1 = vmul.f32 %v1360_v60, %v1575_v43  ;;  %1367 = vrcp.f32 %v1587_v59  ;;  %vm593_vm4 = vweird.f32 %v1360_v60  ;;  %v836_v13 = vand.u32 2147483647, %v1587_v59 }
  0xbe   : > { %v1364_v4 = vpop.eup %1363  ;;  %v708_v5 = vmul.f32 %v1362_v0, %v1577_v45  ;;  %1369 = vpow2.f32 %v1277_v55  ;;  %v838_v16 = vand.u32 2147483648, %v1587_v59  ;;  %vm713_vm5 = vweird.f32 %v1362_v0  ;;  %vm594_vm6 = vmor %vm592_vm0, %vm593_vm4 }
  0xbf   : > { %v1366_v8 = vpop.eup %1365  ;;  %v589_v9 = vsub.f32 1.0, %v588_v1  ;;  %1371 = vrcp.f32 %v1591_v61  ;;  %v1610_v17 = vadd.f32 1.0, %v1364_v4  ;;  %v956_v20 = vand.u32 2147483647, %v1591_v61  ;;  %v424_v29 = vpop.f32.mrf.mxu2  ;;  %vm714_vm9 = vmor %vm712_vm1, %vm713_vm5 }
  0xc0   : > { %v709_v12 = vsub.f32 1.0, %v708_v5  ;;  %v1612_v18 = vadd.f32 1.0, %v1366_v8  ;;  %1373 = vpow2.f32 %v1285_v7  ;;  %v958_v23 = vand.u32 2147483648, %v1591_v61  ;;  %v444_v56 = vpop.f32.mrf.mxu3  ;;  %v386_v11 = vpop.f32.mrf.mxu0 }
  0xc1   : > { %v590_v15 = vmul.f32 %v1360_v60, %v589_v9  ;;  %1375 = vrcp.f32 %v1610_v17  ;;  %vm832_vm7 = vweird.f32 %v1587_v59  ;;  %vm952_vm8 = vweird.f32 %v1591_v61 }
  0xc2   : > { %v710_v19 = vmul.f32 %v1362_v0, %v709_v12  ;;  %vm1633_vm10 = vcmp.eq.f32.partialorder %v836_v13, 8.507059e+37  ;;  %v839_v33 = vor.u32 1.1754944e-38, %v838_v16  ;;  %1377 = vrcp.f32 %v1612_v18 }
  0xc3   : > { %v1368_v21 = vpop.eup %1367  ;;  %v591_v22 = vadd.f32 %v1360_v60, %v590_v15  ;;  %vm1641_vm11 = vcmp.eq.f32.partialorder %v956_v20, 8.507059e+37  ;;  %v959_v40 = vor.u32 1.1754944e-38, %v958_v23  ;;  %v611_v41 = vand.u32 2147483647, %v1610_v17 }
  0xc4   : > { %v1370_v26 = vpop.eup %1369  ;;  %v711_v27 = vadd.f32 %v1362_v0, %v710_v19  ;;  %v828_v28 = vmul.f32 %v1368_v21, %v1587_v59  ;;  %v425_v42 = vadd.f32 %v1567_v24, %v424_v29  ;;  %vm833_vm12 = vweird.f32 %v1368_v21  ;;  %v406_v29 = vpop.f32.mrf.mxu1 }
  0xc5   : > { %v1372_v30 = vpop.eup %1371  ;;  %v595_v31 = vsel %vm594_vm6, %v1360_v60, %v591_v22  ;;  %v1651_v46 = vadd.f32 1.0, %v1370_v26  ;;  %vm607_vm14 = vweird.f32 %v1610_v17  ;;  %v613_v48 = vand.u32 2147483648, %v1610_v17  ;;  %vm834_vm15 = vmor %vm832_vm7, %vm833_vm12 }
  0xc6   : > { %v600_v34 = vsel %vm1595_vm2, %v599_v3, %v595_v31  ;;  %v715_v35 = vsel %vm714_vm9, %v1362_v0, %v711_v27  ;;  %v829_v36 = vsub.f32 1.0, %v828_v28  ;;  %v948_v37 = vmul.f32 %v1372_v30, %v1591_v61  ;;  %v1374_v43 = vpop.eup %1373 }
  0xc7   : > { %1067 = vst [vmem:[%s1622_s14] sm:$0xff] %v600_v34  ;;  %v720_v39 = vsel %vm1601_vm3, %v719_v10, %v715_v35  ;;  %v1376_v47 = vpop.eup %1375  ;;  %vm953_vm13 = vweird.f32 %v1372_v30  ;;  %1379 = vpow2.f32 %v1262_v14  ;;  %v1656_v52 = vadd.f32 1.0, %v1374_v43 }
  0xc8   : > { %1075 = vst [vmem:[%s1622_s14 + $0x40] sm:$0xff] %v720_v39  ;;  %v830_v44 = vmul.f32 %v1368_v21, %v829_v36  ;;  %v949_v45 = vsub.f32 1.0, %v948_v37  ;;  %v603_v51 = vmul.f32 %v1376_v47, %v1610_v17  ;;  %v1378_v53 = vpop.eup %1377  ;;  %vm1660_vm0 = vcmp.eq.f32.partialorder %v611_v41, 8.507059e+37  ;;  %vm954_vm2 = vmor %vm952_vm8, %vm953_vm13 }
  0xc9   : > { %vm727_vm1 = vweird.f32 %v1612_v18  ;;  %v731_v55 = vand.u32 2147483647, %v1612_v18  ;;  %1381 = vrcp.f32 %v1651_v46  ;;  %v723_v62 = vmul.f32 %v1378_v53, %v1612_v18 }
  0xca   : > { %v831_v49 = vadd.f32 %v1368_v21, %v830_v44  ;;  %v950_v50 = vmul.f32 %v1372_v30, %v949_v45  ;;  %v604_v60 = vsub.f32 1.0, %v603_v51  ;;  %vm608_vm3 = vweird.f32 %v1376_v47 }
  0xcb   : > { %v733_v63 = vand.u32 2147483648, %v1612_v18  ;;  %v851_v0 = vand.u32 2147483647, %v1651_v46  ;;  %v724_v3 = vsub.f32 1.0, %v723_v62  ;;  %1383 = vrcp.f32 %v1656_v52  ;;  %vm609_vm6 = vmor %vm607_vm14, %vm608_vm3 }
  0xcc   : > { %v835_v57 = vsel %vm834_vm15, %v1368_v21, %v831_v49  ;;  %v951_v58 = vadd.f32 %v1372_v30, %v950_v50  ;;  %v605_v2 = vmul.f32 %v1376_v47, %v604_v60  ;;  %v614_v6 = vor.u32 1.1754944e-38, %v613_v48 }
  0xcd   : > { %v840_v59 = vsel %vm1633_vm10, %v839_v33, %v835_v57  ;;  %v1380_v4 = vpop.eup %1379  ;;  %vm1679_vm4 = vcmp.eq.f32.partialorder %v731_v55, 8.507059e+37  ;;  %v853_v61 = vand.u32 2147483648, %v1651_v46  ;;  %v725_v9 = vmul.f32 %v1378_v53, %v724_v3  ;;  %v446_v33 = vpop.f32.mrf.mxu3 }
  0xce   : > { %1083 = vst [vmem:[%s1622_s14 + $0x80] sm:$0xff] %v840_v59  ;;  %v955_v1 = vsel %vm954_vm2, %v1372_v30, %v951_v58  ;;  %v606_v8 = vadd.f32 %v1376_v47, %v605_v2  ;;  %vm728_vm5 = vweird.f32 %v1378_v53  ;;  %v1685_v10 = vadd.f32 1.0, %v1380_v4  ;;  %v426_v30 = vpop.f32.mrf.mxu2 }
  0xcf   : > { %v960_v5 = vsel %vm1641_vm11, %v959_v40, %v955_v1  ;;  %v1382_v12 = vpop.eup %1381  ;;  %v734_v13 = vor.u32 1.1754944e-38, %v733_v63  ;;  %vm847_vm7 = vweird.f32 %v1651_v46  ;;  %1385 = vpow2.f32 %v1617_v25  ;;  %vm729_vm9 = vmor %vm727_vm1, %vm728_vm5 }
  0xd0   : > { %1091 = vst [vmem:[%s1622_s14 + $0xc0] sm:$0xff] %v960_v5  ;;  %v1278_v14 = vmul.f32 -1.442695, %v425_v42  ;;  %v610_v15 = vsel %vm609_vm6, %v1376_v47, %v606_v8  ;;  %v726_v16 = vadd.f32 %v1378_v53, %v725_v9  ;;  %v843_v19 = vmul.f32 %v1382_v12, %v1651_v46  ;;  %v389_v9 = vpop.f32.mrf.mxu0 }
  0xd1   : > { %vm1693_vm8 = vcmp.eq.f32.partialorder %v851_v0, 8.507059e+37  ;;  %v445_v21 = vadd.f32 %v1567_v24, %v444_v56  ;;  %v615_v17 = vsel %vm1660_vm0, %v614_v6, %v610_v15  ;;  %v854_v22 = vor.u32 1.1754944e-38, %v853_v61  ;;  %v1384_v25 = vpop.eup %1383 }
  0xd2   : > { %1387 = vrcp.f32 %v1685_v10  ;;  %v387_v23 = vadd.f32 %v1567_v24, %v386_v11  ;;  %1068 = vst [vmem:[%s1622_s14 + $0x8] sm:$0xff] %v615_v17  ;;  %v730_v26 = vsel %vm729_vm9, %v1378_v53, %v726_v16  ;;  %v844_v27 = vsub.f32 1.0, %v843_v19 }
  0xd3   : > { %vm967_vm10 = vweird.f32 %v1656_v52  ;;  %v971_v28 = vand.u32 2147483647, %v1656_v52  ;;  %v735_v18 = vsel %vm1679_vm4, %v734_v13, %v730_v26  ;;  %v963_v31 = vmul.f32 %v1384_v25, %v1656_v52 }
  0xd4   : > { %v973_v32 = vand.u32 2147483648, %v1656_v52  ;;  %1389 = vpow2.f32 %v1278_v14  ;;  %1076 = vst [vmem:[%s1622_s14 + $0x48] sm:$0xff] %v735_v18  ;;  %v845_v34 = vmul.f32 %v1382_v12, %v844_v27  ;;  %vm848_vm11 = vweird.f32 %v1382_v12 }
  0xd5   : > { %vm968_vm12 = vweird.f32 %v1384_v25  ;;  %v1286_v35 = vmul.f32 -1.442695, %v445_v21  ;;  %v1386_v36 = vpop.eup %1385  ;;  %v964_v37 = vsub.f32 1.0, %v963_v31  ;;  %v1263_v38 = vmul.f32 -1.442695, %v387_v23  ;;  %vm849_vm13 = vmor %vm847_vm7, %vm848_vm11 }
  0xd6   : > { %v407_v39 = vadd.f32 %v1567_v24, %v406_v29  ;;  %v427_v40 = vadd.f32 %v1567_v24, %v426_v30  ;;  %v846_v41 = vadd.f32 %v1382_v12, %v845_v34  ;;  %v1715_v42 = vadd.f32 1.0, %v1386_v36  ;;  %vm969_vm0 = vmor %vm967_vm10, %vm968_vm12 }
  0xd7   : > { %1391 = vpow2.f32 %v1286_v35  ;;  %v447_v43 = vadd.f32 %v1567_v24, %v446_v33  ;;  %v965_v45 = vmul.f32 %v1384_v25, %v964_v37  ;;  %vm1720_vm14 = vcmp.eq.f32.partialorder %v971_v28, 8.507059e+37 }
  0xd8   : > { %v1388_v44 = vpop.eup %1387  ;;  %1393 = vpow2.f32 %v1263_v38  ;;  %v1271_v47 = vmul.f32 -1.442695, %v407_v39  ;;  %v1279_v48 = vmul.f32 -1.442695, %v427_v40  ;;  %v850_v49 = vsel %vm849_vm13, %v1382_v12, %v846_v41 }
  0xd9   : > { %v618_v51 = vmul.f32 %v1388_v44, %v1685_v10  ;;  %1395 = vrcp.f32 %v1715_v42  ;;  %v855_v54 = vsel %vm1693_vm8, %v854_v22, %v850_v49  ;;  %v966_v55 = vadd.f32 %v1384_v25, %v965_v45 }
  0xda   : > { %v1390_v53 = vpop.eup %1389  ;;  %v974_v46 = vor.u32 1.1754944e-38, %v973_v32  ;;  %vm622_vm15 = vweird.f32 %v1685_v10  ;;  %1084 = vst [vmem:[%s1622_s14 + $0x88] sm:$0xff] %v855_v54  ;;  %v626_v57 = vand.u32 2147483647, %v1685_v10  ;;  %1397 = vpow2.f32 %v1271_v47 }
  0xdb   : > { %v619_v56 = vsub.f32 1.0, %v618_v51  ;;  %v1734_v58 = vadd.f32 1.0, %v1390_v53  ;;  %v970_v60 = vsel %vm969_vm0, %v1384_v25, %v966_v55  ;;  %v628_v62 = vand.u32 2147483648, %v1685_v10 }
  0xdc   : > { %1399 = vpow2.f32 %v1279_v48  ;;  %v1287_v59 = vmul.f32 -1.442695, %v447_v43  ;;  %v975_v0 = vsel %vm1720_vm14, %v974_v46, %v970_v60  ;;  %vm623_vm1 = vweird.f32 %v1388_v44 }
  0xdd   : > { %v1392_v63 = vpop.eup %1391  ;;  %v620_v1 = vmul.f32 %v1388_v44, %v619_v56  ;;  %1401 = vrcp.f32 %v1734_v58  ;;  %1092 = vst [vmem:[%s1622_s14 + $0xc8] sm:$0xff] %v975_v0  ;;  %v746_v2 = vand.u32 2147483647, %v1715_v42  ;;  %v748_v6 = vand.u32 2147483648, %v1715_v42  ;;  %vm624_vm2 = vmor %vm622_vm15, %vm623_vm1 }
  0xde   : > { %v1394_v52 = vpop.eup %1393  ;;  %v1742_v3 = vadd.f32 1.0, %v1392_v63  ;;  %1403 = vpow2.f32 %v1287_v59  ;;  %vm627_vm3 = vcmp.eq.f32.partialorder %v626_v57, 8.507059e+37  ;;  %v629_v61 = vor.u32 1.1754944e-38, %v628_v62  ;;  %v429_v57 = vpop.f32.mrf.mxu2 }
  0xdf   : > { %v1396_v4 = vpop.eup %1395  ;;  %v621_v5 = vadd.f32 %v1388_v44, %v620_v1  ;;  %v1745_v7 = vadd.f32 1.0, %v1394_v52  ;;  %v866_v13 = vand.u32 2147483647, %v1734_v58  ;;  %v868_v14 = vand.u32 2147483648, %v1734_v58 }
  0xe0   : > { %v738_v8 = vmul.f32 %v1396_v4, %v1715_v42  ;;  %v1398_v11 = vpop.eup %1397  ;;  %1405 = vrcp.f32 %v1742_v3  ;;  %vm742_vm4 = vweird.f32 %v1715_v42  ;;  %vm1756_vm5 = vcmp.eq.f32.partialorder %v746_v2, 8.507059e+37  ;;  %v409_v42 = vpop.f32.mrf.mxu1 }
  0xe1   : > { %v625_v12 = vsel %vm624_vm2, %v1388_v44, %v621_v5  ;;  %1407 = vrcp.f32 %v1745_v7  ;;  %v749_v21 = vor.u32 1.1754944e-38, %v748_v6  ;;  %vm862_vm6 = vweird.f32 %v1734_v58 }
  0xe2   : > { %v1400_v15 = vpop.eup %1399  ;;  %v630_v16 = vsel %vm627_vm3, %v629_v61, %v625_v12  ;;  %v739_v19 = vsub.f32 1.0, %v738_v8  ;;  %v390_v17 = vadd.f32 %v1567_v24, %v389_v9  ;;  %vm743_vm7 = vweird.f32 %v1396_v4 }
  0xe3   : > { %v1402_v10 = vpop.eup %1401  ;;  %1069 = vst [vmem:[%s1622_s14 + $0x10] sm:$0xff] %v630_v16  ;;  %v986_v25 = vand.u32 2147483647, %v1742_v3  ;;  %vm1764_vm8 = vcmp.eq.f32.partialorder %v866_v13, 8.507059e+37  ;;  %v869_v28 = vor.u32 1.1754944e-38, %v868_v14  ;;  %v988_v29 = vand.u32 2147483648, %v1742_v3  ;;  %vm744_vm10 = vmor %vm742_vm4, %vm743_vm7  ;;  %v449_v14 = vpop.f32.mrf.mxu3 }
  0xe4   : > { %v740_v22 = vmul.f32 %v1396_v4, %v739_v19  ;;  %v858_v23 = vmul.f32 %v1402_v10, %v1734_v58  ;;  %v1404_v26 = vpop.eup %1403  ;;  %v1769_v30 = vadd.f32 1.0, %v1398_v11  ;;  %vm982_vm9 = vweird.f32 %v1742_v3 }
  0xe5   : > { %v1772_v32 = vadd.f32 1.0, %v1400_v15  ;;  %vm863_vm11 = vweird.f32 %v1402_v10  ;;  %vm637_vm12 = vweird.f32 %v1745_v7  ;;  %v641_v34 = vand.u32 2147483647, %v1745_v7  ;;  %v391_v15 = vpop.f32.mrf.mxu0 }
  0xe6   : > { %v741_v18 = vadd.f32 %v1396_v4, %v740_v22  ;;  %v859_v31 = vsub.f32 1.0, %v858_v23  ;;  %v1406_v33 = vpop.eup %1405  ;;  %v643_v35 = vand.u32 2147483648, %v1745_v7  ;;  %1409 = vrcp.f32 %v1769_v30  ;;  %vm864_vm14 = vmor %vm862_vm6, %vm863_vm11 }
  0xe7   : > { %v1408_v36 = vpop.eup %1407  ;;  %v978_v39 = vmul.f32 %v1406_v33, %v1742_v3  ;;  %vm1781_vm13 = vcmp.eq.f32.partialorder %v986_v25, 8.507059e+37  ;;  %v1785_v41 = vadd.f32 1.0, %v1404_v26  ;;  %v989_v44 = vor.u32 1.1754944e-38, %v988_v29 }
  0xe8   : > { %v745_v37 = vsel %vm744_vm10, %v1396_v4, %v741_v18  ;;  %v860_v38 = vmul.f32 %v1402_v10, %v859_v31  ;;  %v633_v45 = vmul.f32 %v1408_v36, %v1745_v7  ;;  %v761_v47 = vand.u32 2147483647, %v1769_v30 }
  0xe9   : > { %v750_v43 = vsel %vm1756_vm5, %v749_v21, %v745_v37  ;;  %v979_v49 = vsub.f32 1.0, %v978_v39  ;;  %v763_v50 = vand.u32 2147483648, %v1769_v30  ;;  %1411 = vrcp.f32 %v1772_v32  ;;  %v411_v21 = vpop.f32.mrf.mxu1  ;;  %v431_v37 = vpop.f32.mrf.mxu2 }
  0xea   : > { %1077 = vst [vmem:[%s1622_s14 + $0x50] sm:$0xff] %v750_v43  ;;  %v861_v48 = vadd.f32 %v1402_v10, %v860_v38  ;;  %v634_v51 = vsub.f32 1.0, %v633_v45  ;;  %vm1797_vm15 = vcmp.eq.f32.partialorder %v641_v34, 8.507059e+37  ;;  %v644_v54 = vor.u32 1.1754944e-38, %v643_v35 }
  0xeb   : > { %v1264_v55 = vmul.f32 -1.442695, %v390_v17  ;;  %v980_v56 = vmul.f32 %v1406_v33, %v979_v49  ;;  %vm983_vm0 = vweird.f32 %v1406_v33  ;;  %1413 = vrcp.f32 %v1785_v41 }
  0xec   : > { %v865_v46 = vsel %vm864_vm14, %v1402_v10, %v861_v48  ;;  %v1410_v60 = vpop.eup %1409  ;;  %v635_v58 = vmul.f32 %v1408_v36, %v634_v51  ;;  %vm638_vm1 = vweird.f32 %v1408_v36  ;;  %vm757_vm2 = vweird.f32 %v1769_v30  ;;  %vm984_vm4 = vmor %vm982_vm9, %vm983_vm0 }
  0xed   : > { %v870_v62 = vsel %vm1764_vm8, %v869_v28, %v865_v46  ;;  %v981_v59 = vadd.f32 %v1406_v33, %v980_v56  ;;  %v753_v63 = vmul.f32 %v1410_v60, %v1769_v30  ;;  %vm1807_vm3 = vcmp.eq.f32.partialorder %v761_v47, 8.507059e+37  ;;  %vm639_vm6 = vmor %vm637_vm12, %vm638_vm1 }
  0xee   : > { %1085 = vst [vmem:[%s1622_s14 + $0x90] sm:$0xff] %v870_v62  ;;  %v764_v1 = vor.u32 1.1754944e-38, %v763_v50  ;;  %v881_v52 = vand.u32 2147483647, %v1772_v32  ;;  %v636_v2 = vadd.f32 %v1408_v36, %v635_v58  ;;  %vm877_vm5 = vweird.f32 %v1772_v32 }
  0xef   : > { %v883_v4 = vand.u32 2147483648, %v1772_v32  ;;  %1415 = vpow2.f32 %v1264_v55  ;;  %v410_v5 = vadd.f32 %v1567_v24, %v409_v42  ;;  %v1412_v6 = vpop.eup %1411  ;;  %v985_v61 = vsel %vm984_vm4, %v1406_v33, %v981_v59 }
  0xf0   : > { %v754_v8 = vsub.f32 1.0, %v753_v63  ;;  %vm758_vm7 = vweird.f32 %v1410_v60  ;;  %v430_v3 = vadd.f32 %v1567_v24, %v429_v57  ;;  %v990_v9 = vsel %vm1781_vm13, %v989_v44, %v985_v61  ;;  %v394_v57 = vpop.f32.mrf.mxu0 }
  0xf1   : > { %v640_v11 = vsel %vm639_vm6, %v1408_v36, %v636_v2  ;;  %v873_v12 = vmul.f32 %v1412_v6, %v1772_v32  ;;  %vm997_vm8 = vweird.f32 %v1785_v41  ;;  %v1001_v13 = vand.u32 2147483647, %v1785_v41  ;;  %v1414_v16 = vpop.eup %1413  ;;  %1093 = vst [vmem:[%s1622_s14 + $0xd0] sm:$0xff] %v990_v9  ;;  %vm759_vm10 = vmor %vm757_vm2, %vm758_vm7 }
  0xf2   : > { %v645_v7 = vsel %vm1797_vm15, %v644_v54, %v640_v11  ;;  %v755_v19 = vmul.f32 %v1410_v60, %v754_v8  ;;  %v1003_v10 = vand.u32 2147483648, %v1785_v41  ;;  %v1272_v20 = vmul.f32 -1.442695, %v410_v5  ;;  %v451_v54 = vpop.f32.mrf.mxu3 }
  0xf3   : > { %1070 = vst [vmem:[%s1622_s14 + $0x18] sm:$0xff] %v645_v7  ;;  %v874_v17 = vsub.f32 1.0, %v873_v12  ;;  %vm878_vm9 = vweird.f32 %v1412_v6  ;;  %v993_v22 = vmul.f32 %v1414_v16, %v1785_v41  ;;  %v1280_v23 = vmul.f32 -1.442695, %v430_v3 }
  0xf4   : > { %v756_v25 = vadd.f32 %v1410_v60, %v755_v19  ;;  %1417 = vpow2.f32 %v1272_v20  ;;  %v450_v26 = vadd.f32 %v1567_v24, %v449_v14  ;;  %v392_v27 = vadd.f32 %v1567_v24, %v391_v15  ;;  %vm879_vm12 = vmor %vm877_vm5, %vm878_vm9 }
  0xf5   : > { %v1416_v28 = vpop.eup %1415  ;;  %v875_v29 = vmul.f32 %v1412_v6, %v874_v17  ;;  %v994_v18 = vsub.f32 1.0, %v993_v22  ;;  %1419 = vpow2.f32 %v1280_v23  ;;  %v412_v31 = vadd.f32 %v1567_v24, %v411_v21 }
  0xf6   : > { %v760_v33 = vsel %vm759_vm10, %v1410_v60, %v756_v25  ;;  %v1838_v34 = vadd.f32 1.0, %v1416_v28  ;;  %v1288_v35 = vmul.f32 -1.442695, %v450_v26  ;;  %v1265_v36 = vmul.f32 -1.442695, %v392_v27 }
  0xf7   : > { %v765_v38 = vsel %vm1807_vm3, %v764_v1, %v760_v33  ;;  %v876_v39 = vadd.f32 %v1412_v6, %v875_v29  ;;  %v995_v40 = vmul.f32 %v1414_v16, %v994_v18  ;;  %vm998_vm11 = vweird.f32 %v1414_v16 }
  0xf8   : > { %1078 = vst [vmem:[%s1622_s14 + $0x58] sm:$0xff] %v765_v38  ;;  %vm882_vm13 = vcmp.eq.f32.partialorder %v881_v52, 8.507059e+37  ;;  %v884_v30 = vor.u32 1.1754944e-38, %v883_v4  ;;  %1421 = vrcp.f32 %v1838_v34  ;;  %v1273_v42 = vmul.f32 -1.442695, %v412_v31  ;;  %vm999_vm14 = vmor %vm997_vm8, %vm998_vm11 }
  0xf9   : > { %v880_v43 = vsel %vm879_vm12, %v1412_v6, %v876_v39  ;;  %v996_v44 = vadd.f32 %v1414_v16, %v995_v40  ;;  %1423 = vpow2.f32 %v1288_v35  ;;  %v432_v45 = vadd.f32 %v1567_v24, %v431_v37 }
  0xfa   : > { %v1418_v47 = vpop.eup %1417  ;;  %v885_v48 = vsel %vm882_vm13, %v884_v30, %v880_v43  ;;  %v1004_v49 = vor.u32 1.1754944e-38, %v1003_v10  ;;  %1425 = vpow2.f32 %v1265_v36  ;;  %vm1002_vm15 = vcmp.eq.f32.partialorder %v1001_v13, 8.507059e+37 }
  0xfb   : > { %v1420_v32 = vpop.eup %1419  ;;  %1086 = vst [vmem:[%s1622_s14 + $0x98] sm:$0xff] %v885_v48  ;;  %v1000_v50 = vsel %vm999_vm14, %v1414_v16, %v996_v44  ;;  %v656_v51 = vand.u32 2147483647, %v1838_v34  ;;  %v1852_v53 = vadd.f32 1.0, %v1418_v47  ;;  %1427 = vpow2.f32 %v1273_v42 }
  0xfc   : > { %v1005_v55 = vsel %vm1002_vm15, %v1004_v49, %v1000_v50  ;;  %v1854_v46 = vadd.f32 1.0, %v1420_v32  ;;  %v1281_v56 = vmul.f32 -1.442695, %v432_v45  ;;  %v658_v60 = vand.u32 2147483648, %v1838_v34  ;;  %v414_v49 = vpop.f32.mrf.mxu1  ;;  %v434_v32 = vpop.f32.mrf.mxu2 }
  0xfd   : > { %1094 = vst [vmem:[%s1622_s14 + $0xd8] sm:$0xff] %v1005_v55  ;;  %1429 = vrcp.f32 %v1852_v53  ;;  %v452_v62 = vadd.f32 %v1567_v24, %v451_v54  ;;  %vm652_vm0 = vweird.f32 %v1838_v34  ;;  %vm1863_vm1 = vcmp.eq.f32.partialorder %v656_v51, 8.507059e+37 }
  0xfe   : > { %v1422_v41 = vpop.eup %1421  ;;  %1431 = vrcp.f32 %v1854_v46  ;;  %v395_v0 = vadd.f32 %v1567_v24, %v394_v57  ;;  %v776_v52 = vand.u32 2147483647, %v1852_v53  ;;  %v778_v2 = vand.u32 2147483648, %v1852_v53 }
  0xff   : > { %v1424_v58 = vpop.eup %1423  ;;  %v648_v59 = vmul.f32 %v1422_v41, %v1838_v34  ;;  %1433 = vpow2.f32 %v1281_v56  ;;  %v896_v6 = vand.u32 2147483647, %v1854_v46  ;;  %v898_v61 = vand.u32 2147483648, %v1854_v46 }
 0x100   : > { %v1426_v1 = vpop.eup %1425  ;;  %v1870_v4 = vadd.f32 1.0, %v1424_v58  ;;  %v659_v9 = vor.u32 1.1754944e-38, %v658_v60  ;;  %vm772_vm2 = vweird.f32 %v1852_v53  ;;  %v1289_v24 = vmul.f32 -1.442695, %v452_v62 }
 0x101   : > { %v649_v5 = vsub.f32 1.0, %v648_v59  ;;  %v1874_v8 = vadd.f32 1.0, %v1426_v1  ;;  %v1428_v3 = vpop.eup %1427  ;;  %vm653_vm3 = vweird.f32 %v1422_v41  ;;  %v1266_v13 = vmul.f32 -1.442695, %v395_v0 }
 0x102   : > { %1435 = vrcp.f32 %v1870_v4  ;;  %vm1880_vm4 = vcmp.eq.f32.partialorder %v776_v52, 8.507059e+37  ;;  %v779_v7 = vor.u32 1.1754944e-38, %v778_v2  ;;  %vm892_vm5 = vweird.f32 %v1854_v46  ;;  %vm654_vm7 = vmor %vm652_vm0, %vm653_vm3 }
 0x103   : > { %v1430_v11 = vpop.eup %1429  ;;  %v650_v12 = vmul.f32 %v1422_v41, %v649_v5  ;;  %1437 = vrcp.f32 %v1874_v8  ;;  %vm1886_vm6 = vcmp.eq.f32.partialorder %v896_v6, 8.507059e+37  ;;  %v899_v21 = vor.u32 1.1754944e-38, %v898_v61 }
 0x104   : > { %v1432_v14 = vpop.eup %1431  ;;  %v768_v15 = vmul.f32 %v1430_v11, %v1852_v53  ;;  %v1016_v17 = vand.u32 2147483647, %v1870_v4  ;;  %v1018_v25 = vand.u32 2147483648, %v1870_v4  ;;  %v1894_v26 = vadd.f32 1.0, %v1428_v3 }
 0x105   : > { %v651_v19 = vadd.f32 %v1422_v41, %v650_v12  ;;  %v888_v10 = vmul.f32 %v1432_v14, %v1854_v46  ;;  %v1434_v22 = vpop.eup %1433  ;;  %1439 = vpow2.f32 %v1289_v24  ;;  %vm773_vm8 = vweird.f32 %v1430_v11 }
 0x106   : > { %v769_v23 = vsub.f32 1.0, %v768_v15  ;;  %v1896_v29 = vadd.f32 1.0, %v1434_v22  ;;  %1441 = vpow2.f32 %v1266_v13  ;;  %vm893_vm9 = vweird.f32 %v1432_v14  ;;  %vm774_vm12 = vmor %vm772_vm2, %vm773_vm8  ;;  %v396_v13 = vpop.f32.mrf.mxu0  ;;  %v436_v22 = vpop.f32.mrf.mxu2 }
 0x107   : > { %v655_v27 = vsel %vm654_vm7, %v1422_v41, %v651_v19  ;;  %v889_v28 = vsub.f32 1.0, %v888_v10  ;;  %1443 = vrcp.f32 %v1894_v26  ;;  %vm1012_vm10 = vweird.f32 %v1870_v4  ;;  %vm894_vm13 = vmor %vm892_vm5, %vm893_vm9  ;;  %v1479_v10 = vld [vmem:[%s2072_s2] ss:$0 sm:$0xff] }
 0x108   : > { %v1436_v18 = vpop.eup %1435  ;;  %v660_v31 = vsel %vm1863_vm1, %v659_v9, %v655_v27  ;;  %v770_v33 = vmul.f32 %v1430_v11, %v769_v23  ;;  %vm667_vm11 = vweird.f32 %v1874_v8  ;;  %v673_v39 = vand.u32 2147483648, %v1874_v8  ;;  %v454_v9 = vpop.f32.mrf.mxu3 }
 0x109   : > { %v1438_v34 = vpop.eup %1437  ;;  %1071 = vst [vmem:[%s1622_s14 + $0x20] sm:$0xff] %v660_v31  ;;  %v890_v35 = vmul.f32 %v1432_v14, %v889_v28  ;;  %v1008_v36 = vmul.f32 %v1436_v18, %v1870_v4  ;;  %v671_v42 = vand.u32 2147483647, %v1874_v8  ;;  %1445 = vrcp.f32 %v1896_v29 }
 0x10a   : > { %v771_v37 = vadd.f32 %v1430_v11, %v770_v33  ;;  %v663_v38 = vmul.f32 %v1438_v34, %v1874_v8  ;;  %vm1913_vm14 = vcmp.eq.f32.partialorder %v1016_v17, 8.507059e+37  ;;  %v1019_v47 = vor.u32 1.1754944e-38, %v1018_v25  ;;  %v416_v17 = vpop.f32.mrf.mxu1 }
 0x10b   : > { %v891_v40 = vadd.f32 %v1432_v14, %v890_v35  ;;  %v1009_v30 = vsub.f32 1.0, %v1008_v36  ;;  %v1440_v43 = vpop.eup %1439  ;;  %vm1013_vm15 = vweird.f32 %v1436_v18  ;;  %vm668_vm0 = vweird.f32 %v1438_v34 }
 0x10c   : > { %v775_v44 = vsel %vm774_vm12, %v1430_v11, %v771_v37  ;;  %v664_v48 = vsub.f32 1.0, %v663_v38  ;;  %v1442_v50 = vpop.eup %1441  ;;  %v674_v57 = vor.u32 1.1754944e-38, %v673_v39  ;;  %v791_v62 = vand.u32 2147483647, %v1894_v26  ;;  %vm1014_vm1 = vmor %vm1012_vm10, %vm1013_vm15 }
 0x10d   : > { %v780_v51 = vsel %vm1880_vm4, %v779_v7, %v775_v44  ;;  %v895_v53 = vsel %vm894_vm13, %v1432_v14, %v891_v40  ;;  %v1010_v54 = vmul.f32 %v1436_v18, %v1009_v30  ;;  %v1444_v55 = vpop.eup %1443  ;;  %v1925_v58 = vadd.f32 1.0, %v1440_v43  ;;  %vm669_vm2 = vmor %vm667_vm11, %vm668_vm0 }
 0x10e   : > { %1079 = vst [vmem:[%s1622_s14 + $0x60] sm:$0xff] %v780_v51  ;;  %v900_v46 = vsel %vm1886_vm6, %v899_v21, %v895_v53  ;;  %v665_v56 = vmul.f32 %v1438_v34, %v664_v48  ;;  %v783_v60 = vmul.f32 %v1444_v55, %v1894_v26  ;;  %v793_v63 = vand.u32 2147483648, %v1894_v26 }
 0x10f   : > { %1087 = vst [vmem:[%s1622_s14 + $0xa0] sm:$0xff] %v900_v46  ;;  %v1011_v41 = vadd.f32 %v1436_v18, %v1010_v54  ;;  %v911_v0 = vand.u32 2147483647, %v1896_v29  ;;  %v1931_v1 = vadd.f32 1.0, %v1442_v50  ;;  %v1446_v52 = vpop.eup %1445  ;;  %v913_v6 = vand.u32 2147483648, %v1896_v29 }
 0x110   : > { %v666_v59 = vadd.f32 %v1438_v34, %v665_v56  ;;  %v784_v5 = vsub.f32 1.0, %v783_v60  ;;  %1447 = vrcp.f32 %v1925_v58  ;;  %vm672_vm3 = vcmp.eq.f32.partialorder %v671_v42, 8.507059e+37 }
 0x111   : > { %v1015_v2 = vsel %vm1014_vm1, %v1436_v18, %v1011_v41  ;;  %v903_v3 = vmul.f32 %v1446_v52, %v1896_v29  ;;  %vm787_vm4 = vweird.f32 %v1894_v26  ;;  %vm788_vm5 = vweird.f32 %v1444_v55 }
 0x112   : > { %v1020_v4 = vsel %vm1913_vm14, %v1019_v47, %v1015_v2  ;;  %v670_v61 = vsel %vm669_vm2, %v1438_v34, %v666_v59  ;;  %v785_v11 = vmul.f32 %v1444_v55, %v784_v5  ;;  %vm1943_vm6 = vcmp.eq.f32.partialorder %v791_v62, 8.507059e+37  ;;  %vm789_vm9 = vmor %vm787_vm4, %vm788_vm5 }
 0x113   : > { %1095 = vst [vmem:[%s1622_s14 + $0xe0] sm:$0xff] %v1020_v4  ;;  %v675_v24 = vsel %vm672_vm3, %v674_v57, %v670_v61  ;;  %v904_v12 = vsub.f32 1.0, %v903_v3  ;;  %vm907_vm7 = vweird.f32 %v1896_v29  ;;  %1449 = vrcp.f32 %v1931_v1 }
 0x114   : > { %1072 = vst [vmem:[%s1622_s14 + $0x28] sm:$0xff] %v675_v24  ;;  %v786_v14 = vadd.f32 %v1444_v55, %v785_v11  ;;  %v794_v15 = vor.u32 1.1754944e-38, %v793_v63  ;;  %vm1949_vm8 = vcmp.eq.f32.partialorder %v911_v0, 8.507059e+37  ;;  %v914_v7 = vor.u32 1.1754944e-38, %v913_v6 }
 0x115   : > { %v905_v19 = vmul.f32 %v1446_v52, %v904_v12  ;;  %vm908_vm10 = vweird.f32 %v1446_v52  ;;  %vm1027_vm11 = vweird.f32 %v1925_v58  ;;  %v415_v20 = vadd.f32 %v1479_v10, %v414_v49  ;;  %v456_v49 = vpop.f32.mrf.mxu3 }
 0x116   : > { %v435_v21 = vadd.f32 %v1479_v10, %v434_v32  ;;  %v1448_v23 = vpop.eup %1447  ;;  %v790_v25 = vsel %vm789_vm9, %v1444_v55, %v786_v14  ;;  %v1031_v26 = vand.u32 2147483647, %v1925_v58  ;;  %v455_v27 = vadd.f32 %v1479_v10, %v454_v9  ;;  %vm909_vm12 = vmor %vm907_vm7, %vm908_vm10 }
 0x117   : > { %v397_v28 = vadd.f32 %v1479_v10, %v396_v13  ;;  %v795_v18 = vsel %vm1943_vm6, %v794_v15, %v790_v25  ;;  %v906_v31 = vadd.f32 %v1446_v52, %v905_v19  ;;  %v1023_v33 = vmul.f32 %v1448_v23, %v1925_v58 }
 0x118   : > { %v1033_v34 = vand.u32 2147483648, %v1925_v58  ;;  %1080 = vst [vmem:[%s1622_s14 + $0x68] sm:$0xff] %v795_v18  ;;  %v1274_v35 = vmul.f32 -1.442695, %v415_v20  ;;  %v1282_v36 = vmul.f32 -1.442695, %v435_v21  ;;  %v417_v37 = vadd.f32 %v1479_v10, %v416_v17 }
 0x119   : > { %v437_v38 = vadd.f32 %v1479_v10, %v436_v22  ;;  %v1450_v39 = vpop.eup %1449  ;;  %v910_v40 = vsel %vm909_vm12, %v1446_v52, %v906_v31  ;;  %v1024_v30 = vsub.f32 1.0, %v1023_v33  ;;  %v1290_v42 = vmul.f32 -1.442695, %v455_v27 }
 0x11a   : > { %v1267_v43 = vmul.f32 -1.442695, %v397_v28  ;;  %v915_v44 = vsel %vm1949_vm8, %v914_v7, %v910_v40  ;;  %vm1028_vm13 = vweird.f32 %v1448_v23  ;;  %v678_v45 = vmul.f32 %v1450_v39, %v1931_v1 }
 0x11b   : > { %1451 = vpow2.f32 %v1274_v35  ;;  %1088 = vst [vmem:[%s1622_s14 + $0xa8] sm:$0xff] %v915_v44  ;;  %v1025_v47 = vmul.f32 %v1448_v23, %v1024_v30  ;;  %v1275_v29 = vmul.f32 -1.442695, %v417_v37  ;;  %v1283_v48 = vmul.f32 -1.442695, %v437_v38  ;;  %vm1029_vm15 = vmor %vm1027_vm11, %vm1028_vm13 }
 0x11c   : > { %1453 = vpow2.f32 %v1282_v36  ;;  %v679_v32 = vsub.f32 1.0, %v678_v45  ;;  %vm682_vm14 = vweird.f32 %v1931_v1  ;;  %v686_v50 = vand.u32 2147483647, %v1931_v1 }
 0x11d   : > { %1455 = vpow2.f32 %v1290_v42  ;;  %v1026_v51 = vadd.f32 %v1448_v23, %v1025_v47  ;;  %v1034_v53 = vor.u32 1.1754944e-38, %v1033_v34  ;;  %v688_v54 = vand.u32 2147483648, %v1931_v1 }
 0x11e   : > { %1457 = vpow2.f32 %v1267_v43  ;;  %v680_v55 = vmul.f32 %v1450_v39, %v679_v32  ;;  %vm683_vm0 = vweird.f32 %v1450_v39  ;;  %v457_v46 = vadd.f32 %v1479_v10, %v456_v49 }
 0x11f   : > { %1459 = vpow2.f32 %v1275_v29  ;;  %v1030_v56 = vsel %vm1029_vm15, %v1448_v23, %v1026_v51  ;;  %vm1032_vm1 = vcmp.eq.f32.partialorder %v1031_v26, 8.507059e+37  ;;  %vm684_vm2 = vmor %vm682_vm14, %vm683_vm0  ;;  %v689_v59 = vor.u32 1.1754944e-38, %v688_v54 }
 0x120   : > { %1461 = vpow2.f32 %v1283_v48  ;;  %v1035_v41 = vsel %vm1032_vm1, %v1034_v53, %v1030_v56  ;;  %v681_v60 = vadd.f32 %v1450_v39, %v680_v55  ;;  %vm687_vm3 = vcmp.eq.f32.partialorder %v686_v50, 8.507059e+37 }
 0x121   : > { %v1452_v57 = vpop.eup %1451  ;;  %1096 = vst [vmem:[%s1622_s14 + $0xe8] sm:$0xff] %v1035_v41  ;;  %v1291_v2 = vmul.f32 -1.442695, %v457_v46 }
 0x122   : > { %v1454_v62 = vpop.eup %1453  ;;  %v1979_v63 = vadd.f32 1.0, %v1452_v57  ;;  %v685_v0 = vsel %vm684_vm2, %v1450_v39, %v681_v60 }
 0x123   : > { %v1456_v58 = vpop.eup %1455  ;;  %v1981_v52 = vadd.f32 1.0, %v1454_v62  ;;  %v690_v6 = vsel %vm687_vm3, %v689_v59, %v685_v0 }
 0x124   : > { %v1458_v5 = vpop.eup %1457  ;;  %1463 = vrcp.f32 %v1979_v63  ;;  %1073 = vst [vmem:[%s1622_s14 + $0x30] sm:$0xff] %v690_v6  ;;  %v1986_v1 = vadd.f32 1.0, %v1456_v58  ;;  %v806_v9 = vand.u32 2147483647, %v1979_v63  ;;  %v808_v11 = vand.u32 2147483648, %v1979_v63 }
 0x125   : > { %v1460_v4 = vpop.eup %1459  ;;  %1465 = vrcp.f32 %v1981_v52  ;;  %v1988_v3 = vadd.f32 1.0, %v1458_v5  ;;  %v926_v8 = vand.u32 2147483647, %v1981_v52  ;;  %v928_v12 = vand.u32 2147483648, %v1981_v52 }
 0x126   : > { %v1462_v61 = vpop.eup %1461  ;;  %v1991_v24 = vadd.f32 1.0, %v1460_v4  ;;  %1467 = vpow2.f32 %v1291_v2  ;;  %vm802_vm4 = vweird.f32 %v1979_v63  ;;  %vm922_vm5 = vweird.f32 %v1981_v52 }
 0x127   : > { %1469 = vrcp.f32 %v1986_v1  ;;  %v1998_v13 = vadd.f32 1.0, %v1462_v61  ;;  %vm2004_vm6 = vcmp.eq.f32.partialorder %v806_v9, 8.507059e+37  ;;  %v1046_v19 = vand.u32 2147483647, %v1986_v1 }
 0x128   : > { %1471 = vrcp.f32 %v1988_v3  ;;  %v1048_v10 = vand.u32 2147483648, %v1986_v1  ;;  %v809_v20 = vor.u32 1.1754944e-38, %v808_v11  ;;  %v701_v17 = vand.u32 2147483647, %v1988_v3 }
 0x129   : > { %1473 = vrcp.f32 %v1991_v24  ;;  %v703_v22 = vand.u32 2147483648, %v1988_v3  ;;  %vm2013_vm7 = vcmp.eq.f32.partialorder %v926_v8, 8.507059e+37  ;;  %v929_v27 = vor.u32 1.1754944e-38, %v928_v12 }
 0x12a   : > { %v1464_v14 = vpop.eup %1463  ;;  %1475 = vrcp.f32 %v1998_v13  ;;  %vm1042_vm9 = vweird.f32 %v1986_v1  ;;  %vm697_vm10 = vweird.f32 %v1988_v3  ;;  %vm2021_vm12 = vcmp.eq.f32.partialorder %v1046_v19, 8.507059e+37 }
 0x12b   : > { %v1466_v15 = vpop.eup %1465  ;;  %v798_v16 = vmul.f32 %v1464_v14, %v1979_v63  ;;  %vm803_vm8 = vweird.f32 %v1464_v14  ;;  %v1049_v36 = vor.u32 1.1754944e-38, %v1048_v10  ;;  %vm817_vm13 = vweird.f32 %v1991_v24 }
 0x12c   : > { %v918_v21 = vmul.f32 %v1466_v15, %v1981_v52  ;;  %v1468_v23 = vpop.eup %1467  ;;  %vm923_vm11 = vweird.f32 %v1466_v15  ;;  %vm2027_vm14 = vcmp.eq.f32.partialorder %v701_v17, 8.507059e+37  ;;  %v704_v30 = vor.u32 1.1754944e-38, %v703_v22  ;;  %vm804_vm15 = vmor %vm802_vm4, %vm803_vm8 }
 0x12d   : > { %v799_v25 = vsub.f32 1.0, %v798_v16  ;;  %v1470_v28 = vpop.eup %1469  ;;  %v821_v42 = vand.u32 2147483647, %v1991_v24  ;;  %v823_v47 = vand.u32 2147483648, %v1991_v24  ;;  %v586_v49 = vadd.f32 1.0, %v1468_v23  ;;  %vm924_vm1 = vmor %vm922_vm5, %vm923_vm11 }
 0x12e   : > { %v919_v18 = vsub.f32 1.0, %v918_v21  ;;  %v1472_v31 = vpop.eup %1471  ;;  %v1038_v34 = vmul.f32 %v1470_v28, %v1986_v1  ;;  %vm1043_vm0 = vweird.f32 %v1470_v28  ;;  %v941_v63 = vand.u32 2147483647, %v1998_v13 }
 0x12f   : > { %v800_v33 = vmul.f32 %v1464_v14, %v799_v25  ;;  %v1474_v37 = vpop.eup %1473  ;;  %v693_v39 = vmul.f32 %v1472_v31, %v1988_v3  ;;  %vm698_vm2 = vweird.f32 %v1472_v31  ;;  %vm1044_vm4 = vmor %vm1042_vm9, %vm1043_vm0  ;;  %1477 = vrcp.f32 %v586_v49 }
 0x130   : > { %v920_v38 = vmul.f32 %v1466_v15, %v919_v18  ;;  %v1039_v44 = vsub.f32 1.0, %v1038_v34  ;;  %v813_v45 = vmul.f32 %v1474_v37, %v1991_v24  ;;  %v1476_v32 = vpop.eup %1475  ;;  %vm818_vm3 = vweird.f32 %v1474_v37  ;;  %vm699_vm5 = vmor %vm697_vm10, %vm698_vm2 }
 0x131   : > { %v801_v43 = vadd.f32 %v1464_v14, %v800_v33  ;;  %v694_v48 = vsub.f32 1.0, %v693_v39  ;;  %v933_v56 = vmul.f32 %v1476_v32, %v1998_v13  ;;  %v824_v52 = vor.u32 1.1754944e-38, %v823_v47 }
 0x132   : > { %v921_v29 = vadd.f32 %v1466_v15, %v920_v38  ;;  %v1040_v51 = vmul.f32 %v1470_v28, %v1039_v44  ;;  %v814_v53 = vsub.f32 1.0, %v813_v45  ;;  %v943_v2 = vand.u32 2147483648, %v1998_v13 }
 0x133   : > { %v805_v50 = vsel %vm804_vm15, %v1464_v14, %v801_v43  ;;  %v695_v46 = vmul.f32 %v1472_v31, %v694_v48  ;;  %v934_v59 = vsub.f32 1.0, %v933_v56  ;;  %vm822_vm8 = vcmp.eq.f32.partialorder %v821_v42, 8.507059e+37 }
 0x134   : > { %v810_v54 = vsel %vm2004_vm6, %v809_v20, %v805_v50  ;;  %v925_v55 = vsel %vm924_vm1, %v1466_v15, %v921_v29  ;;  %v1041_v41 = vadd.f32 %v1470_v28, %v1040_v51  ;;  %v815_v60 = vmul.f32 %v1474_v37, %v814_v53  ;;  %vm819_vm6 = vmor %vm817_vm13, %vm818_vm3 }
 0x135   : > { %1081 = vst [vmem:[%s1622_s14 + $0x70] sm:$0xff] %v810_v54  ;;  %v930_v57 = vsel %vm2013_vm7, %v929_v27, %v925_v55  ;;  %v696_v62 = vadd.f32 %v1472_v31, %v695_v46  ;;  %v935_v4 = vmul.f32 %v1476_v32, %v934_v59  ;;  %vm938_vm7 = vweird.f32 %v1476_v32  ;;  %v1478_v8 = vpop.eup %1477 }
 0x136   : > { %1089 = vst [vmem:[%s1622_s14 + $0xb0] sm:$0xff] %v930_v57  ;;  %v1045_v58 = vsel %vm1044_vm4, %v1470_v28, %v1041_v41  ;;  %v816_v0 = vadd.f32 %v1474_v37, %v815_v60  ;;  %vm937_vm9 = vweird.f32 %v1998_v13  ;;  %v944_v11 = vor.u32 1.1754944e-38, %v943_v2 }
 0x137   : > { %v1050_v5 = vsel %vm2021_vm12, %v1049_v36, %v1045_v58  ;;  %v700_v6 = vsel %vm699_vm5, %v1472_v31, %v696_v62  ;;  %v936_v9 = vadd.f32 %v1476_v32, %v935_v4  ;;  %vm939_vm10 = vmor %vm937_vm9, %vm938_vm7  ;;  %vm942_vm11 = vcmp.eq.f32.partialorder %v941_v63, 8.507059e+37 }
 0x138   : > { %1097 = vst [vmem:[%s1622_s14 + $0xf0] sm:$0xff] %v1050_v5  ;;  %v705_v61 = vsel %vm2027_vm14, %v704_v30, %v700_v6  ;;  %v820_v1 = vsel %vm819_vm6, %v1474_v37, %v816_v0  ;;  %v1053_v14 = vmul.f32 %v1478_v8, %v586_v49  ;;  %v1063_v16 = vand.u32 2147483648, %v586_v49 }
 0x139   : > { %1074 = vst [vmem:[%s1622_s14 + $0x38] sm:$0xff] %v705_v61  ;;  %v825_v3 = vsel %vm822_vm8, %v824_v52, %v820_v1  ;;  %v940_v24 = vsel %vm939_vm10, %v1476_v32, %v936_v9  ;;  %vm1058_vm12 = vweird.f32 %v1478_v8  ;;  %v1061_v19 = vand.u32 2147483647, %v586_v49 }
 0x13a   : > { %1082 = vst [vmem:[%s1622_s14 + $0x78] sm:$0xff] %v825_v3  ;;  %v945_v12 = vsel %vm942_vm11, %v944_v11, %v940_v24  ;;  %v1054_v15 = vsub.f32 1.0, %v1053_v14  ;;  %vm1057_vm13 = vweird.f32 %v586_v49  ;;  %v1064_v20 = vor.u32 1.1754944e-38, %v1063_v16 }
 0x13b   : > { %1090 = vst [vmem:[%s1622_s14 + $0xb8] sm:$0xff] %v945_v12  ;;  %vm1059_vm14 = vmor %vm1057_vm13, %vm1058_vm12  ;;  %vm1062_vm15 = vcmp.eq.f32.partialorder %v1061_v19, 8.507059e+37 }
 0x13c   : > { %v1055_v7 = vmul.f32 %v1478_v8, %v1054_v15 }
 0x13e   : > { %v1056_v10 = vadd.f32 %v1478_v8, %v1055_v7 }
 0x140   : > { %v1060_v13 = vsel %vm1059_vm14, %v1478_v8, %v1056_v10 }
 0x141   : > { %v1065_v21 = vsel %vm1062_vm15, %v1064_v20, %v1060_v13 }
 0x142   : > { %1098 = vst [vmem:[%s1622_s14 + $0xf8] sm:$0xff] %v1065_v21 }
 0x143 PF: > { %s13_s12 = sadd.s32 1, %s1486_s12  }
 0x144   : > { %p10_p4 = scmp.ge.s32.totalorder %s13_s12, 4  }
 0x146   :  { %12 = sbr.rel (!%p10_p4) target bundleno = 1 (0x1), region = 62 }

// kernel: rrg_fwd.54
= control target key start
LH: loop header
LB: loop body
LE: loop exit
PB: predicated region body
PF: predicated region fallthrough
CT: control target
= control target key end

     0   :  { %s499_s12 = smov 0   ;;  %s543_s0 = inlined_call_operand.vmem [shape: bf16[128,128], index: 0, kind: input, shape index: {}]   ;;  %s544_s1 = inlined_call_operand.vmem [shape: bf16[128,128], index: 1, kind: input, shape index: {}]   ;;  %s545_s2 = inlined_call_operand.vmem [shape: f32[1,128], index: 2, kind: input, shape index: {}]   ;;  %s546_s3 = inlined_call_operand.vmem [shape: f32[128,128], index: 3, kind: output, shape index: {}]  }
   0x1 LB: > { %s367_s13 = sadd.s32 4294967295, %s477_s12   ;;  %p371_p0 = scmp.ge.s32.totalorder %s477_s12, 1  ;;  %s477_s12 = sphi %s499_s12, %s13_s12  }
   0x2   : > { %p138_p1 = scmp.lt.s32.totalorder %s477_s12, 3 }
   0x4   : > { %p139_p2 = pnand %p371_p0, %p138_p1 }
   0x5   : > { %s372_s22 = sshll.u32 (!%p139_p2), %s367_s13, 3 }
   0x6   : > { %142 = sbr.rel (%p139_p2) target bundleno = 188 (0xbc), region = 32  ;;  %p163_p3 = scmp.lt.s32.totalorder (!%p139_p2), %s372_s22, 15 }
   0xb   : > { %v437_v0 = vld [vmem:[%s544_s1 + $0x38] sm:$0xff]  ;;  %v436_v1 = vld [vmem:[%s544_s1 + $0x30] sm:$0xff]  ;;  %v435_v2 = vld [vmem:[%s544_s1 + $0x28] sm:$0xff]  ;;  %s548_s22 = smov (!%p163_p3, %s372_s22), 15 }
   0xc   : > { %274 = vmatpush.bf16.msra.mxu0 %v437_v0  ;;  %438 = vmatpush.bf16.msra.mxu1 %v437_v0  ;;  %v434_v3 = vld [vmem:[%s544_s1 + $0x20] sm:$0xff]  ;;  %v433_v4 = vld [vmem:[%s544_s1 + $0x18] sm:$0xff]  ;;  %v432_v5 = vld [vmem:[%s544_s1 + $0x10] sm:$0xff]  ;;  %s373_s29 = sshll.u32 %s548_s22, 2  ;;  %s375_s8 = sshll.u32 %s548_s22, 3 }
   0xd   : > { %439 = vmatpush.bf16.msra.mxu2 %v437_v0  ;;  %440 = vmatpush.bf16.msra.mxu3 %v437_v0  ;;  %v431_v6 = vld [vmem:[%s544_s1 + $0x8] sm:$0xff]  ;;  %v430_v7 = vld [vmem:[%s544_s1] sm:$0xff]  ;;  %s166_s7 = scalar_lea.vmem %s543_s0, %s373_s29  ;;  %s172_s14 = scalar_lea.vmem %s546_s3, %s375_s8 }
   0xe   : > { %v426_v8 = vld [vmem:[%s166_s7] sm:$0xff]  ;;  %v427_v9 = vld [vmem:[%s166_s7 + $0x8] sm:$0xff]  ;;  %v428_v10 = vld [vmem:[%s166_s7 + $0x10] sm:$0xff] }
   0xf   : > { %v429_v11 = vld [vmem:[%s166_s7 + $0x18] sm:$0xff]  ;;  %v470_v12 = vld [vmem:[%s545_s2] ss:$0 sm:$0xff] }
  0x10   : > { %275 = vmatpush.bf16.msra.mxu0 %v436_v1  ;;  %441 = vmatpush.bf16.msra.mxu1 %v436_v1 }
  0x11   : > { %442 = vmatpush.bf16.msra.mxu2 %v436_v1  ;;  %443 = vmatpush.bf16.msra.mxu3 %v436_v1 }
  0x14   : > { %276 = vmatpush.bf16.msra.mxu0 %v435_v2  ;;  %444 = vmatpush.bf16.msra.mxu1 %v435_v2 }
  0x15   : > { %445 = vmatpush.bf16.msra.mxu2 %v435_v2  ;;  %446 = vmatpush.bf16.msra.mxu3 %v435_v2 }
  0x18   : > { %277 = vmatpush.bf16.msra.mxu0 %v434_v3  ;;  %447 = vmatpush.bf16.msra.mxu1 %v434_v3 }
  0x19   : > { %448 = vmatpush.bf16.msra.mxu2 %v434_v3  ;;  %449 = vmatpush.bf16.msra.mxu3 %v434_v3 }
  0x1c   : > { %278 = vmatpush.bf16.msra.mxu0 %v433_v4  ;;  %450 = vmatpush.bf16.msra.mxu1 %v433_v4 }
  0x1d   : > { %451 = vmatpush.bf16.msra.mxu2 %v433_v4  ;;  %452 = vmatpush.bf16.msra.mxu3 %v433_v4 }
  0x20   : > { %279 = vmatpush.bf16.msra.mxu0 %v432_v5  ;;  %453 = vmatpush.bf16.msra.mxu1 %v432_v5 }
  0x21   : > { %454 = vmatpush.bf16.msra.mxu2 %v432_v5  ;;  %455 = vmatpush.bf16.msra.mxu3 %v432_v5 }
  0x24   : > { %280 = vmatpush.bf16.msra.mxu0 %v431_v6  ;;  %456 = vmatpush.bf16.msra.mxu1 %v431_v6 }
  0x25   : > { %457 = vmatpush.bf16.msra.mxu2 %v431_v6  ;;  %458 = vmatpush.bf16.msra.mxu3 %v431_v6 }
  0x28   : > { %281 = vmatpush.bf16.msra.mxu0 %v430_v7  ;;  %459 = vmatpush.bf16.msra.mxu1 %v430_v7 }
  0x29   : > { %460 = vmatpush.bf16.msra.mxu2 %v430_v7  ;;  %461 = vmatpush.bf16.msra.mxu3 %v430_v7 }
  0x2b   : > { %282 = vmatmul.bf16.vlgmr.msra.gmra.mxu0 %v426_v8  ;;  %287 = vmatmul.bf16.vlgmr.msra.gmra.mxu1 %v427_v9 }
  0x2c   : > { %292 = vmatmul.bf16.vlgmr.msra.gmra.mxu2 %v428_v10  ;;  %297 = vmatmul.bf16.vlgmr.msra.gmra.mxu3 %v429_v11 }
  0xa8   : > { %v283_v13 = vpop.f32.mrf.mxu0  ;;  %v288_v14 = vpop.f32.mrf.mxu1 }
  0xa9   : > { %v284_v15 = vadd.f32 %v470_v12, %v283_v13  ;;  %v289_v16 = vadd.f32 %v470_v12, %v288_v14 }
  0xab   : > { %303 = vst [vmem:[%s172_s14] sm:$0xff] %v284_v15 }
  0xac   : > { %305 = vst [vmem:[%s172_s14 + $0x10] sm:$0xff] %v289_v16 }
  0xaf   : > { %v293_v17 = vpop.f32.mrf.mxu2  ;;  %v298_v18 = vpop.f32.mrf.mxu3 }
  0xb0   : > { %v294_v19 = vadd.f32 %v470_v12, %v293_v17  ;;  %v299_v20 = vadd.f32 %v470_v12, %v298_v18  ;;  %v285_v21 = vpop.f32.mrf.mxu0  ;;  %v290_v22 = vpop.f32.mrf.mxu1 }
  0xb1   : > { %v286_v23 = vadd.f32 %v470_v12, %v285_v21  ;;  %v291_v24 = vadd.f32 %v470_v12, %v290_v22 }
  0xb2   : > { %307 = vst [vmem:[%s172_s14 + $0x20] sm:$0xff] %v294_v19 }
  0xb3   : > { %309 = vst [vmem:[%s172_s14 + $0x30] sm:$0xff] %v299_v20 }
  0xb4   : > { %304 = vst [vmem:[%s172_s14 + $0x8] sm:$0xff] %v286_v23 }
  0xb5   : > { %306 = vst [vmem:[%s172_s14 + $0x18] sm:$0xff] %v291_v24 }
  0xb7   : > { %v295_v25 = vpop.f32.mrf.mxu2  ;;  %v300_v26 = vpop.f32.mrf.mxu3 }
  0xb8   : > { %v296_v27 = vadd.f32 %v470_v12, %v295_v25  ;;  %v301_v28 = vadd.f32 %v470_v12, %v300_v26 }
  0xba   : > { %308 = vst [vmem:[%s172_s14 + $0x28] sm:$0xff] %v296_v27 }
  0xbb   : > { %310 = vst [vmem:[%s172_s14 + $0x38] sm:$0xff] %v301_v28 }
  0xbc PF: > { %s13_s12 = sadd.s32 1, %s477_s12  }
  0xbd   : > { %p10_p4 = scmp.ge.s32.totalorder %s13_s12, 4  }
  0xbf   :  { %12 = sbr.rel (!%p10_p4) target bundleno = 1 (0x1), region = 62 }

// kernel: rrg_fwd.56
= control target key start
LH: loop header
LB: loop body
LE: loop exit
PB: predicated region body
PF: predicated region fallthrough
CT: control target
= control target key end

     0   :  { %s726_s15 = smov 0   ;;  %s832_s0 = inlined_call_operand.vmem [shape: bf16[128,256], index: 0, kind: input, shape index: {}]   ;;  %s833_s1 = inlined_call_operand.vmem [shape: bf16[256,128], index: 1, kind: input, shape index: {}]   ;;  %s834_s2 = inlined_call_operand.vmem [shape: f32[1,128], index: 2, kind: input, shape index: {}]   ;;  %s835_s3 = inlined_call_operand.vmem [shape: f32[1,128], index: 3, kind: input, shape index: {}]   ;;  %s836_s4 = inlined_call_operand.vmem [shape: f32[128,128], index: 4, kind: output, shape index: {}]  }
   0x1 LB: > { %s534_s16 = sadd.s32 4294967295, %s699_s15   ;;  %p538_p0 = scmp.ge.s32.totalorder %s699_s15, 1  ;;  %s699_s15 = sphi %s726_s15, %s14_s15  }
   0x2   : > { %p164_p1 = scmp.lt.s32.totalorder %s699_s15, 3 }
   0x4   : > { %p165_p2 = pnand %p538_p0, %p164_p1 }
   0x5   : > { %s539_s29 = sshll.u32 (!%p165_p2), %s534_s16, 3 }
   0x6   : > { %168 = sbr.rel (%p165_p2) target bundleno = 207 (0xcf), region = 36  ;;  %p192_p3 = scmp.lt.s32.totalorder (!%p165_p2), %s539_s29, 15 }
   0xb   : > { %v658_v0 = vld [vmem:[%s833_s1 + $0x38] sm:$0xff]  ;;  %v657_v2 = vld [vmem:[%s833_s1 + $0x30] sm:$0xff]  ;;  %v656_v4 = vld [vmem:[%s833_s1 + $0x28] sm:$0xff]  ;;  %s838_s29 = smov (!%p192_p3, %s539_s29), 15 }
   0xc   : > { %v666_v1 = vld [vmem:[%s833_s1 + $0x78] sm:$0xff]  ;;  %384 = vmatpush.bf16.msra.mxu0 %v658_v0  ;;  %667 = vmatpush.bf16.msra.mxu2 %v658_v0  ;;  %v665_v3 = vld [vmem:[%s833_s1 + $0x70] sm:$0xff]  ;;  %v664_v5 = vld [vmem:[%s833_s1 + $0x68] sm:$0xff]  ;;  %s642_s17 = sshll.u32 %s838_s29, 3 }
   0xd   : > { %413 = vmatpush.bf16.msra.mxu1 %v666_v1  ;;  %675 = vmatpush.bf16.msra.mxu3 %v666_v1  ;;  %v655_v6 = vld [vmem:[%s833_s1 + $0x20] sm:$0xff]  ;;  %v654_v8 = vld [vmem:[%s833_s1 + $0x18] sm:$0xff]  ;;  %v653_v10 = vld [vmem:[%s833_s1 + $0x10] sm:$0xff]  ;;  %s781_s22 = scalar_lea.vmem %s832_s0, %s642_s17  ;;  %s819_s10 = scalar_lea.vmem %s836_s4, %s642_s17 }
   0xe   : > { %v663_v7 = vld [vmem:[%s833_s1 + $0x60] sm:$0xff]  ;;  %v662_v9 = vld [vmem:[%s833_s1 + $0x58] sm:$0xff]  ;;  %v661_v11 = vld [vmem:[%s833_s1 + $0x50] sm:$0xff] }
   0xf   : > { %v652_v12 = vld [vmem:[%s833_s1 + $0x8] sm:$0xff]  ;;  %v651_v14 = vld [vmem:[%s833_s1] sm:$0xff]  ;;  %v554_v28 = vld [vmem:[%s781_s22 + $0x10] sm:$0xf] }
  0x10   : > { %385 = vmatpush.bf16.msra.mxu0 %v657_v2  ;;  %668 = vmatpush.bf16.msra.mxu2 %v657_v2  ;;  %v660_v13 = vld [vmem:[%s833_s1 + $0x48] sm:$0xff]  ;;  %v659_v15 = vld [vmem:[%s833_s1 + $0x40] sm:$0xff]  ;;  %v646_v29 = vld [vmem:[%s781_s22 + $0x14] sm:$0xf0] }
  0x11   : > { %414 = vmatpush.bf16.msra.mxu1 %v665_v3  ;;  %676 = vmatpush.bf16.msra.mxu3 %v665_v3  ;;  %v546_v16 = vld [vmem:[%s781_s22] sm:$0xf]  ;;  %v644_v17 = vld [vmem:[%s781_s22 + $0x4] sm:$0xf0]  ;;  %v643_v20 = vld [vmem:[%s781_s22 + $0x4] sm:$0xf]  ;;  %v555_v36 = vor.u32 %v646_v29, %v554_v28 }
  0x12   : > { %v562_v18 = vld [vmem:[%s781_s22 + $0x20] sm:$0xf]  ;;  %v648_v19 = vld [vmem:[%s781_s22 + $0x24] sm:$0xf0]  ;;  %v548_v21 = vld [vmem:[%s781_s22 + $0x8] sm:$0xf0]  ;;  %v547_v24 = vor.u32 %v644_v17, %v546_v16 }
  0x13   : > { %v647_v22 = vld [vmem:[%s781_s22 + $0x24] sm:$0xf]  ;;  %v564_v23 = vld [vmem:[%s781_s22 + $0x28] sm:$0xf0]  ;;  %v563_v25 = vor.u32 %v648_v19, %v562_v18  ;;  %v551_v26 = vor.u32 %v643_v20, %v548_v21  ;;  %v570_v30 = vld [vmem:[%s781_s22 + $0x30] sm:$0xf] }
  0x14   : > { %386 = vmatpush.bf16.msra.mxu0 %v656_v4  ;;  %669 = vmatpush.bf16.msra.mxu2 %v656_v4  ;;  %v567_v27 = vor.u32 %v647_v22, %v564_v23  ;;  %v650_v31 = vld [vmem:[%s781_s22 + $0x34] sm:$0xf0]  ;;  %v645_v32 = vld [vmem:[%s781_s22 + $0x14] sm:$0xf]  ;;  %v556_v33 = vld [vmem:[%s781_s22 + $0x18] sm:$0xf0] }
  0x15   : > { %415 = vmatpush.bf16.msra.mxu1 %v664_v5  ;;  %677 = vmatpush.bf16.msra.mxu3 %v664_v5  ;;  %v649_v34 = vld [vmem:[%s781_s22 + $0x34] sm:$0xf]  ;;  %v572_v35 = vld [vmem:[%s781_s22 + $0x38] sm:$0xf0]  ;;  %v571_v37 = vor.u32 %v650_v31, %v570_v30  ;;  %v559_v38 = vor.u32 %v645_v32, %v556_v33  ;;  %v691_v40 = vld [vmem:[%s834_s2] ss:$0 sm:$0xff] }
  0x16   : > { %v575_v39 = vor.u32 %v649_v34, %v572_v35  ;;  %v692_v44 = vld [vmem:[%s835_s3] ss:$0 sm:$0xff] }
  0x18   : > { %387 = vmatpush.bf16.msra.mxu0 %v655_v6  ;;  %670 = vmatpush.bf16.msra.mxu2 %v655_v6 }
  0x19   : > { %416 = vmatpush.bf16.msra.mxu1 %v663_v7  ;;  %678 = vmatpush.bf16.msra.mxu3 %v663_v7 }
  0x1c   : > { %388 = vmatpush.bf16.msra.mxu0 %v654_v8  ;;  %671 = vmatpush.bf16.msra.mxu2 %v654_v8 }
  0x1d   : > { %417 = vmatpush.bf16.msra.mxu1 %v662_v9  ;;  %679 = vmatpush.bf16.msra.mxu3 %v662_v9 }
  0x20   : > { %389 = vmatpush.bf16.msra.mxu0 %v653_v10  ;;  %672 = vmatpush.bf16.msra.mxu2 %v653_v10 }
  0x21   : > { %418 = vmatpush.bf16.msra.mxu1 %v661_v11  ;;  %680 = vmatpush.bf16.msra.mxu3 %v661_v11 }
  0x24   : > { %390 = vmatpush.bf16.msra.mxu0 %v652_v12  ;;  %673 = vmatpush.bf16.msra.mxu2 %v652_v12 }
  0x25   : > { %419 = vmatpush.bf16.msra.mxu1 %v660_v13  ;;  %681 = vmatpush.bf16.msra.mxu3 %v660_v13 }
  0x28   : > { %391 = vmatpush.bf16.msra.mxu0 %v651_v14  ;;  %674 = vmatpush.bf16.msra.mxu2 %v651_v14 }
  0x29   : > { %420 = vmatpush.bf16.msra.mxu1 %v659_v15  ;;  %682 = vmatpush.bf16.msra.mxu3 %v659_v15 }
  0x2b   : > { %392 = vmatmul.bf16.vlgmr.msra.gmra.mxu0 %v547_v24  ;;  %402 = vmatmul.bf16.vlgmr.msra.gmra.mxu2 %v563_v25 }
  0x2c   : > { %421 = vmatmul.bf16.vlgmr.msra.gmra.mxu1 %v551_v26  ;;  %431 = vmatmul.bf16.vlgmr.msra.gmra.mxu3 %v567_v27 }
  0x3b   : > { %397 = vmatmul.bf16.gmra.mxu0 %v555_v36  ;;  %407 = vmatmul.bf16.gmra.mxu2 %v571_v37 }
  0x3c   : > { %426 = vmatmul.bf16.gmra.mxu1 %v559_v38  ;;  %436 = vmatmul.bf16.gmra.mxu3 %v575_v39 }
  0xa8   : > { %v393_v41 = vpop.f32.mrf.mxu0 }
  0xa9   : > { %v394_v42 = vadd.f32 %v691_v40, %v393_v41  ;;  %v422_v43 = vpop.f32.mrf.mxu1 }
  0xab   : > { %v423_v45 = vadd.f32 %v422_v43, %v394_v42 }
  0xad   : > { %vm442_vm0 = vcmp.ge.f32.partialorder %v423_v45, 0.0  ;;  %v454_v46 = vmul.f32 %v692_v44, %v423_v45 }
  0xae   : > { %v403_v47 = vpop.f32.mrf.mxu2 }
  0xaf   : > { %v462_v48 = vsel %vm442_vm0, %v423_v45, %v454_v46  ;;  %v404_v49 = vadd.f32 %v691_v40, %v403_v47  ;;  %v432_v50 = vpop.f32.mrf.mxu3 }
  0xb0   : > { %470 = vst [vmem:[%s819_s10] sm:$0xff] %v462_v48  ;;  %v395_v51 = vpop.f32.mrf.mxu0 }
  0xb1   : > { %v433_v52 = vadd.f32 %v432_v50, %v404_v49  ;;  %v396_v53 = vadd.f32 %v691_v40, %v395_v51  ;;  %v424_v54 = vpop.f32.mrf.mxu1 }
  0xb3   : > { %vm446_vm1 = vcmp.ge.f32.partialorder %v433_v52, 0.0  ;;  %v458_v55 = vmul.f32 %v692_v44, %v433_v52  ;;  %v425_v56 = vadd.f32 %v424_v54, %v396_v53 }
  0xb5   : > { %v466_v57 = vsel %vm446_vm1, %v433_v52, %v458_v55  ;;  %vm443_vm2 = vcmp.ge.f32.partialorder %v425_v56, 0.0  ;;  %v455_v58 = vmul.f32 %v692_v44, %v425_v56 }
  0xb6   : > { %474 = vst [vmem:[%s819_s10 + $0x20] sm:$0xff] %v466_v57  ;;  %v405_v59 = vpop.f32.mrf.mxu2 }
  0xb7   : > { %v463_v60 = vsel %vm443_vm2, %v425_v56, %v455_v58  ;;  %v406_v61 = vadd.f32 %v691_v40, %v405_v59  ;;  %v434_v62 = vpop.f32.mrf.mxu3 }
  0xb8   : > { %471 = vst [vmem:[%s819_s10 + $0x8] sm:$0xff] %v463_v60  ;;  %v398_v63 = vpop.f32.mrf.mxu0 }
  0xb9   : > { %v435_v0 = vadd.f32 %v434_v62, %v406_v61  ;;  %v399_v1 = vadd.f32 %v691_v40, %v398_v63  ;;  %v427_v2 = vpop.f32.mrf.mxu1 }
  0xbb   : > { %vm447_vm3 = vcmp.ge.f32.partialorder %v435_v0, 0.0  ;;  %v459_v3 = vmul.f32 %v692_v44, %v435_v0  ;;  %v428_v4 = vadd.f32 %v427_v2, %v399_v1 }
  0xbd   : > { %v467_v5 = vsel %vm447_vm3, %v435_v0, %v459_v3  ;;  %vm444_vm4 = vcmp.ge.f32.partialorder %v428_v4, 0.0  ;;  %v456_v6 = vmul.f32 %v692_v44, %v428_v4 }
  0xbe   : > { %475 = vst [vmem:[%s819_s10 + $0x28] sm:$0xff] %v467_v5  ;;  %v408_v7 = vpop.f32.mrf.mxu2 }
  0xbf   : > { %v464_v8 = vsel %vm444_vm4, %v428_v4, %v456_v6  ;;  %v409_v9 = vadd.f32 %v691_v40, %v408_v7  ;;  %v437_v10 = vpop.f32.mrf.mxu3 }
  0xc0   : > { %472 = vst [vmem:[%s819_s10 + $0x10] sm:$0xff] %v464_v8  ;;  %v400_v11 = vpop.f32.mrf.mxu0 }
  0xc1   : > { %v438_v12 = vadd.f32 %v437_v10, %v409_v9  ;;  %v401_v13 = vadd.f32 %v691_v40, %v400_v11  ;;  %v429_v14 = vpop.f32.mrf.mxu1 }
  0xc3   : > { %vm448_vm5 = vcmp.ge.f32.partialorder %v438_v12, 0.0  ;;  %v460_v15 = vmul.f32 %v692_v44, %v438_v12  ;;  %v430_v16 = vadd.f32 %v429_v14, %v401_v13 }
  0xc5   : > { %v468_v17 = vsel %vm448_vm5, %v438_v12, %v460_v15  ;;  %vm445_vm6 = vcmp.ge.f32.partialorder %v430_v16, 0.0  ;;  %v457_v18 = vmul.f32 %v692_v44, %v430_v16 }
  0xc6   : > { %476 = vst [vmem:[%s819_s10 + $0x30] sm:$0xff] %v468_v17  ;;  %v410_v19 = vpop.f32.mrf.mxu2 }
  0xc7   : > { %v465_v20 = vsel %vm445_vm6, %v430_v16, %v457_v18  ;;  %v411_v21 = vadd.f32 %v691_v40, %v410_v19  ;;  %v439_v22 = vpop.f32.mrf.mxu3 }
  0xc8   : > { %473 = vst [vmem:[%s819_s10 + $0x18] sm:$0xff] %v465_v20 }
  0xc9   : > { %v440_v23 = vadd.f32 %v439_v22, %v411_v21 }
  0xcb   : > { %vm449_vm7 = vcmp.ge.f32.partialorder %v440_v23, 0.0  ;;  %v461_v24 = vmul.f32 %v692_v44, %v440_v23 }
  0xcd   : > { %v469_v25 = vsel %vm449_vm7, %v440_v23, %v461_v24 }
  0xce   : > { %477 = vst [vmem:[%s819_s10 + $0x38] sm:$0xff] %v469_v25 }
  0xcf PF: > { %s14_s15 = sadd.s32 1, %s699_s15  }
  0xd0   : > { %p11_p4 = scmp.ge.s32.totalorder %s14_s15, 4  }
  0xd2   :  { %13 = sbr.rel (!%p11_p4) target bundleno = 1 (0x1), region = 66 }

// kernel: rrg_fwd.57
= control target key start
LH: loop header
LB: loop body
LE: loop exit
PB: predicated region body
PF: predicated region fallthrough
CT: control target
= control target key end

     0   :  { %s665_s12 = smov 0   ;;  %s768_s0 = inlined_call_operand.vmem [shape: bf16[128,256], index: 0, kind: input, shape index: {}]   ;;  %s769_s1 = inlined_call_operand.vmem [shape: bf16[256,128], index: 1, kind: input, shape index: {}]   ;;  %s770_s2 = inlined_call_operand.vmem [shape: f32[1,128], index: 2, kind: input, shape index: {}]   ;;  %s771_s3 = inlined_call_operand.vmem [shape: f32[128,128], index: 3, kind: output, shape index: {}]  }
   0x1 LB: > { %s479_s13 = sadd.s32 4294967295, %s643_s12   ;;  %p483_p0 = scmp.ge.s32.totalorder %s643_s12, 1  ;;  %s643_s12 = sphi %s665_s12, %s13_s12  }
   0x2   : > { %p139_p1 = scmp.lt.s32.totalorder %s643_s12, 3 }
   0x4   : > { %p140_p2 = pnand %p483_p0, %p139_p1 }
   0x5   : > { %s484_s26 = sshll.u32 (!%p140_p2), %s479_s13, 3 }
   0x6   : > { %143 = sbr.rel (%p140_p2) target bundleno = 204 (0xcc), region = 32  ;;  %p165_p3 = scmp.lt.s32.totalorder (!%p140_p2), %s484_s26, 15 }
   0xb   : > { %v603_v0 = vld [vmem:[%s769_s1 + $0x38] sm:$0xff]  ;;  %v602_v2 = vld [vmem:[%s769_s1 + $0x30] sm:$0xff]  ;;  %v601_v4 = vld [vmem:[%s769_s1 + $0x28] sm:$0xff]  ;;  %s773_s26 = smov (!%p165_p3, %s484_s26), 15 }
   0xc   : > { %v611_v1 = vld [vmem:[%s769_s1 + $0x78] sm:$0xff]  ;;  %357 = vmatpush.bf16.msra.mxu0 %v603_v0  ;;  %612 = vmatpush.bf16.msra.mxu2 %v603_v0  ;;  %v610_v3 = vld [vmem:[%s769_s1 + $0x70] sm:$0xff]  ;;  %v609_v5 = vld [vmem:[%s769_s1 + $0x68] sm:$0xff]  ;;  %s587_s13 = sshll.u32 %s773_s26, 3 }
   0xd   : > { %386 = vmatpush.bf16.msra.mxu1 %v611_v1  ;;  %620 = vmatpush.bf16.msra.mxu3 %v611_v1  ;;  %v600_v6 = vld [vmem:[%s769_s1 + $0x20] sm:$0xff]  ;;  %v599_v8 = vld [vmem:[%s769_s1 + $0x18] sm:$0xff]  ;;  %v598_v10 = vld [vmem:[%s769_s1 + $0x10] sm:$0xff]  ;;  %s720_s18 = scalar_lea.vmem %s768_s0, %s587_s13  ;;  %s755_s30 = scalar_lea.vmem %s771_s3, %s587_s13 }
   0xe   : > { %v608_v7 = vld [vmem:[%s769_s1 + $0x60] sm:$0xff]  ;;  %v607_v9 = vld [vmem:[%s769_s1 + $0x58] sm:$0xff]  ;;  %v606_v11 = vld [vmem:[%s769_s1 + $0x50] sm:$0xff] }
   0xf   : > { %v597_v12 = vld [vmem:[%s769_s1 + $0x8] sm:$0xff]  ;;  %v596_v14 = vld [vmem:[%s769_s1] sm:$0xff]  ;;  %v499_v28 = vld [vmem:[%s720_s18 + $0x10] sm:$0xf] }
  0x10   : > { %358 = vmatpush.bf16.msra.mxu0 %v602_v2  ;;  %613 = vmatpush.bf16.msra.mxu2 %v602_v2  ;;  %v605_v13 = vld [vmem:[%s769_s1 + $0x48] sm:$0xff]  ;;  %v604_v15 = vld [vmem:[%s769_s1 + $0x40] sm:$0xff]  ;;  %v591_v29 = vld [vmem:[%s720_s18 + $0x14] sm:$0xf0] }
  0x11   : > { %387 = vmatpush.bf16.msra.mxu1 %v610_v3  ;;  %621 = vmatpush.bf16.msra.mxu3 %v610_v3  ;;  %v491_v16 = vld [vmem:[%s720_s18] sm:$0xf]  ;;  %v589_v17 = vld [vmem:[%s720_s18 + $0x4] sm:$0xf0]  ;;  %v588_v20 = vld [vmem:[%s720_s18 + $0x4] sm:$0xf]  ;;  %v500_v36 = vor.u32 %v591_v29, %v499_v28 }
  0x12   : > { %v507_v18 = vld [vmem:[%s720_s18 + $0x20] sm:$0xf]  ;;  %v593_v19 = vld [vmem:[%s720_s18 + $0x24] sm:$0xf0]  ;;  %v493_v21 = vld [vmem:[%s720_s18 + $0x8] sm:$0xf0]  ;;  %v492_v24 = vor.u32 %v589_v17, %v491_v16 }
  0x13   : > { %v592_v22 = vld [vmem:[%s720_s18 + $0x24] sm:$0xf]  ;;  %v509_v23 = vld [vmem:[%s720_s18 + $0x28] sm:$0xf0]  ;;  %v508_v25 = vor.u32 %v593_v19, %v507_v18  ;;  %v496_v26 = vor.u32 %v588_v20, %v493_v21  ;;  %v515_v30 = vld [vmem:[%s720_s18 + $0x30] sm:$0xf] }
  0x14   : > { %359 = vmatpush.bf16.msra.mxu0 %v601_v4  ;;  %614 = vmatpush.bf16.msra.mxu2 %v601_v4  ;;  %v512_v27 = vor.u32 %v592_v22, %v509_v23  ;;  %v595_v31 = vld [vmem:[%s720_s18 + $0x34] sm:$0xf0]  ;;  %v590_v32 = vld [vmem:[%s720_s18 + $0x14] sm:$0xf]  ;;  %v501_v33 = vld [vmem:[%s720_s18 + $0x18] sm:$0xf0] }
  0x15   : > { %388 = vmatpush.bf16.msra.mxu1 %v609_v5  ;;  %622 = vmatpush.bf16.msra.mxu3 %v609_v5  ;;  %v594_v34 = vld [vmem:[%s720_s18 + $0x34] sm:$0xf]  ;;  %v517_v35 = vld [vmem:[%s720_s18 + $0x38] sm:$0xf0]  ;;  %v516_v37 = vor.u32 %v595_v31, %v515_v30  ;;  %v504_v38 = vor.u32 %v590_v32, %v501_v33  ;;  %v636_v40 = vld [vmem:[%s770_s2] ss:$0 sm:$0xff] }
  0x16   : > { %v520_v39 = vor.u32 %v594_v34, %v517_v35 }
  0x18   : > { %360 = vmatpush.bf16.msra.mxu0 %v600_v6  ;;  %615 = vmatpush.bf16.msra.mxu2 %v600_v6 }
  0x19   : > { %389 = vmatpush.bf16.msra.mxu1 %v608_v7  ;;  %623 = vmatpush.bf16.msra.mxu3 %v608_v7 }
  0x1c   : > { %361 = vmatpush.bf16.msra.mxu0 %v599_v8  ;;  %616 = vmatpush.bf16.msra.mxu2 %v599_v8 }
  0x1d   : > { %390 = vmatpush.bf16.msra.mxu1 %v607_v9  ;;  %624 = vmatpush.bf16.msra.mxu3 %v607_v9 }
  0x20   : > { %362 = vmatpush.bf16.msra.mxu0 %v598_v10  ;;  %617 = vmatpush.bf16.msra.mxu2 %v598_v10 }
  0x21   : > { %391 = vmatpush.bf16.msra.mxu1 %v606_v11  ;;  %625 = vmatpush.bf16.msra.mxu3 %v606_v11 }
  0x24   : > { %363 = vmatpush.bf16.msra.mxu0 %v597_v12  ;;  %618 = vmatpush.bf16.msra.mxu2 %v597_v12 }
  0x25   : > { %392 = vmatpush.bf16.msra.mxu1 %v605_v13  ;;  %626 = vmatpush.bf16.msra.mxu3 %v605_v13 }
  0x28   : > { %364 = vmatpush.bf16.msra.mxu0 %v596_v14  ;;  %619 = vmatpush.bf16.msra.mxu2 %v596_v14 }
  0x29   : > { %393 = vmatpush.bf16.msra.mxu1 %v604_v15  ;;  %627 = vmatpush.bf16.msra.mxu3 %v604_v15 }
  0x2b   : > { %365 = vmatmul.bf16.vlgmr.msra.gmra.mxu0 %v492_v24  ;;  %375 = vmatmul.bf16.vlgmr.msra.gmra.mxu2 %v508_v25 }
  0x2c   : > { %394 = vmatmul.bf16.vlgmr.msra.gmra.mxu1 %v496_v26  ;;  %404 = vmatmul.bf16.vlgmr.msra.gmra.mxu3 %v512_v27 }
  0x3b   : > { %370 = vmatmul.bf16.gmra.mxu0 %v500_v36  ;;  %380 = vmatmul.bf16.gmra.mxu2 %v516_v37 }
  0x3c   : > { %399 = vmatmul.bf16.gmra.mxu1 %v504_v38  ;;  %409 = vmatmul.bf16.gmra.mxu3 %v520_v39 }
  0xa8   : > { %v366_v41 = vpop.f32.mrf.mxu0 }
  0xa9   : > { %v367_v42 = vadd.f32 %v636_v40, %v366_v41  ;;  %v395_v43 = vpop.f32.mrf.mxu1 }
  0xab   : > { %v396_v44 = vadd.f32 %v395_v43, %v367_v42 }
  0xad   : > { %415 = vst [vmem:[%s755_s30] sm:$0xff] %v396_v44 }
  0xae   : > { %v376_v45 = vpop.f32.mrf.mxu2 }
  0xaf   : > { %v377_v46 = vadd.f32 %v636_v40, %v376_v45  ;;  %v405_v47 = vpop.f32.mrf.mxu3 }
  0xb0   : > { %v368_v48 = vpop.f32.mrf.mxu0 }
  0xb1   : > { %v406_v49 = vadd.f32 %v405_v47, %v377_v46  ;;  %v369_v50 = vadd.f32 %v636_v40, %v368_v48  ;;  %v397_v51 = vpop.f32.mrf.mxu1 }
  0xb3   : > { %419 = vst [vmem:[%s755_s30 + $0x20] sm:$0xff] %v406_v49  ;;  %v398_v52 = vadd.f32 %v397_v51, %v369_v50 }
  0xb5   : > { %416 = vst [vmem:[%s755_s30 + $0x8] sm:$0xff] %v398_v52 }
  0xb6   : > { %v378_v53 = vpop.f32.mrf.mxu2 }
  0xb7   : > { %v379_v54 = vadd.f32 %v636_v40, %v378_v53  ;;  %v407_v55 = vpop.f32.mrf.mxu3 }
  0xb8   : > { %v371_v56 = vpop.f32.mrf.mxu0 }
  0xb9   : > { %v408_v57 = vadd.f32 %v407_v55, %v379_v54  ;;  %v372_v58 = vadd.f32 %v636_v40, %v371_v56  ;;  %v400_v59 = vpop.f32.mrf.mxu1 }
  0xbb   : > { %420 = vst [vmem:[%s755_s30 + $0x28] sm:$0xff] %v408_v57  ;;  %v401_v60 = vadd.f32 %v400_v59, %v372_v58 }
  0xbd   : > { %417 = vst [vmem:[%s755_s30 + $0x10] sm:$0xff] %v401_v60 }
  0xbe   : > { %v381_v61 = vpop.f32.mrf.mxu2 }
  0xbf   : > { %v382_v62 = vadd.f32 %v636_v40, %v381_v61  ;;  %v410_v63 = vpop.f32.mrf.mxu3 }
  0xc0   : > { %v373_v0 = vpop.f32.mrf.mxu0 }
  0xc1   : > { %v411_v1 = vadd.f32 %v410_v63, %v382_v62  ;;  %v374_v2 = vadd.f32 %v636_v40, %v373_v0  ;;  %v402_v3 = vpop.f32.mrf.mxu1 }
  0xc3   : > { %421 = vst [vmem:[%s755_s30 + $0x30] sm:$0xff] %v411_v1  ;;  %v403_v4 = vadd.f32 %v402_v3, %v374_v2 }
  0xc5   : > { %418 = vst [vmem:[%s755_s30 + $0x18] sm:$0xff] %v403_v4 }
  0xc6   : > { %v383_v5 = vpop.f32.mrf.mxu2 }
  0xc7   : > { %v384_v6 = vadd.f32 %v636_v40, %v383_v5  ;;  %v412_v7 = vpop.f32.mrf.mxu3 }
  0xc9   : > { %v413_v8 = vadd.f32 %v412_v7, %v384_v6 }
  0xcb   : > { %422 = vst [vmem:[%s755_s30 + $0x38] sm:$0xff] %v413_v8 }
  0xcc PF: > { %s13_s12 = sadd.s32 1, %s643_s12  }
  0xcd   : > { %p10_p4 = scmp.ge.s32.totalorder %s13_s12, 4  }
  0xcf   :  { %12 = sbr.rel (!%p10_p4) target bundleno = 1 (0x1), region = 62 }

// kernel: rrg_fwd.58
= control target key start
LH: loop header
LB: loop body
LE: loop exit
PB: predicated region body
PF: predicated region fallthrough
CT: control target
= control target key end

     0   :  { %s691_s12 = smov 0   ;;  %s810_s0 = inlined_call_operand.vmem [shape: bf16[128,128], index: 0, kind: input, shape index: {}]   ;;  %s811_s1 = inlined_call_operand.vmem [shape: bf16[128,128], index: 1, kind: input, shape index: {}]   ;;  %s812_s2 = inlined_call_operand.vmem [shape: f32[1,128], index: 2, kind: input, shape index: {}]   ;;  %s813_s3 = inlined_call_operand.vmem [shape: f32[128,128], index: 3, kind: output, shape index: {}]  }
   0x1 LB: > { %s519_s13 = sadd.s32 4294967295, %s669_s12   ;;  %p523_p0 = scmp.ge.s32.totalorder %s669_s12, 1  ;;  %s669_s12 = sphi %s691_s12, %s13_s12  }
   0x2   : > { %p138_p1 = scmp.lt.s32.totalorder %s669_s12, 3 }
   0x4   : > { %p139_p2 = pnand %p523_p0, %p138_p1 }
   0x5   : > { %s524_s22 = sshll.u32 (!%p139_p2), %s519_s13, 3 }
   0x6   : > { %142 = sbr.rel (%p139_p2) target bundleno = 219 (0xdb), region = 32  ;;  %p163_p3 = scmp.lt.s32.totalorder (!%p139_p2), %s524_s22, 15 }
   0xb   : > { %v597_v0 = vld [vmem:[%s811_s1 + $0x38] sm:$0xff]  ;;  %v596_v1 = vld [vmem:[%s811_s1 + $0x30] sm:$0xff]  ;;  %v595_v2 = vld [vmem:[%s811_s1 + $0x28] sm:$0xff]  ;;  %s819_s22 = smov (!%p163_p3, %s524_s22), 15 }
   0xc   : > { %274 = vmatpush.bf16.msra.mxu0 %v597_v0  ;;  %598 = vmatpush.bf16.msra.mxu1 %v597_v0  ;;  %v594_v3 = vld [vmem:[%s811_s1 + $0x20] sm:$0xff]  ;;  %v593_v4 = vld [vmem:[%s811_s1 + $0x18] sm:$0xff]  ;;  %v592_v5 = vld [vmem:[%s811_s1 + $0x10] sm:$0xff]  ;;  %s525_s29 = sshll.u32 %s819_s22, 2  ;;  %s527_s10 = sshll.u32 %s819_s22, 3 }
   0xd   : > { %599 = vmatpush.bf16.msra.mxu2 %v597_v0  ;;  %600 = vmatpush.bf16.msra.mxu3 %v597_v0  ;;  %v591_v6 = vld [vmem:[%s811_s1 + $0x8] sm:$0xff]  ;;  %v590_v7 = vld [vmem:[%s811_s1] sm:$0xff]  ;;  %s166_s7 = scalar_lea.vmem %s810_s0, %s525_s29  ;;  %s747_s14 = scalar_lea.vmem %s813_s3, %s527_s10 }
   0xe   : > { %v586_v8 = vld [vmem:[%s166_s7] sm:$0xff]  ;;  %v587_v9 = vld [vmem:[%s166_s7 + $0x8] sm:$0xff]  ;;  %v588_v10 = vld [vmem:[%s166_s7 + $0x10] sm:$0xff] }
   0xf   : > { %v589_v11 = vld [vmem:[%s166_s7 + $0x18] sm:$0xff]  ;;  %v630_v12 = vld [vmem:[%s812_s2] ss:$0 sm:$0xff] }
  0x10   : > { %275 = vmatpush.bf16.msra.mxu0 %v596_v1  ;;  %601 = vmatpush.bf16.msra.mxu1 %v596_v1 }
  0x11   : > { %602 = vmatpush.bf16.msra.mxu2 %v596_v1  ;;  %603 = vmatpush.bf16.msra.mxu3 %v596_v1 }
  0x14   : > { %276 = vmatpush.bf16.msra.mxu0 %v595_v2  ;;  %604 = vmatpush.bf16.msra.mxu1 %v595_v2 }
  0x15   : > { %605 = vmatpush.bf16.msra.mxu2 %v595_v2  ;;  %606 = vmatpush.bf16.msra.mxu3 %v595_v2 }
  0x18   : > { %277 = vmatpush.bf16.msra.mxu0 %v594_v3  ;;  %607 = vmatpush.bf16.msra.mxu1 %v594_v3 }
  0x19   : > { %608 = vmatpush.bf16.msra.mxu2 %v594_v3  ;;  %609 = vmatpush.bf16.msra.mxu3 %v594_v3 }
  0x1c   : > { %278 = vmatpush.bf16.msra.mxu0 %v593_v4  ;;  %610 = vmatpush.bf16.msra.mxu1 %v593_v4 }
  0x1d   : > { %611 = vmatpush.bf16.msra.mxu2 %v593_v4  ;;  %612 = vmatpush.bf16.msra.mxu3 %v593_v4 }
  0x20   : > { %279 = vmatpush.bf16.msra.mxu0 %v592_v5  ;;  %613 = vmatpush.bf16.msra.mxu1 %v592_v5 }
  0x21   : > { %614 = vmatpush.bf16.msra.mxu2 %v592_v5  ;;  %615 = vmatpush.bf16.msra.mxu3 %v592_v5 }
  0x24   : > { %280 = vmatpush.bf16.msra.mxu0 %v591_v6  ;;  %616 = vmatpush.bf16.msra.mxu1 %v591_v6 }
  0x25   : > { %617 = vmatpush.bf16.msra.mxu2 %v591_v6  ;;  %618 = vmatpush.bf16.msra.mxu3 %v591_v6 }
  0x28   : > { %281 = vmatpush.bf16.msra.mxu0 %v590_v7  ;;  %619 = vmatpush.bf16.msra.mxu1 %v590_v7 }
  0x29   : > { %620 = vmatpush.bf16.msra.mxu2 %v590_v7  ;;  %621 = vmatpush.bf16.msra.mxu3 %v590_v7 }
  0x2b   : > { %282 = vmatmul.bf16.vlgmr.msra.gmra.mxu0 %v586_v8  ;;  %287 = vmatmul.bf16.vlgmr.msra.gmra.mxu1 %v587_v9 }
  0x2c   : > { %292 = vmatmul.bf16.vlgmr.msra.gmra.mxu2 %v588_v10  ;;  %297 = vmatmul.bf16.vlgmr.msra.gmra.mxu3 %v589_v11 }
  0xa8   : > { %v283_v13 = vpop.f32.mrf.mxu0  ;;  %v288_v14 = vpop.f32.mrf.mxu1 }
  0xa9   : > { %v284_v15 = vadd.f32 %v630_v12, %v283_v13  ;;  %v289_v16 = vadd.f32 %v630_v12, %v288_v14 }
  0xab   : > { %v576_v17 = vmul.f32 -1.442695, %v284_v15  ;;  %v578_v18 = vmul.f32 -1.442695, %v289_v16 }
  0xad   : > { %631 = vpow2.f32 %v576_v17 }
  0xae   : > { %633 = vpow2.f32 %v578_v18 }
  0xaf   : > { %v293_v19 = vpop.f32.mrf.mxu2  ;;  %v298_v20 = vpop.f32.mrf.mxu3 }
  0xb0   : > { %v294_v21 = vadd.f32 %v630_v12, %v293_v19  ;;  %v299_v22 = vadd.f32 %v630_v12, %v298_v20  ;;  %v285_v23 = vpop.f32.mrf.mxu0  ;;  %v290_v24 = vpop.f32.mrf.mxu1 }
  0xb1   : > { %v286_v25 = vadd.f32 %v630_v12, %v285_v23  ;;  %v291_v26 = vadd.f32 %v630_v12, %v290_v24 }
  0xb2   : > { %v580_v27 = vmul.f32 -1.442695, %v294_v21  ;;  %v582_v28 = vmul.f32 -1.442695, %v299_v22 }
  0xb3   : > { %v632_v29 = vpop.eup %631  ;;  %v577_v32 = vmul.f32 -1.442695, %v286_v25  ;;  %v579_v34 = vmul.f32 -1.442695, %v291_v26 }
  0xb4   : > { %v634_v30 = vpop.eup %633  ;;  %v327_v31 = vadd.f32 1.0, %v632_v29  ;;  %635 = vpow2.f32 %v580_v27 }
  0xb5   : > { %v329_v33 = vadd.f32 1.0, %v634_v30  ;;  %637 = vpow2.f32 %v582_v28 }
  0xb6   : > { %639 = vrcp.f32 %v327_v31  ;;  %vm340_vm0 = vweird.f32 %v327_v31  ;;  %v344_v52 = vand.u32 2147483647, %v327_v31  ;;  %v346_v53 = vand.u32 2147483648, %v327_v31 }
  0xb7   : > { %641 = vrcp.f32 %v329_v33  ;;  %v295_v35 = vpop.f32.mrf.mxu2  ;;  %v300_v36 = vpop.f32.mrf.mxu3  ;;  %v374_v55 = vand.u32 2147483647, %v329_v33  ;;  %v376_v56 = vand.u32 2147483648, %v329_v33  ;;  %vm370_vm2 = vweird.f32 %v329_v33 }
  0xb8   : > { %643 = vpow2.f32 %v577_v32  ;;  %v296_v37 = vadd.f32 %v630_v12, %v295_v35  ;;  %v301_v40 = vadd.f32 %v630_v12, %v300_v36  ;;  %vm345_vm4 = vcmp.eq.f32.partialorder %v344_v52, 8.507059e+37 }
  0xb9   : > { %645 = vpow2.f32 %v579_v34  ;;  %v347_v0 = vor.u32 1.1754944e-38, %v346_v53  ;;  %vm375_vm6 = vcmp.eq.f32.partialorder %v374_v55, 8.507059e+37  ;;  %v377_v5 = vor.u32 1.1754944e-38, %v376_v56 }
  0xba   : > { %v636_v38 = vpop.eup %635  ;;  %v581_v39 = vmul.f32 -1.442695, %v296_v37  ;;  %v583_v49 = vmul.f32 -1.442695, %v301_v40 }
  0xbb   : > { %v638_v41 = vpop.eup %637  ;;  %v732_v42 = vadd.f32 1.0, %v636_v38 }
  0xbc   : > { %v640_v43 = vpop.eup %639  ;;  %v734_v44 = vadd.f32 1.0, %v638_v41 }
  0xbd   : > { %v642_v45 = vpop.eup %641  ;;  %v336_v46 = vmul.f32 %v640_v43, %v327_v31  ;;  %647 = vrcp.f32 %v732_v42  ;;  %vm341_vm1 = vweird.f32 %v640_v43  ;;  %v404_v6 = vand.u32 2147483647, %v732_v42 }
  0xbe   : > { %v644_v47 = vpop.eup %643  ;;  %v366_v48 = vmul.f32 %v642_v45, %v329_v33  ;;  %649 = vpow2.f32 %v581_v39  ;;  %vm371_vm3 = vweird.f32 %v642_v45  ;;  %vm342_vm5 = vmor %vm340_vm0, %vm341_vm1  ;;  %v406_v12 = vand.u32 2147483648, %v732_v42 }
  0xbf   : > { %v646_v50 = vpop.eup %645  ;;  %v337_v51 = vsub.f32 1.0, %v336_v46  ;;  %651 = vrcp.f32 %v734_v44  ;;  %v739_v58 = vadd.f32 1.0, %v644_v47  ;;  %vm372_vm7 = vmor %vm370_vm2, %vm371_vm3  ;;  %v434_v13 = vand.u32 2147483647, %v734_v44 }
  0xc0   : > { %v367_v54 = vsub.f32 1.0, %v366_v48  ;;  %v741_v59 = vadd.f32 1.0, %v646_v50  ;;  %653 = vpow2.f32 %v583_v49  ;;  %v436_v14 = vand.u32 2147483648, %v734_v44 }
  0xc1   : > { %v338_v57 = vmul.f32 %v640_v43, %v337_v51  ;;  %655 = vrcp.f32 %v739_v58  ;;  %vm400_vm9 = vweird.f32 %v732_v42  ;;  %vm764_vm10 = vcmp.eq.f32.partialorder %v404_v6, 8.507059e+37 }
  0xc2   : > { %v368_v60 = vmul.f32 %v642_v45, %v367_v54  ;;  %657 = vrcp.f32 %v741_v59  ;;  %vm430_vm11 = vweird.f32 %v734_v44  ;;  %v407_v26 = vor.u32 1.1754944e-38, %v406_v12 }
  0xc3   : > { %v648_v61 = vpop.eup %647  ;;  %v339_v62 = vadd.f32 %v640_v43, %v338_v57  ;;  %vm772_vm14 = vcmp.eq.f32.partialorder %v434_v13, 8.507059e+37  ;;  %v437_v28 = vor.u32 1.1754944e-38, %v436_v14  ;;  %v359_v34 = vand.u32 2147483647, %v739_v58 }
  0xc4   : > { %v650_v63 = vpop.eup %649  ;;  %v369_v1 = vadd.f32 %v642_v45, %v368_v60  ;;  %v396_v2 = vmul.f32 %v648_v61, %v732_v42  ;;  %vm401_vm8 = vweird.f32 %v648_v61  ;;  %v361_v35 = vand.u32 2147483648, %v739_v58 }
  0xc5   : > { %v652_v3 = vpop.eup %651  ;;  %v343_v4 = vsel %vm342_vm5, %v640_v43, %v339_v62  ;;  %v761_v18 = vadd.f32 1.0, %v650_v63  ;;  %vm402_vm13 = vmor %vm400_vm9, %vm401_vm8  ;;  %vm355_vm1 = vweird.f32 %v739_v58  ;;  %v391_v40 = vand.u32 2147483648, %v741_v59 }
  0xc6   : > { %v348_v7 = vsel %vm345_vm4, %v347_v0, %v343_v4  ;;  %v373_v8 = vsel %vm372_vm7, %v642_v45, %v369_v1  ;;  %v397_v9 = vsub.f32 1.0, %v396_v2  ;;  %v426_v10 = vmul.f32 %v652_v3, %v734_v44  ;;  %v654_v15 = vpop.eup %653 }
  0xc7   : > { %455 = vst [vmem:[%s747_s14] sm:$0xff] %v348_v7  ;;  %v378_v11 = vsel %vm375_vm6, %v377_v5, %v373_v8  ;;  %v656_v19 = vpop.eup %655  ;;  %vm431_vm12 = vweird.f32 %v652_v3  ;;  %v770_v24 = vadd.f32 1.0, %v654_v15  ;;  %659 = vrcp.f32 %v761_v18 }
  0xc8   : > { %457 = vst [vmem:[%s747_s14 + $0x10] sm:$0xff] %v378_v11  ;;  %v398_v16 = vmul.f32 %v648_v61, %v397_v9  ;;  %v427_v17 = vsub.f32 1.0, %v426_v10  ;;  %v351_v23 = vmul.f32 %v656_v19, %v739_v58  ;;  %v658_v25 = vpop.eup %657  ;;  %vm432_vm15 = vmor %vm430_vm11, %vm431_vm12  ;;  %vm356_vm0 = vweird.f32 %v656_v19 }
  0xc9   : > { %v381_v32 = vmul.f32 %v658_v25, %v741_v59  ;;  %661 = vrcp.f32 %v770_v24  ;;  %vm386_vm2 = vweird.f32 %v658_v25  ;;  %v389_v43 = vand.u32 2147483647, %v741_v59  ;;  %vm357_vm3 = vmor %vm355_vm1, %vm356_vm0 }
  0xca   : > { %v399_v21 = vadd.f32 %v648_v61, %v398_v16  ;;  %v428_v22 = vmul.f32 %v652_v3, %v427_v17  ;;  %v352_v31 = vsub.f32 1.0, %v351_v23  ;;  %vm360_vm4 = vcmp.eq.f32.partialorder %v359_v34, 8.507059e+37 }
  0xcb   : > { %v382_v38 = vsub.f32 1.0, %v381_v32  ;;  %v362_v45 = vor.u32 1.1754944e-38, %v361_v35  ;;  %vm385_vm5 = vweird.f32 %v741_v59  ;;  %v392_v50 = vor.u32 1.1754944e-38, %v391_v40 }
  0xcc   : > { %v403_v29 = vsel %vm402_vm13, %v648_v61, %v399_v21  ;;  %v429_v30 = vadd.f32 %v652_v3, %v428_v22  ;;  %v353_v37 = vmul.f32 %v656_v19, %v352_v31  ;;  %vm387_vm6 = vmor %vm385_vm5, %vm386_vm2  ;;  %vm390_vm7 = vcmp.eq.f32.partialorder %v389_v43, 8.507059e+37 }
  0xcd   : > { %v408_v33 = vsel %vm764_vm10, %v407_v26, %v403_v29  ;;  %v383_v42 = vmul.f32 %v658_v25, %v382_v38  ;;  %v660_v44 = vpop.eup %659  ;;  %v421_v55 = vand.u32 2147483648, %v761_v18  ;;  %v419_v58 = vand.u32 2147483647, %v761_v18 }
  0xce   : > { %459 = vst [vmem:[%s747_s14 + $0x20] sm:$0xff] %v408_v33  ;;  %v433_v36 = vsel %vm432_vm15, %v652_v3, %v429_v30  ;;  %v354_v41 = vadd.f32 %v656_v19, %v353_v37  ;;  %v411_v48 = vmul.f32 %v660_v44, %v761_v18  ;;  %vm416_vm8 = vweird.f32 %v660_v44 }
  0xcf   : > { %v438_v39 = vsel %vm772_vm14, %v437_v28, %v433_v36  ;;  %v384_v47 = vadd.f32 %v658_v25, %v383_v42  ;;  %v662_v51 = vpop.eup %661  ;;  %vm415_vm9 = vweird.f32 %v761_v18  ;;  %v451_v61 = vand.u32 2147483648, %v770_v24 }
  0xd0   : > { %461 = vst [vmem:[%s747_s14 + $0x30] sm:$0xff] %v438_v39  ;;  %v358_v46 = vsel %vm357_vm3, %v656_v19, %v354_v41  ;;  %v412_v53 = vsub.f32 1.0, %v411_v48  ;;  %v441_v56 = vmul.f32 %v662_v51, %v770_v24  ;;  %vm417_vm10 = vmor %vm415_vm9, %vm416_vm8  ;;  %v422_v62 = vor.u32 1.1754944e-38, %v421_v55 }
  0xd1   : > { %v363_v49 = vsel %vm360_vm4, %v362_v45, %v358_v46  ;;  %v388_v52 = vsel %vm387_vm6, %v658_v25, %v384_v47  ;;  %vm446_vm11 = vweird.f32 %v662_v51  ;;  %v449_v0 = vand.u32 2147483647, %v770_v24 }
  0xd2   : > { %456 = vst [vmem:[%s747_s14 + $0x8] sm:$0xff] %v363_v49  ;;  %v393_v54 = vsel %vm390_vm7, %v392_v50, %v388_v52  ;;  %v413_v57 = vmul.f32 %v660_v44, %v412_v53  ;;  %v442_v59 = vsub.f32 1.0, %v441_v56  ;;  %vm420_vm12 = vcmp.eq.f32.partialorder %v419_v58, 8.507059e+37 }
  0xd3   : > { %458 = vst [vmem:[%s747_s14 + $0x18] sm:$0xff] %v393_v54  ;;  %vm445_vm13 = vweird.f32 %v770_v24  ;;  %v452_v4 = vor.u32 1.1754944e-38, %v451_v61  ;;  %vm450_vm15 = vcmp.eq.f32.partialorder %v449_v0, 8.507059e+37 }
  0xd4   : > { %v414_v60 = vadd.f32 %v660_v44, %v413_v57  ;;  %v443_v63 = vmul.f32 %v662_v51, %v442_v59  ;;  %vm447_vm14 = vmor %vm445_vm13, %vm446_vm11 }
  0xd6   : > { %v418_v1 = vsel %vm417_vm10, %v660_v44, %v414_v60  ;;  %v444_v3 = vadd.f32 %v662_v51, %v443_v63 }
  0xd7   : > { %v423_v2 = vsel %vm420_vm12, %v422_v62, %v418_v1 }
  0xd8   : > { %460 = vst [vmem:[%s747_s14 + $0x28] sm:$0xff] %v423_v2  ;;  %v448_v5 = vsel %vm447_vm14, %v662_v51, %v444_v3 }
  0xd9   : > { %v453_v6 = vsel %vm450_vm15, %v452_v4, %v448_v5 }
  0xda   : > { %462 = vst [vmem:[%s747_s14 + $0x38] sm:$0xff] %v453_v6 }
  0xdb PF: > { %s13_s12 = sadd.s32 1, %s669_s12  }
  0xdc   : > { %p10_p4 = scmp.ge.s32.totalorder %s13_s12, 4  }
  0xde   :  { %12 = sbr.rel (!%p10_p4) target bundleno = 1 (0x1), region = 62 }

// kernel: rrg_fwd.62
= control target key start
LH: loop header
LB: loop body
LE: loop exit
PB: predicated region body
PF: predicated region fallthrough
CT: control target
= control target key end

     0   :  { %s560_s15 = smov 0   ;;  %s621_s0 = inlined_call_operand.vmem [shape: bf16[128,128], index: 0, kind: input, shape index: {}]   ;;  %s622_s1 = inlined_call_operand.vmem [shape: bf16[128,128], index: 1, kind: input, shape index: {}]   ;;  %s623_s2 = inlined_call_operand.vmem [shape: f32[1,128], index: 2, kind: input, shape index: {}]   ;;  %s624_s3 = inlined_call_operand.vmem [shape: f32[1,128], index: 3, kind: input, shape index: {}]   ;;  %s625_s4 = inlined_call_operand.vmem [shape: f32[128,128], index: 4, kind: output, shape index: {}]  }
   0x1 LB: > { %s422_s16 = sadd.s32 4294967295, %s533_s15   ;;  %p426_p0 = scmp.ge.s32.totalorder %s533_s15, 1  ;;  %s533_s15 = sphi %s560_s15, %s14_s15  }
   0x2   : > { %p163_p1 = scmp.lt.s32.totalorder %s533_s15, 3 }
   0x4   : > { %p164_p2 = pnand %p426_p0, %p163_p1 }
   0x5   : > { %s427_s25 = sshll.u32 (!%p164_p2), %s422_s16, 3 }
   0x6   : > { %167 = sbr.rel (%p164_p2) target bundleno = 191 (0xbf), region = 36  ;;  %p190_p3 = scmp.lt.s32.totalorder (!%p164_p2), %s427_s25, 15 }
   0xb   : > { %v492_v0 = vld [vmem:[%s622_s1 + $0x38] sm:$0xff]  ;;  %v491_v1 = vld [vmem:[%s622_s1 + $0x30] sm:$0xff]  ;;  %v490_v2 = vld [vmem:[%s622_s1 + $0x28] sm:$0xff]  ;;  %s627_s25 = smov (!%p190_p3, %s427_s25), 15 }
   0xc   : > { %301 = vmatpush.bf16.msra.mxu0 %v492_v0  ;;  %493 = vmatpush.bf16.msra.mxu1 %v492_v0  ;;  %v489_v3 = vld [vmem:[%s622_s1 + $0x20] sm:$0xff]  ;;  %v488_v4 = vld [vmem:[%s622_s1 + $0x18] sm:$0xff]  ;;  %v487_v5 = vld [vmem:[%s622_s1 + $0x10] sm:$0xff]  ;;  %s428_s6 = sshll.u32 %s627_s25, 2  ;;  %s430_s17 = sshll.u32 %s627_s25, 3 }
   0xd   : > { %494 = vmatpush.bf16.msra.mxu2 %v492_v0  ;;  %495 = vmatpush.bf16.msra.mxu3 %v492_v0  ;;  %v486_v6 = vld [vmem:[%s622_s1 + $0x8] sm:$0xff]  ;;  %v485_v7 = vld [vmem:[%s622_s1] sm:$0xff]  ;;  %s193_s11 = scalar_lea.vmem %s621_s0, %s428_s6  ;;  %s608_s20 = scalar_lea.vmem %s625_s4, %s430_s17 }
   0xe   : > { %v481_v8 = vld [vmem:[%s193_s11] sm:$0xff]  ;;  %v482_v9 = vld [vmem:[%s193_s11 + $0x8] sm:$0xff]  ;;  %v483_v10 = vld [vmem:[%s193_s11 + $0x10] sm:$0xff] }
   0xf   : > { %v484_v11 = vld [vmem:[%s193_s11 + $0x18] sm:$0xff]  ;;  %v525_v12 = vld [vmem:[%s623_s2] ss:$0 sm:$0xff] }
  0x10   : > { %302 = vmatpush.bf16.msra.mxu0 %v491_v1  ;;  %496 = vmatpush.bf16.msra.mxu1 %v491_v1  ;;  %v526_v13 = vld [vmem:[%s624_s3] ss:$0 sm:$0xff] }
  0x11   : > { %497 = vmatpush.bf16.msra.mxu2 %v491_v1  ;;  %498 = vmatpush.bf16.msra.mxu3 %v491_v1 }
  0x14   : > { %303 = vmatpush.bf16.msra.mxu0 %v490_v2  ;;  %499 = vmatpush.bf16.msra.mxu1 %v490_v2 }
  0x15   : > { %500 = vmatpush.bf16.msra.mxu2 %v490_v2  ;;  %501 = vmatpush.bf16.msra.mxu3 %v490_v2 }
  0x18   : > { %304 = vmatpush.bf16.msra.mxu0 %v489_v3  ;;  %502 = vmatpush.bf16.msra.mxu1 %v489_v3 }
  0x19   : > { %503 = vmatpush.bf16.msra.mxu2 %v489_v3  ;;  %504 = vmatpush.bf16.msra.mxu3 %v489_v3 }
  0x1c   : > { %305 = vmatpush.bf16.msra.mxu0 %v488_v4  ;;  %505 = vmatpush.bf16.msra.mxu1 %v488_v4 }
  0x1d   : > { %506 = vmatpush.bf16.msra.mxu2 %v488_v4  ;;  %507 = vmatpush.bf16.msra.mxu3 %v488_v4 }
  0x20   : > { %306 = vmatpush.bf16.msra.mxu0 %v487_v5  ;;  %508 = vmatpush.bf16.msra.mxu1 %v487_v5 }
  0x21   : > { %509 = vmatpush.bf16.msra.mxu2 %v487_v5  ;;  %510 = vmatpush.bf16.msra.mxu3 %v487_v5 }
  0x24   : > { %307 = vmatpush.bf16.msra.mxu0 %v486_v6  ;;  %511 = vmatpush.bf16.msra.mxu1 %v486_v6 }
  0x25   : > { %512 = vmatpush.bf16.msra.mxu2 %v486_v6  ;;  %513 = vmatpush.bf16.msra.mxu3 %v486_v6 }
  0x28   : > { %308 = vmatpush.bf16.msra.mxu0 %v485_v7  ;;  %514 = vmatpush.bf16.msra.mxu1 %v485_v7 }
  0x29   : > { %515 = vmatpush.bf16.msra.mxu2 %v485_v7  ;;  %516 = vmatpush.bf16.msra.mxu3 %v485_v7 }
  0x2b   : > { %309 = vmatmul.bf16.vlgmr.msra.gmra.mxu0 %v481_v8  ;;  %314 = vmatmul.bf16.vlgmr.msra.gmra.mxu1 %v482_v9 }
  0x2c   : > { %319 = vmatmul.bf16.vlgmr.msra.gmra.mxu2 %v483_v10  ;;  %324 = vmatmul.bf16.vlgmr.msra.gmra.mxu3 %v484_v11 }
  0xa8   : > { %v310_v14 = vpop.f32.mrf.mxu0  ;;  %v315_v15 = vpop.f32.mrf.mxu1 }
  0xa9   : > { %v311_v16 = vadd.f32 %v525_v12, %v310_v14  ;;  %v316_v17 = vadd.f32 %v525_v12, %v315_v15 }
  0xab   : > { %vm330_vm0 = vcmp.ge.f32.partialorder %v311_v16, 0.0  ;;  %v342_v18 = vmul.f32 %v526_v13, %v311_v16  ;;  %vm332_vm1 = vcmp.ge.f32.partialorder %v316_v17, 0.0  ;;  %v344_v19 = vmul.f32 %v526_v13, %v316_v17 }
  0xad   : > { %v350_v20 = vsel %vm330_vm0, %v311_v16, %v342_v18  ;;  %v352_v21 = vsel %vm332_vm1, %v316_v17, %v344_v19 }
  0xae   : > { %358 = vst [vmem:[%s608_s20] sm:$0xff] %v350_v20 }
  0xaf   : > { %360 = vst [vmem:[%s608_s20 + $0x10] sm:$0xff] %v352_v21  ;;  %v320_v22 = vpop.f32.mrf.mxu2  ;;  %v325_v23 = vpop.f32.mrf.mxu3 }
  0xb0   : > { %v321_v24 = vadd.f32 %v525_v12, %v320_v22  ;;  %v326_v25 = vadd.f32 %v525_v12, %v325_v23  ;;  %v312_v26 = vpop.f32.mrf.mxu0  ;;  %v317_v27 = vpop.f32.mrf.mxu1 }
  0xb1   : > { %v313_v28 = vadd.f32 %v525_v12, %v312_v26  ;;  %v318_v29 = vadd.f32 %v525_v12, %v317_v27 }
  0xb2   : > { %vm334_vm2 = vcmp.ge.f32.partialorder %v321_v24, 0.0  ;;  %v346_v30 = vmul.f32 %v526_v13, %v321_v24  ;;  %vm336_vm3 = vcmp.ge.f32.partialorder %v326_v25, 0.0  ;;  %v348_v31 = vmul.f32 %v526_v13, %v326_v25 }
  0xb3   : > { %vm331_vm4 = vcmp.ge.f32.partialorder %v313_v28, 0.0  ;;  %v343_v32 = vmul.f32 %v526_v13, %v313_v28  ;;  %vm333_vm5 = vcmp.ge.f32.partialorder %v318_v29, 0.0  ;;  %v345_v33 = vmul.f32 %v526_v13, %v318_v29 }
  0xb4   : > { %v354_v34 = vsel %vm334_vm2, %v321_v24, %v346_v30  ;;  %v356_v35 = vsel %vm336_vm3, %v326_v25, %v348_v31 }
  0xb5   : > { %362 = vst [vmem:[%s608_s20 + $0x20] sm:$0xff] %v354_v34  ;;  %v351_v36 = vsel %vm331_vm4, %v313_v28, %v343_v32  ;;  %v353_v37 = vsel %vm333_vm5, %v318_v29, %v345_v33 }
  0xb6   : > { %364 = vst [vmem:[%s608_s20 + $0x30] sm:$0xff] %v356_v35 }
  0xb7   : > { %359 = vst [vmem:[%s608_s20 + $0x8] sm:$0xff] %v351_v36  ;;  %v322_v38 = vpop.f32.mrf.mxu2  ;;  %v327_v39 = vpop.f32.mrf.mxu3 }
  0xb8   : > { %361 = vst [vmem:[%s608_s20 + $0x18] sm:$0xff] %v353_v37  ;;  %v323_v40 = vadd.f32 %v525_v12, %v322_v38  ;;  %v328_v41 = vadd.f32 %v525_v12, %v327_v39 }
  0xba   : > { %vm335_vm6 = vcmp.ge.f32.partialorder %v323_v40, 0.0  ;;  %v347_v42 = vmul.f32 %v526_v13, %v323_v40  ;;  %vm337_vm7 = vcmp.ge.f32.partialorder %v328_v41, 0.0  ;;  %v349_v43 = vmul.f32 %v526_v13, %v328_v41 }
  0xbc   : > { %v355_v44 = vsel %vm335_vm6, %v323_v40, %v347_v42  ;;  %v357_v45 = vsel %vm337_vm7, %v328_v41, %v349_v43 }
  0xbd   : > { %363 = vst [vmem:[%s608_s20 + $0x28] sm:$0xff] %v355_v44 }
  0xbe   : > { %365 = vst [vmem:[%s608_s20 + $0x38] sm:$0xff] %v357_v45 }
  0xbf PF: > { %s14_s15 = sadd.s32 1, %s533_s15  }
  0xc0   : > { %p11_p4 = scmp.ge.s32.totalorder %s14_s15, 4  }
  0xc2   :  { %13 = sbr.rel (!%p11_p4) target bundleno = 1 (0x1), region = 66 }

</bundles_post_ra>
